<compile_context>
chip_gen: v7x
topology: tpu7x:2x2x1
jax: 0.10.0
libtpu: 0.0.40
codegen_flags: <defaults>
</compile_context>

<pallas_src>
import jax
import jax.numpy as jnp
from jax.experimental import pallas as pl
from jax.experimental.pallas import tpu as pltpu

VOCAB = 5000
EMB = 64
SEQ = 600
KSIZE = 5
CONV_OUT = 256
L_OUT = SEQ - KSIZE + 1            # 596
FLAT = CONV_OUT * L_OUT            # 152576
H1 = 128
NCLASS = 10

# padded / tiled geometry
L_TILE = 128                       # conv output rows per grid step (32 f32 vregs acc)
L_PAD = 640                        # 5 * 128; FLAT_PAD = 640*256 = 163840 = 20*8192
N_LT = L_PAD // L_TILE             # 5
SEQ_PAD = L_PAD + 8                # 648 >= L_PAD + KSIZE - 1, multiple of 8
FLAT_PAD = L_PAD * CONV_OUT        # 163840
TK = 8192                          # MLP K-reduction tile (bf16 W1 tile = 2 MiB)
NSPLIT = 2                         # K split across the "parallel" axis (v7x megacore)
NKP = FLAT_PAD // (TK * NSPLIT)    # 10 reduction steps per split


# ---------------- Conv1d kernel: grid (B, L tiles), time-major / channels-last ----------------
def conv1d_kernel(x_ref, w_ref, b_ref, o_ref):
    # x_ref: (1, SEQ_PAD, EMB) f32 (full zero-padded sequence of this batch element)
    # w_ref: (KSIZE, EMB, CONV_OUT) f32, b_ref: (1, CONV_OUT) f32
    # o_ref: (1, L_TILE, CONV_OUT) bf16
    lt = pl.program_id(1)
    base = pl.multiple_of(lt * L_TILE, L_TILE)
    xw = x_ref[0, pl.ds(base, L_TILE + 8), :]              # (136, 64) aligned window
    acc = jnp.zeros((L_TILE, CONV_OUT), jnp.float32)
    for k in range(KSIZE):                                 # 5 shifted (128,64)@(64,256) MXU matmuls
        acc = acc + jnp.dot(xw[k:k + L_TILE, :], w_ref[k],
                            preferred_element_type=jnp.float32)
    o_ref[0] = (acc + b_ref[...]).astype(o_ref.dtype)      # bias broadcast over time, cast to bf16


def conv1d(x_emb, w_conv, b_conv):
    B = x_emb.shape[0]
    return pl.pallas_call(
        conv1d_kernel,
        out_shape=jax.ShapeDtypeStruct((B, L_PAD, CONV_OUT), jnp.bfloat16),
        grid_spec=pltpu.PrefetchScalarGridSpec(
            num_scalar_prefetch=0,
            grid=(B, N_LT),
            in_specs=[
                pl.BlockSpec((1, SEQ_PAD, EMB), lambda b, lt: (b, 0, 0)),
                pl.BlockSpec((KSIZE, EMB, CONV_OUT), lambda b, lt: (0, 0, 0)),
                pl.BlockSpec((1, CONV_OUT), lambda b, lt: (0, 0)),
            ],
            out_specs=pl.BlockSpec((1, L_TILE, CONV_OUT), lambda b, lt: (b, lt, 0)),
        ),
        compiler_params=pltpu.CompilerParams(
            dimension_semantics=("parallel", "parallel")),
    )(x_emb, w_conv, b_conv)


# ---------------- MLP part 1: x @ W1, K split across a parallel axis ----------------
def mlp_partial_kernel(xf_ref, w1_ref, o_ref, acc_ref):
    k = pl.program_id(1)

    @pl.when(k == 0)
    def _():
        acc_ref[...] = jnp.zeros_like(acc_ref)

    # bf16 x bf16 -> f32 accumulation on the MXU
    acc_ref[...] += jnp.dot(xf_ref[...], w1_ref[...],
                            preferred_element_type=jnp.float32)

    @pl.when(k == pl.num_programs(1) - 1)
    def _():
        o_ref[0] = acc_ref[...]


def mlp_partial(x_flat, w1):
    B = x_flat.shape[0]
    return pl.pallas_call(
        mlp_partial_kernel,
        out_shape=jax.ShapeDtypeStruct((NSPLIT, B, H1), jnp.float32),
        grid_spec=pltpu.PrefetchScalarGridSpec(
            num_scalar_prefetch=0,
            grid=(NSPLIT, NKP),
            in_specs=[
                pl.BlockSpec((B, TK), lambda s, k: (0, s * NKP + k)),
                pl.BlockSpec((TK, H1), lambda s, k: (s * NKP + k, 0)),
            ],
            out_specs=pl.BlockSpec((1, B, H1), lambda s, k: (s, 0, 0)),
            scratch_shapes=[pltpu.VMEM((B, H1), jnp.float32)],
        ),
        compiler_params=pltpu.CompilerParams(
            dimension_semantics=("parallel", "arbitrary"),
            vmem_limit_bytes=32 * 1024 * 1024),
    )(x_flat, w1)


# ---------------- MLP part 2: combine partials, +b1, ReLU, Linear2, Softmax ----------------
def mlp_head_kernel(part_ref, b1_ref, w2_ref, b2_ref, o_ref):
    h = part_ref[0] + part_ref[1] + b1_ref[...]            # combine K-split partial sums + bias
    h = jnp.maximum(h, 0.0)                                # ReLU
    logits = jnp.dot(h, w2_ref[...],
                     preferred_element_type=jnp.float32) + b2_ref[...]
    m = jnp.max(logits, axis=-1, keepdims=True)            # Softmax (dim=1)
    e = jnp.exp(logits - m)
    o_ref[...] = e / jnp.sum(e, axis=-1, keepdims=True)


def mlp_head(partials, b1, w2, b2):
    B = partials.shape[1]
    return pl.pallas_call(
        mlp_head_kernel,
        out_shape=jax.ShapeDtypeStruct((B, NCLASS), jnp.float32),
        grid_spec=pltpu.PrefetchScalarGridSpec(
            num_scalar_prefetch=0,
            grid=(1,),
            in_specs=[
                pl.BlockSpec((NSPLIT, B, H1), lambda i: (0, 0, 0)),
                pl.BlockSpec((1, H1), lambda i: (0, 0)),
                pl.BlockSpec((H1, NCLASS), lambda i: (0, 0)),
                pl.BlockSpec((1, NCLASS), lambda i: (0, 0)),
            ],
            out_specs=pl.BlockSpec((B, NCLASS), lambda i: (0, 0)),
        ),
    )(partials, b1, w2, b2)


# ---------------- Full forward ----------------
def textcnn_forward(tokens, params):
    emb, w_conv, b_conv, w1, b1, w2, b2 = params
    B = tokens.shape[0]
    # embedding lookup (gather) — glue in plain JAX
    x = jnp.take(emb, tokens, axis=0)                         # (B, 600, 64) f32
    x = jnp.pad(x, ((0, 0), (0, SEQ_PAD - SEQ), (0, 0)))      # zero pad time axis -> (B, 648, 64)
    y = conv1d(x, w_conv, b_conv)                             # (B, 640, 256) bf16, time-major
    # time-major flatten is a FREE reshape (W1 rows were permuted/padded at init to match
    # PyTorch's channel-major flatten idx = c*596 + t; padded rows of W1 are zero).
    x_flat = y.reshape(B, FLAT_PAD)                           # (B, 163840) bf16
    partials = mlp_partial(x_flat, w1)                        # (2, B, 128) f32
    return mlp_head(partials, b1, w2, b2)                     # (B, 10) f32


def init_params(key):
    ks = jax.random.split(key, 7)
    emb = jax.random.normal(ks[0], (VOCAB, EMB), jnp.float32) * 0.02

    # PyTorch Conv1d weight layout (C_out, C_in, K) -> kernel layout (K, C_in, C_out)
    w_conv_pt = jax.random.normal(ks[1], (CONV_OUT, EMB, KSIZE), jnp.float32) * 0.05
    w_conv = jnp.transpose(w_conv_pt, (2, 1, 0))
    b_conv = (jax.random.normal(ks[2], (CONV_OUT,), jnp.float32) * 0.05).reshape(1, CONV_OUT)

    # PyTorch Linear weight layout (H1, FLAT); input index is channel-major: c*596 + t.
    w1_pt = jax.random.normal(ks[3], (H1, FLAT), jnp.float32) * 0.003
    # One-time row permutation to the time-major flatten used by the kernels
    # (W1_tm[t*256 + c] = W1_pt.T[c*596 + t]) + zero padding of the time axis, cast to bf16.
    w1_tm = w1_pt.T.reshape(CONV_OUT, L_OUT, H1).transpose(1, 0, 2)   # (L_OUT, C, H1)
    w1_tm = jnp.pad(w1_tm, ((0, L_PAD - L_OUT), (0, 0), (0, 0)))      # zero rows for padded t
    w1 = w1_tm.reshape(FLAT_PAD, H1).astype(jnp.bfloat16)

    b1 = (jax.random.normal(ks[4], (H1,), jnp.float32) * 0.01).reshape(1, H1)
    w2 = jnp.transpose(jax.random.normal(ks[5], (NCLASS, H1), jnp.float32)) * 0.1   # (H1, 10)
    b2 = (jax.random.normal(ks[6], (NCLASS,), jnp.float32) * 0.01).reshape(1, NCLASS)
    return (emb, w_conv, b_conv, w1, b1, w2, b2)


if __name__ == "__main__":
    key = jax.random.PRNGKey(0)
    pkey, xkey = jax.random.split(key)
    params = init_params(pkey)

    B = 2
    tokens = jax.random.randint(xkey, (B, SEQ), 0, VOCAB, dtype=jnp.int32)

    out = jax.jit(textcnn_forward)(tokens, params)
    out = jax.block_until_ready(out)

    assert out.shape == (B, NCLASS)
    assert out.dtype == jnp.float32
    # softmax rows must sum to 1
    assert bool(jnp.allclose(jnp.sum(out, axis=-1), 1.0, atol=1e-5))
    print("KERNEL_OK")
</pallas_src>

<mosaic_0001>
module attributes {stable_mosaic.version = 11 : i64} {
  func.func private @main(%arg0: i32) attributes {dimension_semantics = [#tpu.dimension_semantics<core_parallel>], iteration_bounds = array<i64: 2>, tpu.core_type = #tpu.core_type<sc_scalar_subcore>, window_params = []} {
    return
  }
}

module attributes {stable_mosaic.version = 11 : i64} {
  func.func private @main(%arg0: i32) attributes {dimension_semantics = [#tpu.dimension_semantics<core_parallel>], iteration_bounds = array<i64: 2>, tpu.core_type = #tpu.core_type<sc_scalar_subcore>, window_params = []} {
    return
  }
}

module attributes {stable_mosaic.version = 11 : i64} {
  func.func @conv1d_kernel(%arg0: i32, %arg1: i32, %arg2: memref<1x648x64xf32, #tpu.memory_space<vmem>>, %arg3: memref<5x64x256xf32, #tpu.memory_space<vmem>>, %arg4: memref<1x256xf32, #tpu.memory_space<vmem>>, %arg5: memref<1x128x256xbf16, #tpu.memory_space<vmem>>) attributes {dimension_semantics = [#tpu.dimension_semantics<parallel>, #tpu.dimension_semantics<parallel>], iteration_bounds = array<i64: 2, 5>, scalar_prefetch = 0 : i64, scratch_operands = 0 : i64, tpu.core_type = #tpu.core_type<tc>, window_params = [{transform_indices = @transform_0, window_bounds = array<i64: 1, 648, 64>}, {pipeline_mode = #tpu.pipeline_mode<synchronous>, transform_indices = @transform_1, window_bounds = array<i64: 5, 64, 256>}, {pipeline_mode = #tpu.pipeline_mode<synchronous>, transform_indices = @transform_2, window_bounds = array<i64: 1, 256>}, {transform_indices = @transform_3, window_bounds = array<i64: 1, 128, 256>}]} {
    %c128_i32 = arith.constant 128 : i32
    %0 = arith.muli %arg1, %c128_i32 : i32
    %1 = tpu.assume_multiple %0, 128 : i32
    %c0 = arith.constant 0 : index
    %2 = arith.index_cast %1 : i32 to index
    %c0_0 = arith.constant 0 : index
    %3 = vector.load %arg2[%c0, %2, %c0_0] : memref<1x648x64xf32, #tpu.memory_space<vmem>>, vector<1x136x64xf32>
    %4 = vector.shape_cast %3 : vector<1x136x64xf32> to vector<136x64xf32>
    %cst = arith.constant 0.000000e+00 : f32
    %5 = vector.broadcast %cst : f32 to vector<128x256xf32>
    %6 = vector.extract_strided_slice %4 {offsets = [0, 0], sizes = [128, 64], strides = [1, 1]} : vector<136x64xf32> to vector<128x64xf32>
    %c0_1 = arith.constant 0 : index
    %c0_2 = arith.constant 0 : index
    %c0_3 = arith.constant 0 : index
    %7 = vector.load %arg3[%c0_1, %c0_2, %c0_3] : memref<5x64x256xf32, #tpu.memory_space<vmem>>, vector<1x64x256xf32>
    %8 = vector.shape_cast %7 : vector<1x64x256xf32> to vector<64x256xf32>
    %cst_4 = arith.constant dense<0.000000e+00> : vector<128x256xf32>
    %9 = tpu.matmul %6, %8, %cst_4 {dimension_numbers = #tpu.dot_dimension_numbers<[1], [0], [0], [1], [0, 0, 1, 1], [], []>} : vector<128x64xf32>, vector<64x256xf32>, vector<128x256xf32> -> vector<128x256xf32>
    %10 = arith.addf %5, %9 : vector<128x256xf32>
    %11 = vector.extract_strided_slice %4 {offsets = [1, 0], sizes = [128, 64], strides = [1, 1]} : vector<136x64xf32> to vector<128x64xf32>
    %c1 = arith.constant 1 : index
    %c0_5 = arith.constant 0 : index
    %c0_6 = arith.constant 0 : index
    %12 = vector.load %arg3[%c1, %c0_5, %c0_6] : memref<5x64x256xf32, #tpu.memory_space<vmem>>, vector<1x64x256xf32>
    %13 = vector.shape_cast %12 : vector<1x64x256xf32> to vector<64x256xf32>
    %cst_7 = arith.constant dense<0.000000e+00> : vector<128x256xf32>
    %14 = tpu.matmul %11, %13, %cst_7 {dimension_numbers = #tpu.dot_dimension_numbers<[1], [0], [0], [1], [0, 0, 1, 1], [], []>} : vector<128x64xf32>, vector<64x256xf32>, vector<128x256xf32> -> vector<128x256xf32>
    %15 = arith.addf %10, %14 : vector<128x256xf32>
    %16 = vector.extract_strided_slice %4 {offsets = [2, 0], sizes = [128, 64], strides = [1, 1]} : vector<136x64xf32> to vector<128x64xf32>
    %c2 = arith.constant 2 : index
    %c0_8 = arith.constant 0 : index
    %c0_9 = arith.constant 0 : index
    %17 = vector.load %arg3[%c2, %c0_8, %c0_9] : memref<5x64x256xf32, #tpu.memory_space<vmem>>, vector<1x64x256xf32>
    %18 = vector.shape_cast %17 : vector<1x64x256xf32> to vector<64x256xf32>
    %cst_10 = arith.constant dense<0.000000e+00> : vector<128x256xf32>
    %19 = tpu.matmul %16, %18, %cst_10 {dimension_numbers = #tpu.dot_dimension_numbers<[1], [0], [0], [1], [0, 0, 1, 1], [], []>} : vector<128x64xf32>, vector<64x256xf32>, vector<128x256xf32> -> vector<128x256xf32>
    %20 = arith.addf %15, %19 : vector<128x256xf32>
    %21 = vector.extract_strided_slice %4 {offsets = [3, 0], sizes = [128, 64], strides = [1, 1]} : vector<136x64xf32> to vector<128x64xf32>
    %c3 = arith.constant 3 : index
    %c0_11 = arith.constant 0 : index
    %c0_12 = arith.constant 0 : index
    %22 = vector.load %arg3[%c3, %c0_11, %c0_12] : memref<5x64x256xf32, #tpu.memory_space<vmem>>, vector<1x64x256xf32>
    %23 = vector.shape_cast %22 : vector<1x64x256xf32> to vector<64x256xf32>
    %cst_13 = arith.constant dense<0.000000e+00> : vector<128x256xf32>
    %24 = tpu.matmul %21, %23, %cst_13 {dimension_numbers = #tpu.dot_dimension_numbers<[1], [0], [0], [1], [0, 0, 1, 1], [], []>} : vector<128x64xf32>, vector<64x256xf32>, vector<128x256xf32> -> vector<128x256xf32>
    %25 = arith.addf %20, %24 : vector<128x256xf32>
    %26 = vector.extract_strided_slice %4 {offsets = [4, 0], sizes = [128, 64], strides = [1, 1]} : vector<136x64xf32> to vector<128x64xf32>
    %c4 = arith.constant 4 : index
    %c0_14 = arith.constant 0 : index
    %c0_15 = arith.constant 0 : index
    %27 = vector.load %arg3[%c4, %c0_14, %c0_15] : memref<5x64x256xf32, #tpu.memory_space<vmem>>, vector<1x64x256xf32>
    %28 = vector.shape_cast %27 : vector<1x64x256xf32> to vector<64x256xf32>
    %cst_16 = arith.constant dense<0.000000e+00> : vector<128x256xf32>
    %29 = tpu.matmul %26, %28, %cst_16 {dimension_numbers = #tpu.dot_dimension_numbers<[1], [0], [0], [1], [0, 0, 1, 1], [], []>} : vector<128x64xf32>, vector<64x256xf32>, vector<128x256xf32> -> vector<128x256xf32>
    %30 = arith.addf %25, %29 : vector<128x256xf32>
    %c0_17 = arith.constant 0 : index
    %c0_18 = arith.constant 0 : index
    %31 = vector.load %arg4[%c0_17, %c0_18] : memref<1x256xf32, #tpu.memory_space<vmem>>, vector<1x256xf32>
    %32 = vector.broadcast %31 : vector<1x256xf32> to vector<128x256xf32>
    %33 = arith.addf %30, %32 : vector<128x256xf32>
    %34 = arith.truncf %33 : vector<128x256xf32> to vector<128x256xbf16>
    %c0_19 = arith.constant 0 : index
    %c0_20 = arith.constant 0 : index
    %c0_21 = arith.constant 0 : index
    %35 = vector.load %arg5[%c0_19, %c0_20, %c0_21] : memref<1x128x256xbf16, #tpu.memory_space<vmem>>, vector<1x128x256xbf16>
    %36 = vector.shape_cast %35 : vector<1x128x256xbf16> to vector<128x256xbf16>
    %37 = vector.shape_cast %34 : vector<128x256xbf16> to vector<1x128x256xbf16>
    tpu.vector_store %arg5[%c0_19, %c0_20, %c0_21], %37 {strides = array<i32>} : memref<1x128x256xbf16, #tpu.memory_space<vmem>>, vector<1x128x256xbf16>,
    return
  }
  func.func @transform_0(%arg0: i32, %arg1: i32) -> (i32, i32, i32) {
    %c0_i32 = arith.constant 0 : i32
    %c0_i32_0 = arith.constant 0 : i32
    %c0_i32_1 = arith.constant 0 : i32
    return %arg0, %c0_i32, %c0_i32_0 : i32, i32, i32
  }
  func.func @transform_1(%arg0: i32, %arg1: i32) -> (i32, i32, i32) {
    %c0_i32 = arith.constant 0 : i32
    %c0_i32_0 = arith.constant 0 : i32
    %c0_i32_1 = arith.constant 0 : i32
    %c0_i32_2 = arith.constant 0 : i32
    return %c0_i32, %c0_i32_0, %c0_i32_1 : i32, i32, i32
  }
  func.func @transform_2(%arg0: i32, %arg1: i32) -> (i32, i32) {
    %c0_i32 = arith.constant 0 : i32
    %c0_i32_0 = arith.constant 0 : i32
    %c0_i32_1 = arith.constant 0 : i32
    return %c0_i32, %c0_i32_0 : i32, i32
  }
  func.func @transform_3(%arg0: i32, %arg1: i32) -> (i32, i32, i32) {
    %c0_i32 = arith.constant 0 : i32
    %c0_i32_0 = arith.constant 0 : i32
    return %arg0, %arg1, %c0_i32 : i32, i32, i32
  }
}

module attributes {stable_mosaic.version = 11 : i64} {
  func.func @mlp_partial_kernel(%arg0: i32, %arg1: i32, %arg2: memref<2x8192xbf16, #tpu.memory_space<vmem>>, %arg3: memref<8192x128xbf16, #tpu.memory_space<vmem>>, %arg4: memref<1x2x128xf32, #tpu.memory_space<vmem>>, %arg5: memref<2x128xf32, #tpu.memory_space<vmem>>) attributes {dimension_semantics = [#tpu.dimension_semantics<parallel>, #tpu.dimension_semantics<arbitrary>], iteration_bounds = array<i64: 2, 10>, scalar_prefetch = 0 : i64, scratch_operands = 1 : i64, tpu.core_type = #tpu.core_type<tc>, window_params = [{transform_indices = @transform_0, window_bounds = array<i64: 2, 8192>}, {transform_indices = @transform_1, window_bounds = array<i64: 8192, 128>}, {transform_indices = @transform_2, window_bounds = array<i64: 1, 2, 128>}]} {
    %c0_i32 = arith.constant 0 : i32
    %0 = arith.cmpi eq, %arg1, %c0_i32 : i32
    %1 = arith.extui %0 : i1 to i32
    %c0_i32_0 = arith.constant 0 : i32
    %2 = arith.cmpi ne, %1, %c0_i32_0 : i32
    scf.if %2 {
      %cst_9 = arith.constant 0.000000e+00 : f32
      %12 = vector.broadcast %cst_9 : f32 to vector<2x128xf32>
      %c0_10 = arith.constant 0 : index
      %c0_11 = arith.constant 0 : index
      %13 = vector.load %arg5[%c0_10, %c0_11] : memref<2x128xf32, #tpu.memory_space<vmem>>, vector<2x128xf32>
      tpu.vector_store %arg5[%c0_10, %c0_11], %12 {strides = array<i32>} : memref<2x128xf32, #tpu.memory_space<vmem>>, vector<2x128xf32>,
    } else {
    }
    %c0 = arith.constant 0 : index
    %c0_1 = arith.constant 0 : index
    %3 = vector.load %arg5[%c0, %c0_1] : memref<2x128xf32, #tpu.memory_space<vmem>>, vector<2x128xf32>
    %c0_2 = arith.constant 0 : index
    %c0_3 = arith.constant 0 : index
    %4 = vector.load %arg2[%c0_2, %c0_3] : memref<2x8192xbf16, #tpu.memory_space<vmem>>, vector<2x8192xbf16>
    %c0_4 = arith.constant 0 : index
    %c0_5 = arith.constant 0 : index
    %5 = vector.load %arg3[%c0_4, %c0_5] : memref<8192x128xbf16, #tpu.memory_space<vmem>>, vector<8192x128xbf16>
    %cst = arith.constant dense<0.000000e+00> : vector<2x128xf32>
    %6 = tpu.matmul %4, %5, %cst {dimension_numbers = #tpu.dot_dimension_numbers<[1], [0], [0], [1], [0, 0, 1, 1], [], []>} : vector<2x8192xbf16>, vector<8192x128xbf16>, vector<2x128xf32> -> vector<2x128xf32>
    %7 = arith.addf %3, %6 : vector<2x128xf32>
    %c0_6 = arith.constant 0 : index
    %c0_7 = arith.constant 0 : index
    %8 = vector.load %arg5[%c0_6, %c0_7] : memref<2x128xf32, #tpu.memory_space<vmem>>, vector<2x128xf32>
    tpu.vector_store %arg5[%c0_6, %c0_7], %7 {strides = array<i32>} : memref<2x128xf32, #tpu.memory_space<vmem>>, vector<2x128xf32>,
    %c9_i32 = arith.constant 9 : i32
    %9 = arith.cmpi eq, %arg1, %c9_i32 : i32
    %10 = arith.extui %9 : i1 to i32
    %c0_i32_8 = arith.constant 0 : i32
    %11 = arith.cmpi ne, %10, %c0_i32_8 : i32
    scf.if %11 {
      %c0_9 = arith.constant 0 : index
      %c0_10 = arith.constant 0 : index
      %12 = vector.load %arg5[%c0_9, %c0_10] : memref<2x128xf32, #tpu.memory_space<vmem>>, vector<2x128xf32>
      %c0_11 = arith.constant 0 : index
      %c0_12 = arith.constant 0 : index
      %c0_13 = arith.constant 0 : index
      %13 = vector.load %arg4[%c0_11, %c0_12, %c0_13] : memref<1x2x128xf32, #tpu.memory_space<vmem>>, vector<1x2x128xf32>
      %14 = vector.shape_cast %13 : vector<1x2x128xf32> to vector<2x128xf32>
      %15 = vector.shape_cast %12 : vector<2x128xf32> to vector<1x2x128xf32>
      tpu.vector_store %arg4[%c0_11, %c0_12, %c0_13], %15 {strides = array<i32>} : memref<1x2x128xf32, #tpu.memory_space<vmem>>, vector<1x2x128xf32>,
    } else {
    }
    return
  }
  func.func @transform_0(%arg0: i32, %arg1: i32) -> (i32, i32) {
    %c10_i32 = arith.constant 10 : i32
    %0 = arith.muli %arg0, %c10_i32 : i32
    %1 = arith.addi %0, %arg1 : i32
    %c0_i32 = arith.constant 0 : i32
    %c0_i32_0 = arith.constant 0 : i32
    return %c0_i32, %1 : i32, i32
  }
  func.func @transform_1(%arg0: i32, %arg1: i32) -> (i32, i32) {
    %c10_i32 = arith.constant 10 : i32
    %0 = arith.muli %arg0, %c10_i32 : i32
    %1 = arith.addi %0, %arg1 : i32
    %c0_i32 = arith.constant 0 : i32
    %c0_i32_0 = arith.constant 0 : i32
    return %1, %c0_i32 : i32, i32
  }
  func.func @transform_2(%arg0: i32, %arg1: i32) -> (i32, i32, i32) {
    %c0_i32 = arith.constant 0 : i32
    %c0_i32_0 = arith.constant 0 : i32
    %c0_i32_1 = arith.constant 0 : i32
    return %arg0, %c0_i32, %c0_i32_0 : i32, i32, i32
  }
}

module attributes {stable_mosaic.version = 11 : i64} {
  func.func @mlp_head_kernel(%arg0: i32, %arg1: memref<2x2x128xf32, #tpu.memory_space<vmem>>, %arg2: memref<1x128xf32, #tpu.memory_space<vmem>>, %arg3: memref<128x10xf32, #tpu.memory_space<vmem>>, %arg4: memref<1x10xf32, #tpu.memory_space<vmem>>, %arg5: memref<2x10xf32, #tpu.memory_space<vmem>>) attributes {dimension_semantics = [#tpu.dimension_semantics<arbitrary>], iteration_bounds = array<i64: 1>, scalar_prefetch = 0 : i64, scratch_operands = 0 : i64, tpu.core_type = #tpu.core_type<tc>, window_params = [{pipeline_mode = #tpu.pipeline_mode<synchronous>, transform_indices = @transform_0, window_bounds = array<i64: 2, 2, 128>}, {pipeline_mode = #tpu.pipeline_mode<synchronous>, transform_indices = @transform_1, window_bounds = array<i64: 1, 128>}, {pipeline_mode = #tpu.pipeline_mode<synchronous>, transform_indices = @transform_2, window_bounds = array<i64: 128, 10>}, {pipeline_mode = #tpu.pipeline_mode<synchronous>, transform_indices = @transform_3, window_bounds = array<i64: 1, 10>}, {pipeline_mode = #tpu.pipeline_mode<synchronous>, transform_indices = @transform_4, window_bounds = array<i64: 2, 10>}]} {
    %c0 = arith.constant 0 : index
    %c0_0 = arith.constant 0 : index
    %c0_1 = arith.constant 0 : index
    %0 = vector.load %arg1[%c0, %c0_0, %c0_1] : memref<2x2x128xf32, #tpu.memory_space<vmem>>, vector<1x2x128xf32>
    %1 = vector.shape_cast %0 : vector<1x2x128xf32> to vector<2x128xf32>
    %c1 = arith.constant 1 : index
    %c0_2 = arith.constant 0 : index
    %c0_3 = arith.constant 0 : index
    %2 = vector.load %arg1[%c1, %c0_2, %c0_3] : memref<2x2x128xf32, #tpu.memory_space<vmem>>, vector<1x2x128xf32>
    %3 = vector.shape_cast %2 : vector<1x2x128xf32> to vector<2x128xf32>
    %4 = arith.addf %1, %3 : vector<2x128xf32>
    %c0_4 = arith.constant 0 : index
    %c0_5 = arith.constant 0 : index
    %5 = vector.load %arg2[%c0_4, %c0_5] : memref<1x128xf32, #tpu.memory_space<vmem>>, vector<1x128xf32>
    %6 = vector.broadcast %5 : vector<1x128xf32> to vector<2x128xf32>
    %7 = arith.addf %4, %6 : vector<2x128xf32>
    %cst = arith.constant 0.000000e+00 : f32
    %8 = vector.broadcast %cst : f32 to vector<2x128xf32>
    %9 = arith.maximumf %7, %8 : vector<2x128xf32>
    %c0_6 = arith.constant 0 : index
    %c0_7 = arith.constant 0 : index
    %10 = vector.load %arg3[%c0_6, %c0_7] : memref<128x10xf32, #tpu.memory_space<vmem>>, vector<128x10xf32>
    %cst_8 = arith.constant dense<0.000000e+00> : vector<2x10xf32>
    %11 = tpu.matmul %9, %10, %cst_8 {dimension_numbers = #tpu.dot_dimension_numbers<[1], [0], [0], [1], [0, 0, 1, 1], [], []>} : vector<2x128xf32>, vector<128x10xf32>, vector<2x10xf32> -> vector<2x10xf32>
    %c0_9 = arith.constant 0 : index
    %c0_10 = arith.constant 0 : index
    %12 = vector.load %arg4[%c0_9, %c0_10] : memref<1x10xf32, #tpu.memory_space<vmem>>, vector<1x10xf32>
    %13 = vector.broadcast %12 : vector<1x10xf32> to vector<2x10xf32>
    %14 = arith.addf %11, %13 : vector<2x10xf32>
    %cst_11 = arith.constant dense<0xFF800000> : vector<2xf32>
    %15 = vector.multi_reduction <maximumf>, %14, %cst_11 [1] : vector<2x10xf32> to vector<2xf32>
    %16 = vector.shape_cast %15 : vector<2xf32> to vector<2x1xf32>
    %17 = vector.broadcast %16 : vector<2x1xf32> to vector<2x10xf32>
    %18 = arith.subf %14, %17 : vector<2x10xf32>
    %19 = math.exp %18 : vector<2x10xf32>
    %cst_12 = arith.constant dense<0.000000e+00> : vector<2xf32>
    %20 = vector.multi_reduction <add>, %19, %cst_12 [1] : vector<2x10xf32> to vector<2xf32>
    %21 = vector.shape_cast %20 : vector<2xf32> to vector<2x1xf32>
    %22 = vector.broadcast %21 : vector<2x1xf32> to vector<2x10xf32>
    %23 = arith.divf %19, %22 : vector<2x10xf32>
    %c0_13 = arith.constant 0 : index
    %c0_14 = arith.constant 0 : index
    %24 = vector.load %arg5[%c0_13, %c0_14] : memref<2x10xf32, #tpu.memory_space<vmem>>, vector<2x10xf32>
    tpu.vector_store %arg5[%c0_13, %c0_14], %23 {strides = array<i32>} : memref<2x10xf32, #tpu.memory_space<vmem>>, vector<2x10xf32>,
    return
  }
  func.func @transform_0(%arg0: i32) -> (i32, i32, i32) {
    %c0_i32 = arith.constant 0 : i32
    %c0_i32_0 = arith.constant 0 : i32
    %c0_i32_1 = arith.constant 0 : i32
    %c0_i32_2 = arith.constant 0 : i32
    return %c0_i32, %c0_i32_0, %c0_i32_1 : i32, i32, i32
  }
  func.func @transform_1(%arg0: i32) -> (i32, i32) {
    %c0_i32 = arith.constant 0 : i32
    %c0_i32_0 = arith.constant 0 : i32
    %c0_i32_1 = arith.constant 0 : i32
    return %c0_i32, %c0_i32_0 : i32, i32
  }
  func.func @transform_2(%arg0: i32) -> (i32, i32) {
    %c0_i32 = arith.constant 0 : i32
    %c0_i32_0 = arith.constant 0 : i32
    %c0_i32_1 = arith.constant 0 : i32
    return %c0_i32, %c0_i32_0 : i32, i32
  }
  func.func @transform_3(%arg0: i32) -> (i32, i32) {
    %c0_i32 = arith.constant 0 : i32
    %c0_i32_0 = arith.constant 0 : i32
    %c0_i32_1 = arith.constant 0 : i32
    return %c0_i32, %c0_i32_0 : i32, i32
  }
  func.func @transform_4(%arg0: i32) -> (i32, i32) {
    %c0_i32 = arith.constant 0 : i32
    %c0_i32_0 = arith.constant 0 : i32
    %c0_i32_1 = arith.constant 0 : i32
    return %c0_i32, %c0_i32_0 : i32, i32
  }
}

</mosaic_0001>

<bundles_post_ra>
// kernel: textcnn_forward.5
= control target key start
LH: loop header
LB: loop body
LE: loop exit
PB: predicated region body
PF: predicated region fallthrough
CT: control target
= control target key end

     0   :  { %v262_v3 = vmov 0.0|0.0   ;;  %vm263_vm0 = vmmov 0   ;;  %v264_v6 = vmov 0.0   ;;  %s366_s0 = inlined_call_operand.vmem [shape: f32[2,2,128], index: 0, kind: input, shape index: {}]   ;;  %s367_s1 = inlined_call_operand.vmem [shape: f32[1,128], index: 1, kind: input, shape index: {}]   ;;  %s368_s2 = inlined_call_operand.vmem [shape: f32[128,10], index: 2, kind: input, shape index: {}]   ;;  %s369_s3 = inlined_call_operand.vmem [shape: f32[1,10], index: 3, kind: input, shape index: {}]   ;;  %s370_s4 = inlined_call_operand.hbm [shape: f32[2,10], index: 4, kind: output, shape index: {}]  }
   0x1   :  { %v31_v0 = vld [vmem:[%s368_s2] sm:$0xff]  ;;  %v32_v1 = vld [vmem:[%s368_s2 + $0x8] sm:$0xff]  ;;  %v33_v2 = vld [vmem:[%s368_s2 + $0x10] sm:$0xff]  ;;  %206 = vmatprep.subr.bf16.mxu0 %v262_v3  ;;  %203 = vmatprep.mubr.msk.f32.mxu0 %vm263_vm0, %v264_v6 }
   0x2   :  { %v207_v4 = vpack.c.bf16 %v32_v1, %v31_v0  ;;  %v34_v5 = vld [vmem:[%s368_s2 + $0x18] sm:$0xff]  ;;  %v35_v8 = vld [vmem:[%s368_s2 + $0x20] sm:$0xff]  ;;  %v36_v9 = vld [vmem:[%s368_s2 + $0x28] sm:$0xff] }
   0x3   :  { %v210_v7 = vpack.c.bf16 %v34_v5, %v33_v2 }
   0x4   :  { %208 = vmatpush3.bf16.msra.mxu0 %v207_v4 }
   0x5   :  { %209 = vmatprep.subr.bf16.mxu0 %v262_v3 }
   0x6   :  { %9 = vsyncpa [#allocation3], 0  ;;  %v213_v10 = vpack.c.bf16 %v36_v9, %v35_v8  ;;  %v37_v11 = vld [vmem:[%s368_s2 + $0x30] sm:$0xff]  ;;  %v38_v12 = vld [vmem:[%s368_s2 + $0x38] sm:$0xff]  ;;  %vm124_vm1 = vcmask 74752  }
   0x7   :  { %v216_v13 = vpack.c.bf16 %v38_v12, %v37_v11  ;;  %v39_v14 = vld [vmem:[%s368_s2 + $0x40] sm:$0xff]  ;;  %v40_v15 = vld [vmem:[%s368_s2 + $0x48] sm:$0xff]  ;;  %v41_v17 = vld [vmem:[%s368_s2 + $0x50] sm:$0xff] }
   0x8   :  { %211 = vmatpush3.bf16.msra.mxu0 %v210_v7  ;;  %v219_v16 = vpack.c.bf16 %v40_v15, %v39_v14  ;;  %v42_v18 = vld [vmem:[%s368_s2 + $0x58] sm:$0xff]  ;;  %v18_v20 = vld [vmem:[%s366_s0] sm:$0x3]  ;;  %v151_v21 = vld [vmem:[%s366_s0 + $0x2] sm:$0x3] }
   0x9   :  { %212 = vmatprep.subr.bf16.mxu0 %v262_v3  ;;  %v222_v19 = vpack.c.bf16 %v42_v18, %v41_v17  ;;  %v43_v22 = vld [vmem:[%s368_s2 + $0x60] sm:$0xff]  ;;  %v44_v23 = vld [vmem:[%s368_s2 + $0x68] sm:$0xff]  ;;  %v21_v24 = vadd.f32 %v151_v21, %v18_v20  ;;  %v45_v27 = vld [vmem:[%s368_s2 + $0x70] sm:$0xff] }
   0xa   :  { %v225_v25 = vpack.c.bf16 %v44_v23, %v43_v22  ;;  %v152_v26 = vld [vmem:[%s367_s1] ss:$0 sm:$0xff]  ;;  %v46_v28 = vld [vmem:[%s368_s2 + $0x78] sm:$0xff]  ;;  %s265_s1 = smov [#allocation2]  }
   0xb   :  { %v29_v29 = vadd.f32 %v152_v26, %v21_v24  ;;  %v228_v30 = vpack.c.bf16 %v46_v28, %v45_v27  ;;  %v153_v32 = vld [vmem:[%s369_s3] ss:$0 sm:$0xff]  ;;  %s143_s2 = sshll.u32 %s265_s1, 4  ;;  %s144_s2 = int_to_ptr.vmem [resolvable:$true] %s143_s2 }
   0xc   :  { %214 = vmatpush3.bf16.msra.mxu0 %v213_v10  ;;  %s238_s3 = scalar_lea.vmem %s144_s2, 32  ;;  %p243_p1 = scmp.lt.s32.totalorder %s144_s2, %s144_s2 }
   0xd   :  { %215 = vmatprep.subr.bf16.mxu0 %v262_v3  ;;  %v30_v31 = vmax.f32 %v29_v29, 0.0  ;;  %p239_p0 = scmp.ne.s32.totalorder %s144_s2, %s238_s3  ;;  %p244_p2 = scmp.lt.s32.totalorder %s238_s3, %s238_s3 }
   0xf   :  { %p245_p3 = por %p244_p2, %p243_p1 }
  0x10   :  { %217 = vmatpush3.bf16.msra.mxu0 %v216_v13 }
  0x11   :  { %218 = vmatprep.subr.bf16.mxu0 %v262_v3  ;;  %p246_p4 = pnand %p245_p3, %p239_p0 }
  0x14   :  { %220 = vmatpush3.bf16.msra.mxu0 %v219_v16 }
  0x15   :  { %221 = vmatprep.subr.bf16.mxu0 %v262_v3 }
  0x18   :  { %223 = vmatpush3.bf16.msra.mxu0 %v222_v19 }
  0x19   :  { %224 = vmatprep.subr.bf16.mxu0 %v262_v3 }
  0x1c   :  { %226 = vmatpush3.bf16.msra.mxu0 %v225_v25 }
  0x1d   :  { %227 = vmatprep.subr.bf16.mxu0 %v262_v3 }
  0x20   :  { %229 = vmatpush3.bf16.msra.mxu0 %v228_v30 }
  0x23   :  { %204 = vmatmul.mubr.f32.vlgmr.msra.gmra.mrb[0].mxu0 %v30_v31 }
  0xf6   :  { %v120_v33 = vpop.f32.mrb[0].mxu0 }
  0xf7   :  { %v121_v34 = vadd.f32 %v153_v32, %v120_v33  ;;  %v205_v35 = vpop.f32.mrb[1].mxu0 }
  0xf9   :  { %v125_v36 = vsel %vm124_vm1, %v121_v34, -inf }
  0xfa   :  { %126 = vmax.xlane.f32.xlu0 %v125_v36 }
 0x187   :  { %v127_v37 = vpop.xlane.xlu0 %126 }
 0x188   :  { %v128_v38 = vsub.f32 %v121_v34, %v127_v37 }
 0x18a   :  { %v129_v39 = vmul.f32 1.442695, %v128_v38 }
 0x18c   :  { %234 = vpow2.f32 %v129_v39 }
 0x196   :  { %v235_v40 = vpop.eup %234 }
 0x197   :  { %v131_v41 = vsel %vm124_vm1, %v235_v40, 0.0 }
 0x198   :  { %132 = vadd.xlane.f32.xlu0 %v131_v41 }
 0x225   :  { %v133_v42 = vpop.xlane.xlu0 %132 }
 0x226   :  { %236 = vrcp.f32 %v133_v42 }
 0x230   :  { %v237_v43 = vpop.eup %236 }
 0x231   :  { %v135_v44 = vmul.f32 %v237_v43, %v235_v40 }
 0x233   :  { %136 = vst.msk [vmem:[#allocation2] sm:$0x3] %vm124_vm1, %v135_v44 }
 0x234   :  { %249 = shalt.err (!%p246_p4)
}
 0x235   :  { %s250_s30 = scalar_lea.hbm %s370_s4, 32 }
 0x236   :  { %p251_p5 = scmp.ne.s32.totalorder %s370_s4, %s250_s30  ;;  %p254_p6 = scmp.lt.u32.totalorder %s250_s30, %s370_s4 }
 0x238   :  { %p256_p7 = pnand %p254_p6, %p251_p5 }
 0x23a   :  { %259 = shalt.err (!%p256_p7)
}
 0x23b   :  { %146 = dma.vmem_to_hbm [thread:$0]  %s144_s2, 32, %s370_s4, [#allocation3]  }
 0x23c   :  { %260 = dma.done.wait [#allocation3], 32  }
 0x23d   :  { %261 = vsyncadd [#allocation3], 4294967264 }
 0x23e   :  { %150 = vsyncpa [#allocation3], 1 }

// kernel: textcnn_forward.3
= control target key start
LH: loop header
LB: loop body
LE: loop exit
PB: predicated region body
PF: predicated region fallthrough
CT: control target
= control target key end

     0   :  { %s2270_s12 = smov 0   ;;  %s2272_s13 = smov 0   ;;  %s3049_s0 = inlined_call_operand.vmem [shape: f32[2,648,64], index: 0, kind: input, shape index: {}]   ;;  %s3050_s1 = inlined_call_operand.vmem [shape: f32[5,64,256], index: 1, kind: input, shape index: {}]   ;;  %s3051_s2 = inlined_call_operand.vmem [shape: f32[1,256], index: 2, kind: input, shape index: {}]   ;;  %s3052_s3 = inlined_call_operand.vmem [shape: bf16[2,640,256], index: 3, kind: output, shape index: {}]  }
   0x1   :  { %s2274_s14 = smov 0   ;;  %s2276_s15 = smov 0  }
   0x2   :  { %s2278_s16 = smov 0  }
   0x3 LB: > { %s22_s17 = sadd.s32 1, %s2239_s14  ;;  %s25_s18 = sadd.s32 1, %s2243_s15  ;;  %s2247_s16 = sphi %s2278_s16, %s13_s16   ;;  %s2243_s15 = sphi %s2276_s15, %s3056_s15   ;;  %s2239_s14 = sphi %s2274_s14, %s3055_s14   ;;  %s2235_s13 = sphi %s2272_s13, %s3054_s13   ;;  %s2231_s12 = sphi %s2270_s12, %s3053_s12  }
   0x4   : > { %p23_p0 = scmp.ge.s32.totalorder %s22_s17, 5  ;;  %p1766_p1 = scmp.ge.s32.totalorder %s2247_s16, 1 }
   0x5   : > { %p151_p2 = scmp.lt.s32.totalorder %s2247_s16, 11 }
   0x6   : > { %s3058_s17 = smov (%p23_p0, %s22_s17), 0  ;;  %s3060_s18 = smov (!%p23_p0, %s25_s18), %s2243_s15 }
   0x7   : > { %p152_p3 = pnand %p1766_p1, %p151_p2  ;;  %p27_p4 = scmp.ge.s32.totalorder %s3060_s18, 2 }
   0x8   : > { %v1773_v0 = vld [vmem:[%s3050_s1 + $0x88] sm:$0xff] (!%p152_p3)  ;;  %v1775_v1 = vld [vmem:[%s3050_s1 + $0x98] sm:$0xff] (!%p152_p3)  ;;  %p180_p5 = scmp.lt.s32.totalorder (!%p152_p3), %s2235_s13, 1  ;;  %v1772_v5 = vld [vmem:[%s3050_s1 + $0x80] sm:$0xff] (!%p152_p3)  ;;  %v2249_v7 = vmov (!%p152_p3), 0.0   ;;  %s1771_s30 = sshll.u32 (!%p152_p3), %s2231_s12, 7 }
   0x9   : > { %s3062_s18 = smov (%p27_p4, %s3060_s18), 0  ;;  %155 = sbr.rel (%p152_p3) target bundleno = 405 (0x195), region = 32 }
   0xa   : > { %v1821_v2 = vld [vmem:[%s3050_s1 + $0x108] sm:$0xff] (!%p152_p3)  ;;  %v1950_v3 = vpack.c.bf16 (!%p152_p3), %v1775_v1, %v1773_v0  ;;  %v1823_v4 = vld [vmem:[%s3050_s1 + $0x118] sm:$0xff] (!%p152_p3)  ;;  %v1774_v6 = vld [vmem:[%s3050_s1 + $0x90] sm:$0xff] (!%p152_p3)  ;;  %396 = vmatprep.mubr.f32.mxu1 (!%p152_p3), %v2249_v7  ;;  %833 = vmatprep.mubr.f32.mxu0 (!%p152_p3), %v2249_v7  ;;  %vm265_vm0 = vcmask (!%p152_p3), 1046528   ;;  %vm703_vm1 = vcmask (!%p152_p3), 1045504   ;;  %vm299_vm2 = vcmask (!%p152_p3), 523264  }
   0xb   : > { %v2325_v8 = vpack.c.bf16 (!%p152_p3), %v1823_v4, %v1821_v2  ;;  %v1952_v9 = vpack.c.bf16 (!%p152_p3), %v1774_v6, %v1772_v5  ;;  %v1820_v10 = vld [vmem:[%s3050_s1 + $0x100] sm:$0xff] (!%p152_p3)  ;;  %v1822_v11 = vld [vmem:[%s3050_s1 + $0x110] sm:$0xff] (!%p152_p3)  ;;  %v1777_v12 = vld [vmem:[%s3050_s1 + $0xa8] sm:$0xff] (!%p152_p3)  ;;  %vm979_vm3 = vcmask (!%p152_p3), 1044480   ;;  %vm1255_vm4 = vcmask (!%p152_p3), 1043456  }
   0xc   : > { %1951 = vmatprep.subr.bf16.mxu1 (!%p152_p3), %v1950_v3  ;;  %v2339_v13 = vpack.c.bf16 (!%p152_p3), %v1822_v11, %v1820_v10  ;;  %v1779_v14 = vld [vmem:[%s3050_s1 + $0xb8] sm:$0xff] (!%p152_p3)  ;;  %v1825_v15 = vld [vmem:[%s3050_s1 + $0x128] sm:$0xff] (!%p152_p3)  ;;  %v1776_v19 = vld [vmem:[%s3050_s1 + $0xa0] sm:$0xff] (!%p152_p3) }
   0xd   : > { %v1827_v16 = vld [vmem:[%s3050_s1 + $0x138] sm:$0xff] (!%p152_p3)  ;;  %1983 = vmatprep.subr.bf16.mxu0 (!%p152_p3), %v2325_v8  ;;  %1953 = vmatpush1.bf16.msra.mxu1 (!%p152_p3), %v1952_v9  ;;  %v1954_v17 = vpack.c.bf16 (!%p152_p3), %v1779_v14, %v1777_v12  ;;  %v1778_v20 = vld [vmem:[%s3050_s1 + $0xb0] sm:$0xff] (!%p152_p3)  ;;  %v1824_v21 = vld [vmem:[%s3050_s1 + $0x120] sm:$0xff] (!%p152_p3) }
   0xe   : > { %v2351_v18 = vpack.c.bf16 (!%p152_p3), %v1827_v16, %v1825_v15  ;;  %1985 = vmatpush1.bf16.msra.mxu0 (!%p152_p3), %v2339_v13  ;;  %v1956_v22 = vpack.c.bf16 (!%p152_p3), %v1778_v20, %v1776_v19  ;;  %v1826_v23 = vld [vmem:[%s3050_s1 + $0x130] sm:$0xff] (!%p152_p3)  ;;  %v1781_v24 = vld [vmem:[%s3050_s1 + $0xc8] sm:$0xff] (!%p152_p3)  ;;  %v1783_v25 = vld [vmem:[%s3050_s1 + $0xd8] sm:$0xff] (!%p152_p3) }
   0xf   : > { %1955 = vmatprep.subr.bf16.mxu1 (!%p152_p3), %v1954_v17  ;;  %v2375_v26 = vpack.c.bf16 (!%p152_p3), %v1826_v23, %v1824_v21  ;;  %v1958_v27 = vpack.c.bf16 (!%p152_p3), %v1783_v25, %v1781_v24  ;;  %v1829_v28 = vld [vmem:[%s3050_s1 + $0x148] sm:$0xff] (!%p152_p3)  ;;  %v1831_v29 = vld [vmem:[%s3050_s1 + $0x158] sm:$0xff] (!%p152_p3)  ;;  %v1780_v30 = vld [vmem:[%s3050_s1 + $0xc0] sm:$0xff] (!%p152_p3) }
  0x10   : > { %s3064_s13 = smov (!%p180_p5, %s2235_s13), 1  ;;  %1987 = vmatprep.subr.bf16.mxu0 %v2351_v18  ;;  %v2389_v31 = vpack.c.bf16 %v1831_v29, %v1829_v28  ;;  %v1782_v32 = vld [vmem:[%s3050_s1 + $0xd0] sm:$0xff]  ;;  %v1828_v33 = vld [vmem:[%s3050_s1 + $0x140] sm:$0xff]  ;;  %v1785_v36 = vld [vmem:[%s3050_s1 + $0xe8] sm:$0xff] }
  0x11   : > { %s2166_s29 = smul.u32 648, %s3064_s13  ;;  %v1830_v34 = vld [vmem:[%s3050_s1 + $0x150] sm:$0xff]  ;;  %1957 = vmatpush1.bf16.msra.mxu1 %v1956_v22  ;;  %v1960_v35 = vpack.c.bf16 %v1782_v32, %v1780_v30  ;;  %v1787_v37 = vld [vmem:[%s3050_s1 + $0xf8] sm:$0xff]  ;;  %v1833_v38 = vld [vmem:[%s3050_s1 + $0x168] sm:$0xff] }
  0x12   : > { %1989 = vmatpush1.bf16.msra.mxu0 %v2375_v26  ;;  %1959 = vmatprep.subr.bf16.mxu1 %v1958_v27  ;;  %v2412_v39 = vpack.c.bf16 %v1830_v34, %v1828_v33  ;;  %v1962_v40 = vpack.c.bf16 %v1787_v37, %v1785_v36  ;;  %v1835_v41 = vld [vmem:[%s3050_s1 + $0x178] sm:$0xff]  ;;  %v1784_v42 = vld [vmem:[%s3050_s1 + $0xe0] sm:$0xff]  ;;  %v1786_v43 = vld [vmem:[%s3050_s1 + $0xf0] sm:$0xff]  ;;  %s2167_s5 = smul.u32 160, %s3064_s13 }
  0x13   : > { %s184_s25 = scalar_lea.vmem %s3049_s0, %s2166_s29  ;;  %1991 = vmatprep.subr.bf16.mxu0 %v2389_v31  ;;  %v2424_v44 = vpack.c.bf16 %v1835_v41, %v1833_v38  ;;  %v1832_v45 = vld [vmem:[%s3050_s1 + $0x160] sm:$0xff]  ;;  %v1834_v46 = vld [vmem:[%s3050_s1 + $0x170] sm:$0xff]  ;;  %v216_v49 = vld [vmem:[%s3050_s1 + $0x8] sm:$0xff]  ;;  %v1964_v51 = vpack.c.bf16 %v1786_v43, %v1784_v42 }
  0x14   : > { %s2400_s7 = scalar_lea.vmem %s184_s25, %s1771_s30  ;;  %v218_v50 = vld [vmem:[%s3050_s1 + $0x18] sm:$0xff]  ;;  %v1853_v54 = vld [vmem:[%s3050_s1 + $0x188] sm:$0xff]  ;;  %v2453_v56 = vpack.c.bf16 %v1834_v46, %v1832_v45  ;;  %v215_v60 = vld [vmem:[%s3050_s1] sm:$0xff] }
  0x15   : > { %v2433_v47 = vld [vmem:[%s2400_s7] sm:$0xff]  ;;  %v2436_v48 = vld [vmem:[%s2400_s7 + $0x8] sm:$0xff]  ;;  %1961 = vmatpush1.bf16.msra.mxu1 %v1960_v35  ;;  %v1855_v55 = vld [vmem:[%s3050_s1 + $0x198] sm:$0xff]  ;;  %v1966_v57 = vpack.c.bf16 %v218_v50, %v216_v49 }
  0x16   : > { %v266_v52 = vrot.slane %v2433_v47, 1  ;;  %v267_v53 = vrot.slane %v2436_v48, 1  ;;  %1993 = vmatpush1.bf16.msra.mxu0 %v2412_v39  ;;  %1963 = vmatprep.subr.bf16.mxu1 %v1962_v40  ;;  %v704_v58 = vrot.slane %v2433_v47, 2  ;;  %v705_v59 = vrot.slane %v2436_v48, 2  ;;  %v217_v61 = vld [vmem:[%s3050_s1 + $0x10] sm:$0xff]  ;;  %v1852_v63 = vld [vmem:[%s3050_s1 + $0x180] sm:$0xff] }
  0x17   : > { %1995 = vmatprep.subr.bf16.mxu0 %v2424_v44  ;;  %v1998_v62 = vpack.c.bf16 %v1855_v55, %v1853_v54  ;;  %v1854_v0 = vld [vmem:[%s3050_s1 + $0x190] sm:$0xff]  ;;  %v1857_v2 = vld [vmem:[%s3050_s1 + $0x1a8] sm:$0xff]  ;;  %v1859_v3 = vld [vmem:[%s3050_s1 + $0x1b8] sm:$0xff]  ;;  %v1968_v5 = vpack.c.bf16 %v217_v61, %v215_v60 }
  0x18   : > { %v2471_v1 = vld [vmem:[%s2400_s7 + $0x10] sm:$0xff]  ;;  %v268_v4 = vsel %vm265_vm0, %v266_v52, %v267_v53  ;;  %v706_v9 = vsel %vm703_vm1, %v704_v58, %v705_v59  ;;  %v2000_v10 = vpack.c.bf16 %v1854_v0, %v1852_v63  ;;  %v2485_v12 = vld [vmem:[%s2400_s7 + $0x18] sm:$0xff]  ;;  %v220_v14 = vld [vmem:[%s3050_s1 + $0x28] sm:$0xff]  ;;  %v2002_v16 = vpack.c.bf16 %v1859_v3, %v1857_v2 }
  0x19   : > { %1965 = vmatpush1.bf16.msra.mxu1 %v1964_v51  ;;  %v269_v6 = vrot.slane %v2471_v1, 1  ;;  %v707_v11 = vrot.slane %v2471_v1, 2  ;;  %v222_v15 = vld [vmem:[%s3050_s1 + $0x38] sm:$0xff]  ;;  %v1856_v17 = vld [vmem:[%s3050_s1 + $0x1a0] sm:$0xff]  ;;  %v1858_v19 = vld [vmem:[%s3050_s1 + $0x1b0] sm:$0xff]  ;;  %v271_v27 = vrot.slane %v2485_v12, 1 }
  0x1a   : > { %1997 = vmatpush1.bf16.msra.mxu0 %v2453_v56  ;;  %1967 = vmatprep.subr.bf16.mxu1 %v1966_v57  ;;  %v1861_v20 = vld [vmem:[%s3050_s1 + $0x1c8] sm:$0xff]  ;;  %v1970_v21 = vpack.c.bf16 %v222_v15, %v220_v14  ;;  %v1863_v22 = vld [vmem:[%s3050_s1 + $0x1d8] sm:$0xff]  ;;  %v219_v23 = vld [vmem:[%s3050_s1 + $0x20] sm:$0xff]  ;;  %v709_v29 = vrot.slane %v2485_v12, 2  ;;  %v2004_v30 = vpack.c.bf16 %v1858_v19, %v1856_v17 }
  0x1b   : > { %1999 = vmatprep.subr.bf16.mxu0 %v1998_v62  ;;  %v221_v24 = vld [vmem:[%s3050_s1 + $0x30] sm:$0xff]  ;;  %v270_v25 = vsel %vm265_vm0, %v267_v53, %v269_v6  ;;  %v708_v28 = vsel %vm703_vm1, %v705_v59, %v707_v11  ;;  %v2519_v32 = vld [vmem:[%s2400_s7 + $0x20] sm:$0xff]  ;;  %v2006_v34 = vpack.c.bf16 %v1863_v22, %v1861_v20  ;;  %v224_v37 = vld [vmem:[%s3050_s1 + $0x48] sm:$0xff]  ;;  %v272_v43 = vsel %vm265_vm0, %v269_v6, %v271_v27 }
  0x1c   : > { %1788 = vmatmul.mubr.msk.f32.vlgmr.msra.gmra.mrb[0].mxu1 %vm299_vm2, %v268_v4  ;;  %v1860_v33 = vld [vmem:[%s3050_s1 + $0x1c0] sm:$0xff]  ;;  %v1972_v35 = vpack.c.bf16 %v221_v24, %v219_v23  ;;  %v1862_v36 = vld [vmem:[%s3050_s1 + $0x1d0] sm:$0xff]  ;;  %v226_v38 = vld [vmem:[%s3050_s1 + $0x58] sm:$0xff]  ;;  %v273_v45 = vrot.slane %v2519_v32, 1  ;;  %v710_v50 = vsel %vm703_vm1, %v707_v11, %v709_v29  ;;  %v711_v51 = vrot.slane %v2519_v32, 2 }
  0x1d   : > { %1836 = vmatmul.mubr.msk.f32.vlgmr.msra.gmra.mrb[0].mxu0 %vm299_vm2, %v706_v9  ;;  %1969 = vmatpush1.bf16.msra.mxu1 %v1968_v5  ;;  %v1865_v40 = vld [vmem:[%s3050_s1 + $0x1e8] sm:$0xff]  ;;  %v1867_v41 = vld [vmem:[%s3050_s1 + $0x1f8] sm:$0xff]  ;;  %v223_v42 = vld [vmem:[%s3050_s1 + $0x40] sm:$0xff]  ;;  %v1974_v46 = vpack.c.bf16 %v226_v38, %v224_v37  ;;  %v2008_v53 = vpack.c.bf16 %v1862_v36, %v1860_v33  ;;  %v980_v38 = vrot.slane %v2433_v47, 3 }
  0x1e   : > { %2001 = vmatpush1.bf16.msra.mxu0 %v2000_v10  ;;  %402 = vmatprep.mubr.f32.mxu1 %v2249_v7  ;;  %v225_v49 = vld [vmem:[%s3050_s1 + $0x50] sm:$0xff]  ;;  %v2555_v52 = vld [vmem:[%s2400_s7 + $0x28] sm:$0xff]  ;;  %v1864_v54 = vld [vmem:[%s3050_s1 + $0x1e0] sm:$0xff]  ;;  %v2010_v55 = vpack.c.bf16 %v1867_v41, %v1865_v40  ;;  %v274_v0 = vsel %vm265_vm0, %v271_v27, %v273_v45  ;;  %v712_v5 = vsel %vm703_vm1, %v709_v29, %v711_v51  ;;  %v981_v40 = vrot.slane %v2436_v48, 3 }
  0x1f   : > { %839 = vmatprep.mubr.f32.mxu0 %v2249_v7  ;;  %2003 = vmatprep.subr.bf16.mxu0 %v2002_v16  ;;  %v1866_v57 = vld [vmem:[%s3050_s1 + $0x1f0] sm:$0xff]  ;;  %v1976_v58 = vpack.c.bf16 %v225_v49, %v223_v42  ;;  %v228_v59 = vld [vmem:[%s3050_s1 + $0x68] sm:$0xff]  ;;  %v230_v60 = vld [vmem:[%s3050_s1 + $0x78] sm:$0xff]  ;;  %v275_v2 = vrot.slane %v2555_v52, 1  ;;  %v713_v6 = vrot.slane %v2555_v52, 2 }
  0x20   : > { %1789 = vmatmul.mubr.msk.f32.gmra.mrb[2].mxu1 %vm299_vm2, %v270_v25  ;;  %1971 = vmatprep.subr.bf16.mxu1 %v1970_v21  ;;  %v1885_v61 = vld [vmem:[%s3050_s1 + $0x208] sm:$0xff]  ;;  %v1887_v62 = vld [vmem:[%s3050_s1 + $0x218] sm:$0xff]  ;;  %v227_v63 = vld [vmem:[%s3050_s1 + $0x60] sm:$0xff]  ;;  %v1978_v3 = vpack.c.bf16 %v230_v60, %v228_v59  ;;  %v2012_v10 = vpack.c.bf16 %v1866_v57, %v1864_v54  ;;  %v982_v57 = vsel %vm979_vm3, %v980_v38, %v981_v40  ;;  %v983_v59 = vrot.slane %v2471_v1, 3 }
  0x21   : > { %1837 = vmatmul.mubr.msk.f32.gmra.mrb[2].mxu0 %vm299_vm2, %v708_v28  ;;  %408 = vmatprep.mubr.f32.mxu1 %v2249_v7  ;;  %v229_v4 = vld [vmem:[%s3050_s1 + $0x70] sm:$0xff]  ;;  %v2014_v11 = vpack.c.bf16 %v1887_v62, %v1885_v61  ;;  %v276_v15 = vsel %vm265_vm0, %v273_v45, %v275_v2  ;;  %v714_v17 = vsel %vm703_vm1, %v711_v51, %v713_v6  ;;  %v2601_v20 = vld [vmem:[%s2400_s7 + $0x38] sm:$0xff]  ;;  %v2613_v25 = vld [vmem:[%s2400_s7 + $0x40] sm:$0xff] }
  0x22   : > { %845 = vmatprep.mubr.f32.mxu0 %v2249_v7  ;;  %2005 = vmatpush1.bf16.msra.mxu0 %v2004_v30  ;;  %v2590_v9 = vld [vmem:[%s2400_s7 + $0x30] sm:$0xff]  ;;  %v1980_v14 = vpack.c.bf16 %v229_v4, %v227_v63  ;;  %v279_v22 = vrot.slane %v2601_v20, 1  ;;  %v717_v24 = vrot.slane %v2601_v20, 2  ;;  %v281_v27 = vrot.slane %v2613_v25, 1  ;;  %v2621_v28 = vld [vmem:[%s2400_s7 + $0x48] sm:$0xff]  ;;  %v1884_v42 = vld [vmem:[%s3050_s1 + $0x200] sm:$0xff] }
  0x23   : > { %2007 = vmatprep.subr.bf16.mxu0 %v2006_v34  ;;  %1973 = vmatpush1.bf16.msra.mxu1 %v1972_v35  ;;  %v277_v16 = vrot.slane %v2590_v9, 1  ;;  %v715_v19 = vrot.slane %v2590_v9, 2  ;;  %v719_v30 = vrot.slane %v2613_v25, 2  ;;  %v721_v33 = vrot.slane %v2621_v28, 2  ;;  %v2642_v41 = vld [vmem:[%s2400_s7 + $0x50] sm:$0xff]  ;;  %v1889_v45 = vld [vmem:[%s3050_s1 + $0x228] sm:$0xff] }
  0x24   : > { %1790 = vmatmul.mubr.msk.f32.gmra.mrb[4].mxu1 %vm299_vm2, %v272_v43  ;;  %1975 = vmatprep.subr.bf16.mxu1 %v1974_v46  ;;  %v282_v35 = vsel %vm265_vm0, %v279_v22, %v281_v27  ;;  %v283_v36 = vrot.slane %v2621_v28, 1  ;;  %v1886_v43 = vld [vmem:[%s3050_s1 + $0x210] sm:$0xff]  ;;  %v1891_v46 = vld [vmem:[%s3050_s1 + $0x238] sm:$0xff]  ;;  %v1888_v62 = vld [vmem:[%s3050_s1 + $0x220] sm:$0xff] }
  0x25   : > { %1838 = vmatmul.mubr.msk.f32.gmra.mrb[4].mxu0 %vm299_vm2, %v710_v50  ;;  %414 = vmatprep.mubr.f32.mxu1 %v2249_v7  ;;  %v278_v21 = vsel %vm265_vm0, %v275_v2, %v277_v16  ;;  %v716_v23 = vsel %vm703_vm1, %v713_v6, %v715_v19  ;;  %v718_v29 = vsel %vm703_vm1, %v715_v19, %v717_v24  ;;  %v2658_v49 = vld [vmem:[%s2400_s7 + $0x78] sm:$0xff]  ;;  %v2661_v50 = vld [vmem:[%s2400_s7 + $0x80] sm:$0xff]  ;;  %v1890_v63 = vld [vmem:[%s3050_s1 + $0x230] sm:$0xff] }
  0x26   : > { %851 = vmatprep.mubr.f32.mxu0 %v2249_v7  ;;  %2009 = vmatpush1.bf16.msra.mxu0 %v2008_v53  ;;  %v2631_v34 = vsel %vm703_vm1, %v719_v30, %v721_v33  ;;  %v720_v37 = vsel %vm703_vm1, %v717_v24, %v719_v30  ;;  %v284_v51 = vsel %vm265_vm0, %v281_v27, %v283_v36  ;;  %v285_v53 = vrot.slane %v2642_v41, 1  ;;  %v2673_v60 = vld [vmem:[%s2400_s7 + $0x58] sm:$0xff]  ;;  %v1893_v2 = vld [vmem:[%s3050_s1 + $0x248] sm:$0xff] }
  0x27   : > { %2011 = vmatprep.subr.bf16.mxu0 %v2010_v55  ;;  %1977 = vmatpush1.bf16.msra.mxu1 %v1976_v58  ;;  %v733_v54 = vrot.slane %v2658_v49, 2  ;;  %v735_v55 = vrot.slane %v2661_v50, 2  ;;  %v2016_v58 = vpack.c.bf16 %v1886_v43, %v1884_v42  ;;  %v2018_v61 = vpack.c.bf16 %v1891_v46, %v1889_v45  ;;  %v1897_v19 = vld [vmem:[%s3050_s1 + $0x268] sm:$0xff]  ;;  %v2741_v43 = vld [vmem:[%s2400_s7 + $0x70] sm:$0xff] }
  0x28   : > { %1791 = vmatmul.mubr.msk.f32.gmra.mrb[6].mxu1 %vm299_vm2, %v274_v0  ;;  %1979 = vmatprep.subr.bf16.mxu1 %v1978_v3  ;;  %v1895_v3 = vld [vmem:[%s3050_s1 + $0x258] sm:$0xff]  ;;  %v286_v4 = vsel %vm265_vm0, %v283_v36, %v285_v53  ;;  %v984_v6 = vsel %vm979_vm3, %v981_v40, %v983_v59  ;;  %v2724_v27 = vld [vmem:[%s2400_s7 + $0x68] sm:$0xff]  ;;  %v1898_v36 = vld [vmem:[%s3050_s1 + $0x270] sm:$0xff]  ;;  %v989_v42 = vrot.slane %v2555_v52, 3 }
  0x29   : > { %1839 = vmatmul.mubr.msk.f32.gmra.mrb[6].mxu0 %vm299_vm2, %v712_v5  ;;  %420 = vmatprep.mubr.f32.mxu1 %v2249_v7  ;;  %v2684_v0 = vsel %vm703_vm1, %v733_v54, %v735_v55  ;;  %v287_v5 = vrot.slane %v2673_v60, 1  ;;  %v291_v38 = vrot.slane %v2724_v27, 1  ;;  %v991_v55 = vrot.slane %v2590_v9, 3 }
  0x2a   : > { %857 = vmatprep.mubr.f32.mxu0 %v2249_v7  ;;  %2013 = vmatpush1.bf16.msra.mxu0 %v2012_v10  ;;  %v985_v10 = vrot.slane %v2485_v12, 3 }
  0x2b   : > { %2015 = vmatprep.subr.bf16.mxu0 %v2014_v11  ;;  %1981 = vmatpush1.bf16.msra.mxu1 %v1980_v14  ;;  %v2701_v11 = vld [vmem:[%s2400_s7 + $0x60] sm:$0xff]  ;;  %v2020_v14 = vpack.c.bf16 %v1890_v63, %v1888_v62  ;;  %v297_v63 = vrot.slane %v2661_v50, 1  ;;  %s1768_s7 = sshll.u32 %s2231_s12, 4 }
  0x2c   : > { %1792 = vmatmul.mubr.msk.f32.gmra.mrb[8].mxu1 %vm299_vm2, %v276_v15  ;;  %2030 = vmatprep.subr.bf16.mxu1 %v2325_v8  ;;  %v280_v8 = vsel %vm265_vm0, %v277_v16, %v279_v22  ;;  %v2022_v15 = vpack.c.bf16 %v1895_v3, %v1893_v2  ;;  %v1892_v16 = vld [vmem:[%s3050_s1 + $0x240] sm:$0xff]  ;;  %v288_v22 = vsel %vm265_vm0, %v285_v53, %v287_v5  ;;  %v995_v3 = vrot.slane %v2613_v25, 3  ;;  %p188_p6 = scmp.lt.s32.totalorder %s1768_s7, 79 }
  0x2d   : > { %1840 = vmatmul.mubr.msk.f32.gmra.mrb[8].mxu0 %vm299_vm2, %v714_v17  ;;  %426 = vmatprep.mubr.f32.mxu1 %v2249_v7  ;;  %v1894_v17 = vld [vmem:[%s3050_s1 + $0x250] sm:$0xff]  ;;  %v986_v24 = vsel %vm979_vm3, %v983_v59, %v985_v10  ;;  %v992_v59 = vsel %vm979_vm3, %v989_v42, %v991_v55 }
  0x2e   : > { %863 = vmatprep.mubr.f32.mxu0 %v2249_v7  ;;  %s3066_s7 = smov (!%p188_p6, %s1768_s7), 79 }
  0x2f   : > { %s1769_s12 = sshll.u32 %s3066_s7, 1 }
  0x30   : > { %1793 = vmatmul.mubr.msk.f32.gmra.mrb[10].mxu1 %vm299_vm2, %v278_v21  ;;  %v1899_v21 = vld [vmem:[%s3050_s1 + $0x278] sm:$0xff]  ;;  %s192_s8 = sadd.s32 %s2167_s5, %s1769_s12 }
  0x31   : > { %1841 = vmatmul.mubr.msk.f32.gmra.mrb[10].mxu0 %vm299_vm2, %v716_v23  ;;  %432 = vmatprep.mubr.f32.mxu1 %v2249_v7  ;;  %v289_v23 = vrot.slane %v2701_v11, 1  ;;  %v2026_v30 = vpack.c.bf16 %v1899_v21, %v1897_v19  ;;  %v1005_v19 = vrot.slane %v2724_v27, 3  ;;  %v1011_v21 = vrot.slane %v2661_v50, 3  ;;  %s1770_s9 = sshll.u32 %s192_s8, 2 }
  0x32   : > { %869 = vmatprep.mubr.f32.mxu0 %v2249_v7  ;;  %s2982_s11 = scalar_lea.vmem %s3052_s3, %s1770_s9 }
  0x33   : > { %v292_v46 = vsel %vm265_vm0, %v289_v23, %v291_v38 }
  0x34   : > { %1794 = vmatmul.mubr.msk.f32.gmra.mrb[12].mxu1 %vm299_vm2, %v280_v8  ;;  %v987_v8 = vrot.slane %v2519_v32, 3 }
  0x35   : > { %1842 = vmatmul.mubr.msk.f32.gmra.mrb[12].mxu0 %vm299_vm2, %v718_v29  ;;  %438 = vmatprep.mubr.f32.mxu1 %v2249_v7  ;;  %v2024_v29 = vpack.c.bf16 %v1894_v17, %v1892_v16  ;;  %v1001_v16 = vrot.slane %v2673_v60, 3  ;;  %v1003_v17 = vrot.slane %v2701_v11, 3 }
  0x36   : > { %875 = vmatprep.mubr.f32.mxu0 %v2249_v7  ;;  %v988_v40 = vsel %vm979_vm3, %v985_v10, %v987_v8  ;;  %v990_v53 = vsel %vm979_vm3, %v987_v8, %v989_v42 }
  0x38   : > { %1795 = vmatmul.mubr.msk.f32.gmra.mrb[14].mxu1 %vm299_vm2, %v282_v35  ;;  %v1896_v35 = vld [vmem:[%s3050_s1 + $0x260] sm:$0xff] }
  0x39   : > { %1843 = vmatmul.mubr.msk.f32.gmra.mrb[14].mxu0 %vm299_vm2, %v720_v37  ;;  %444 = vmatprep.mubr.f32.mxu1 %v2249_v7  ;;  %v290_v37 = vsel %vm265_vm0, %v287_v5, %v289_v23  ;;  %v2028_v45 = vpack.c.bf16 %v1898_v36, %v1896_v35  ;;  %v1256_v23 = vrot.slane %v2433_v47, 4  ;;  %v1265_v35 = vrot.slane %v2555_v52, 4 }
  0x3a   : > { %1109 = vmatprep.mubr.f32.mxu0 %v2249_v7  ;;  %v1267_v36 = vrot.slane %v2590_v9, 4 }
  0x3c   : > { %1796 = vmatmul.mubr.msk.f32.gmra.mrb[16].mxu1 %vm299_vm2, %v284_v51  ;;  %v293_v51 = vrot.slane %v2741_v43, 1 }
  0x3d   : > { %1868 = vmatmul.mubr.msk.f32.vlgmr.msra.gmra.mrb[0].mxu0 %vm299_vm2, %v982_v57  ;;  %450 = vmatprep.mubr.f32.mxu1 %v2249_v7 }
  0x3e   : > { %2017 = vmatpush1.bf16.msra.mxu0 %v2016_v58  ;;  %1115 = vmatprep.mubr.f32.mxu0 %v2249_v7  ;;  %v294_v57 = vsel %vm265_vm0, %v291_v38, %v293_v51  ;;  %v295_v58 = vrot.slane %v2658_v49, 1  ;;  %v1271_v38 = vrot.slane %v2613_v25, 4 }
  0x3f   : > { %2019 = vmatprep.subr.bf16.mxu0 %v2018_v61  ;;  %v993_v61 = vrot.slane %v2601_v20, 3 }
  0x40   : > { %1797 = vmatmul.mubr.msk.f32.gmra.mrb[18].mxu1 %vm299_vm2, %v286_v4  ;;  %v296_v62 = vsel %vm265_vm0, %v293_v51, %v295_v58  ;;  %v298_v4 = vsel %vm265_vm0, %v295_v58, %v297_v63  ;;  %v725_v51 = vrot.slane %v2673_v60, 2  ;;  %v1283_v63 = vrot.slane %v2741_v43, 4 }
  0x41   : > { %1869 = vmatmul.mubr.msk.f32.gmra.mrb[2].mxu0 %vm299_vm2, %v984_v6  ;;  %456 = vmatprep.mubr.f32.mxu1 %v2249_v7  ;;  %v994_v2 = vsel %vm979_vm3, %v991_v55, %v993_v61  ;;  %v996_v5 = vsel %vm979_vm3, %v993_v61, %v995_v3  ;;  %v997_v6 = vrot.slane %v2621_v28, 3  ;;  %v1277_v55 = vrot.slane %v2673_v60, 4 }
  0x42   : > { %1121 = vmatprep.mubr.f32.mxu0 %v2249_v7  ;;  %2021 = vmatpush1.bf16.msra.mxu0 %v2020_v14  ;;  %v999_v14 = vrot.slane %v2642_v41, 3  ;;  %v731_v61 = vrot.slane %v2741_v43, 2 }
  0x43   : > { %2023 = vmatprep.subr.bf16.mxu0 %v2022_v15  ;;  %v998_v10 = vsel %vm979_vm3, %v995_v3, %v997_v6  ;;  %v1285_v3 = vrot.slane %v2658_v49, 4 }
  0x44   : > { %1798 = vmatmul.mubr.msk.f32.gmra.mrb[20].mxu1 %vm299_vm2, %v288_v22  ;;  %v1000_v15 = vsel %vm979_vm3, %v997_v6, %v999_v14 }
  0x45   : > { %1870 = vmatmul.mubr.msk.f32.gmra.mrb[4].mxu0 %vm299_vm2, %v986_v24  ;;  %462 = vmatprep.mubr.f32.mxu1 %v2249_v7  ;;  %v1257_v24 = vrot.slane %v2436_v48, 4 }
  0x46   : > { %1127 = vmatprep.mubr.f32.mxu0 %v2249_v7  ;;  %2025 = vmatpush1.bf16.msra.mxu0 %v2024_v29  ;;  %v1259_v29 = vrot.slane %v2471_v1, 4 }
  0x47   : > { %2027 = vmatprep.subr.bf16.mxu0 %v2026_v30  ;;  %v1258_v8 = vsel %vm1255_vm4, %v1256_v23, %v1257_v24  ;;  %v1263_v30 = vrot.slane %v2519_v32, 4 }
  0x48   : > { %1799 = vmatmul.mubr.msk.f32.gmra.mrb[22].mxu1 %vm299_vm2, %v290_v37  ;;  %v1269_v37 = vrot.slane %v2601_v20, 4 }
  0x49   : > { %1871 = vmatmul.mubr.msk.f32.gmra.mrb[6].mxu0 %vm299_vm2, %v988_v40  ;;  %468 = vmatprep.mubr.f32.mxu1 %v2249_v7  ;;  %v1273_v40 = vrot.slane %v2621_v28, 4 }
  0x4a   : > { %1133 = vmatprep.mubr.f32.mxu0 %v2249_v7  ;;  %2029 = vmatpush1.bf16.msra.mxu0 %v2028_v45  ;;  %v1275_v45 = vrot.slane %v2642_v41, 4 }
  0x4b   : > { %v1274_v42 = vsel %vm1255_vm4, %v1271_v38, %v1273_v40 }
  0x4c   : > { %1800 = vmatmul.mubr.msk.f32.gmra.mrb[24].mxu1 %vm299_vm2, %v292_v46 }
  0x4d   : > { %1872 = vmatmul.mubr.msk.f32.gmra.mrb[8].mxu0 %vm299_vm2, %v990_v53  ;;  %474 = vmatprep.mubr.f32.mxu1 %v2249_v7  ;;  %v1276_v53 = vsel %vm1255_vm4, %v1273_v40, %v1275_v45 }
  0x4e   : > { %1139 = vmatprep.mubr.f32.mxu0 %v2249_v7 }
  0x50   : > { %1801 = vmatmul.mubr.msk.f32.gmra.mrb[26].mxu1 %vm299_vm2, %v294_v57  ;;  %v729_v57 = vrot.slane %v2724_v27, 2 }
  0x51   : > { %1873 = vmatmul.mubr.msk.f32.gmra.mrb[10].mxu0 %vm299_vm2, %v992_v59  ;;  %480 = vmatprep.mubr.f32.mxu1 %v2249_v7  ;;  %v1281_v59 = vrot.slane %v2724_v27, 4 }
  0x52   : > { %1145 = vmatprep.mubr.f32.mxu0 %v2249_v7 }
  0x54   : > { %1802 = vmatmul.mubr.msk.f32.gmra.mrb[28].mxu1 %vm299_vm2, %v296_v62 }
  0x55   : > { %1874 = vmatmul.mubr.msk.f32.gmra.mrb[12].mxu0 %vm299_vm2, %v994_v2  ;;  %486 = vmatprep.mubr.f32.mxu1 %v2249_v7  ;;  %v1284_v2 = vsel %vm1255_vm4, %v1281_v59, %v1283_v63 }
  0x56   : > { %1151 = vmatprep.mubr.f32.mxu0 %v2249_v7 }
  0x58   : > { %1803 = vmatmul.mubr.msk.f32.gmra.mrb[30].mxu1 %vm299_vm2, %v298_v4  ;;  %v1286_v4 = vsel %vm1255_vm4, %v1283_v63, %v1285_v3 }
  0x59   : > { %1875 = vmatmul.mubr.msk.f32.gmra.mrb[14].mxu0 %vm299_vm2, %v996_v5  ;;  %589 = vmatprep.mubr.f32.mxu1 %v2249_v7  ;;  %v1287_v5 = vrot.slane %v2661_v50, 4 }
  0x5a   : > { %1157 = vmatprep.mubr.f32.mxu0 %v2249_v7 }
  0x5b   : > { %v1288_v6 = vsel %vm1255_vm4, %v1285_v3, %v1287_v5 }
  0x5c   : > { %1804 = vmatmul.mubr.msk.f32.vlgmr.msra.gmra.mrb[0].mxu1 %vm299_vm2, %v2433_v47  ;;  %v1260_v47 = vsel %vm1255_vm4, %v1257_v24, %v1259_v29 }
  0x5d   : > { %1876 = vmatmul.mubr.msk.f32.gmra.mrb[16].mxu0 %vm299_vm2, %v998_v10  ;;  %2034 = vmatpush1.bf16.msra.mxu1 %v2339_v13  ;;  %v1002_v13 = vsel %vm979_vm3, %v999_v14, %v1001_v16 }
  0x5e   : > { %595 = vmatprep.mubr.f32.mxu1 %v2249_v7  ;;  %1163 = vmatprep.mubr.f32.mxu0 %v2249_v7 }
  0x5f   : > { %2031 = vmatprep.subr.bf16.mxu1 %v2351_v18  ;;  %v1004_v18 = vsel %vm979_vm3, %v1001_v16, %v1003_v17 }
  0x60   : > { %1805 = vmatmul.mubr.msk.f32.gmra.mrb[2].mxu1 %vm299_vm2, %v2436_v48  ;;  %v1261_v48 = vrot.slane %v2485_v12, 4 }
  0x61   : > { %1877 = vmatmul.mubr.msk.f32.gmra.mrb[18].mxu0 %vm299_vm2, %v1000_v15  ;;  %601 = vmatprep.mubr.f32.mxu1 %v2249_v7 }
  0x62   : > { %1169 = vmatprep.mubr.f32.mxu0 %v2249_v7  ;;  %2035 = vmatpush1.bf16.msra.mxu1 %v2375_v26  ;;  %v1006_v26 = vsel %vm979_vm3, %v1003_v17, %v1005_v19 }
  0x63   : > { %2032 = vmatprep.subr.bf16.mxu1 %v2389_v31  ;;  %v1007_v31 = vrot.slane %v2741_v43, 3 }
  0x64   : > { %1806 = vmatmul.mubr.msk.f32.gmra.mrb[4].mxu1 %vm299_vm2, %v2471_v1  ;;  %v1262_v1 = vsel %vm1255_vm4, %v1259_v29, %v1261_v48 }
  0x65   : > { %1878 = vmatmul.mubr.msk.f32.gmra.mrb[20].mxu0 %vm299_vm2, %v1002_v13  ;;  %607 = vmatprep.mubr.f32.mxu1 %v2249_v7 }
  0x66   : > { %1175 = vmatprep.mubr.f32.mxu0 %v2249_v7  ;;  %2036 = vmatpush1.bf16.msra.mxu1 %v2412_v39  ;;  %v1008_v39 = vsel %vm979_vm3, %v1005_v19, %v1007_v31  ;;  %v1516_v19 = vlaneseq }
  0x67   : > { %2033 = vmatprep.subr.bf16.mxu1 %v2424_v44  ;;  %v1009_v44 = vrot.slane %v2658_v49, 3 }
  0x68   : > { %1807 = vmatmul.mubr.msk.f32.gmra.mrb[6].mxu1 %vm299_vm2, %v2485_v12  ;;  %v1264_v12 = vsel %vm1255_vm4, %v1261_v48, %v1263_v30 }
  0x69   : > { %1879 = vmatmul.mubr.msk.f32.gmra.mrb[22].mxu0 %vm299_vm2, %v1004_v18  ;;  %613 = vmatprep.mubr.f32.mxu1 %v2249_v7  ;;  %v1012_v22 = vsel %vm979_vm3, %v1009_v44, %v1011_v21 }
  0x6a   : > { %1181 = vmatprep.mubr.f32.mxu0 %v2249_v7  ;;  %2037 = vmatpush1.bf16.msra.mxu1 %v2453_v56  ;;  %v1010_v56 = vsel %vm979_vm3, %v1007_v31, %v1009_v44 }
  0x6c   : > { %1808 = vmatmul.mubr.msk.f32.gmra.mrb[8].mxu1 %vm299_vm2, %v2519_v32  ;;  %v1266_v32 = vsel %vm1255_vm4, %v1263_v30, %v1265_v35 }
  0x6d   : > { %1880 = vmatmul.mubr.msk.f32.gmra.mrb[24].mxu0 %vm299_vm2, %v1006_v26  ;;  %619 = vmatprep.mubr.f32.mxu1 %v2249_v7 }
  0x6e   : > { %1187 = vmatprep.mubr.f32.mxu0 %v2249_v7 }
  0x70   : > { %1809 = vmatmul.mubr.msk.f32.gmra.mrb[10].mxu1 %vm299_vm2, %v2555_v52  ;;  %v1268_v52 = vsel %vm1255_vm4, %v1265_v35, %v1267_v36 }
  0x71   : > { %1881 = vmatmul.mubr.msk.f32.gmra.mrb[26].mxu0 %vm299_vm2, %v1008_v39  ;;  %625 = vmatprep.mubr.f32.mxu1 %v2249_v7 }
  0x72   : > { %1193 = vmatprep.mubr.f32.mxu0 %v2249_v7 }
  0x74   : > { %1810 = vmatmul.mubr.msk.f32.gmra.mrb[12].mxu1 %vm299_vm2, %v2590_v9  ;;  %v1270_v9 = vsel %vm1255_vm4, %v1267_v36, %v1269_v37 }
  0x75   : > { %1882 = vmatmul.mubr.msk.f32.gmra.mrb[28].mxu0 %vm299_vm2, %v1010_v56  ;;  %631 = vmatprep.mubr.f32.mxu1 %v2249_v7 }
  0x76   : > { %1199 = vmatprep.mubr.f32.mxu0 %v2249_v7 }
  0x78   : > { %1811 = vmatmul.mubr.msk.f32.gmra.mrb[14].mxu1 %vm299_vm2, %v2601_v20  ;;  %v1272_v20 = vsel %vm1255_vm4, %v1269_v37, %v1271_v38 }
  0x79   : > { %1883 = vmatmul.mubr.msk.f32.gmra.mrb[30].mxu0 %vm299_vm2, %v1012_v22  ;;  %637 = vmatprep.mubr.f32.mxu1 %v2249_v7  ;;  %v1514_v22 = vld [vmem:[%s3051_s2] sm:$0x3] }
  0x7a   : > { %1385 = vmatprep.mubr.f32.mxu0 %v2249_v7 }
  0x7c   : > { %1812 = vmatmul.mubr.msk.f32.gmra.mrb[16].mxu1 %vm299_vm2, %v2613_v25  ;;  %v723_v25 = vrot.slane %v2642_v41, 2 }
  0x7d   : > { %1900 = vmatmul.mubr.msk.f32.vlgmr.msra.gmra.mrb[0].mxu0 %vm299_vm2, %v1258_v8  ;;  %643 = vmatprep.mubr.f32.mxu1 %v2249_v7 }
  0x7e   : > { %1391 = vmatprep.mubr.f32.mxu0 %v2249_v7  ;;  %v724_v46 = vsel %vm703_vm1, %v721_v33, %v723_v25  ;;  %v1278_v33 = vsel %vm1255_vm4, %v1275_v45, %v1277_v55 }
  0x80   : > { %1813 = vmatmul.mubr.msk.f32.gmra.mrb[18].mxu1 %vm299_vm2, %v2621_v28  ;;  %v727_v28 = vrot.slane %v2701_v11, 2 }
  0x81   : > { %1901 = vmatmul.mubr.msk.f32.gmra.mrb[2].mxu0 %vm299_vm2, %v1260_v47  ;;  %649 = vmatprep.mubr.f32.mxu1 %v2249_v7 }
  0x82   : > { %1397 = vmatprep.mubr.f32.mxu0 %v2249_v7 }
  0x84   : > { %1814 = vmatmul.mubr.msk.f32.gmra.mrb[20].mxu1 %vm299_vm2, %v2642_v41  ;;  %v1279_v41 = vrot.slane %v2701_v11, 4 }
  0x85   : > { %1902 = vmatmul.mubr.msk.f32.gmra.mrb[4].mxu0 %vm299_vm2, %v1262_v1  ;;  %655 = vmatprep.mubr.f32.mxu1 %v2249_v7 }
  0x86   : > { %1403 = vmatprep.mubr.f32.mxu0 %v2249_v7  ;;  %v1280_v58 = vsel %vm1255_vm4, %v1277_v55, %v1279_v41  ;;  %v1282_v62 = vsel %vm1255_vm4, %v1279_v41, %v1281_v59 }
  0x88   : > { %1815 = vmatmul.mubr.msk.f32.gmra.mrb[22].mxu1 %vm299_vm2, %v2673_v60  ;;  %v728_v60 = vsel %vm703_vm1, %v725_v51, %v727_v28 }
  0x89   : > { %1903 = vmatmul.mubr.msk.f32.gmra.mrb[6].mxu0 %vm299_vm2, %v1264_v12  ;;  %661 = vmatprep.mubr.f32.mxu1 %v2249_v7 }
  0x8a   : > { %1409 = vmatprep.mubr.f32.mxu0 %v2249_v7 }
  0x8c   : > { %1816 = vmatmul.mubr.msk.f32.gmra.mrb[24].mxu1 %vm299_vm2, %v2701_v11  ;;  %v730_v11 = vsel %vm703_vm1, %v727_v28, %v729_v57 }
  0x8d   : > { %1904 = vmatmul.mubr.msk.f32.gmra.mrb[8].mxu0 %vm299_vm2, %v1266_v32  ;;  %667 = vmatprep.mubr.f32.mxu1 %v2249_v7 }
  0x8e   : > { %1415 = vmatprep.mubr.f32.mxu0 %v2249_v7 }
  0x90   : > { %1817 = vmatmul.mubr.msk.f32.gmra.mrb[26].mxu1 %vm299_vm2, %v2724_v27  ;;  %v732_v27 = vsel %vm703_vm1, %v729_v57, %v731_v61 }
  0x91   : > { %1905 = vmatmul.mubr.msk.f32.gmra.mrb[10].mxu0 %vm299_vm2, %v1268_v52  ;;  %673 = vmatprep.mubr.f32.mxu1 %v2249_v7 }
  0x92   : > { %1421 = vmatprep.mubr.f32.mxu0 %v2249_v7 }
  0x94   : > { %1818 = vmatmul.mubr.msk.f32.gmra.mrb[28].mxu1 %vm299_vm2, %v2741_v43  ;;  %v734_v43 = vsel %vm703_vm1, %v731_v61, %v733_v54 }
  0x95   : > { %1906 = vmatmul.mubr.msk.f32.gmra.mrb[12].mxu0 %vm299_vm2, %v1270_v9  ;;  %679 = vmatprep.mubr.f32.mxu1 %v2249_v7 }
  0x96   : > { %1427 = vmatprep.mubr.f32.mxu0 %v2249_v7 }
  0x98   : > { %1819 = vmatmul.mubr.msk.f32.gmra.mrb[30].mxu1 %vm299_vm2, %v2658_v49 }
  0x99   : > { %1907 = vmatmul.mubr.msk.f32.gmra.mrb[14].mxu0 %vm299_vm2, %v1272_v20  ;;  %881 = vmatprep.mubr.f32.mxu1 %v2249_v7 }
  0x9a   : > { %1433 = vmatprep.mubr.f32.mxu0 %v2249_v7 }
  0x9c   : > { %1844 = vmatmul.mubr.msk.f32.vlgmr.msra.gmra.mrb[16].mxu1 %vm299_vm2, %v2631_v34  ;;  %v726_v34 = vsel %vm703_vm1, %v723_v25, %v725_v51 }
  0x9d   : > { %1908 = vmatmul.mubr.msk.f32.gmra.mrb[16].mxu0 %vm299_vm2, %v1274_v42  ;;  %887 = vmatprep.mubr.f32.mxu1 %v2249_v7 }
  0x9e   : > { %1439 = vmatprep.mubr.f32.mxu0 %v2249_v7 }
  0xa0   : > { %1845 = vmatmul.mubr.msk.f32.gmra.mrb[18].mxu1 %vm299_vm2, %v724_v46 }
  0xa1   : > { %1909 = vmatmul.mubr.msk.f32.gmra.mrb[18].mxu0 %vm299_vm2, %v1276_v53  ;;  %893 = vmatprep.mubr.f32.mxu1 %v2249_v7 }
  0xa2   : > { %1445 = vmatprep.mubr.f32.mxu0 %v2249_v7 }
  0xa4   : > { %1846 = vmatmul.mubr.msk.f32.gmra.mrb[20].mxu1 %vm299_vm2, %v726_v34 }
  0xa5   : > { %1910 = vmatmul.mubr.msk.f32.gmra.mrb[20].mxu0 %vm299_vm2, %v1278_v33  ;;  %899 = vmatprep.mubr.f32.mxu1 %v2249_v7 }
  0xa6   : > { %1451 = vmatprep.mubr.f32.mxu0 %v2249_v7 }
  0xa8   : > { %1847 = vmatmul.mubr.msk.f32.gmra.mrb[22].mxu1 %vm299_vm2, %v728_v60 }
  0xa9   : > { %1911 = vmatmul.mubr.msk.f32.gmra.mrb[22].mxu0 %vm299_vm2, %v1280_v58  ;;  %905 = vmatprep.mubr.f32.mxu1 %v2249_v7 }
  0xaa   : > { %1457 = vmatprep.mubr.f32.mxu0 %v2249_v7 }
  0xac   : > { %1848 = vmatmul.mubr.msk.f32.gmra.mrb[24].mxu1 %vm299_vm2, %v730_v11 }
  0xad   : > { %1912 = vmatmul.mubr.msk.f32.gmra.mrb[24].mxu0 %vm299_vm2, %v1282_v62  ;;  %911 = vmatprep.mubr.f32.mxu1 %v2249_v7 }
  0xae   : > { %1463 = vmatprep.mubr.f32.mxu0 %v2249_v7 }
  0xb0   : > { %1849 = vmatmul.mubr.msk.f32.gmra.mrb[26].mxu1 %vm299_vm2, %v732_v27 }
  0xb1   : > { %1913 = vmatmul.mubr.msk.f32.gmra.mrb[26].mxu0 %vm299_vm2, %v1284_v2  ;;  %917 = vmatprep.mubr.f32.mxu1 %v2249_v7 }
  0xb2   : > { %1469 = vmatprep.mubr.f32.mxu0 %v2249_v7 }
  0xb4   : > { %1850 = vmatmul.mubr.msk.f32.gmra.mrb[28].mxu1 %vm299_vm2, %v734_v43 }
  0xb5   : > { %1914 = vmatmul.mubr.msk.f32.gmra.mrb[28].mxu0 %vm299_vm2, %v1286_v4  ;;  %923 = vmatprep.mubr.f32.mxu1 %v2249_v7 }
  0xb6   : > { %1475 = vmatprep.mubr.f32.mxu0 %v2249_v7 }
  0xb8   : > { %1851 = vmatmul.mubr.msk.f32.gmra.mrb[30].mxu1 %vm299_vm2, %v2684_v0  ;;  %v1517_v0 = vshrl.u32 %v1516_v19, 7 }
  0xb9   : > { %1915 = vmatmul.mubr.msk.f32.gmra.mrb[30].mxu0 %vm299_vm2, %v1288_v6 }
  0xba   : > { %v1518_v56 = vsub.s32 0, %v1517_v0  ;;  %v1522_v23 = vsub.s32 1, %v1517_v0 }
  0xbc   : > { %v2973_v24 = vrot.slane %v1514_v22, %v1518_v56  ;;  %v2975_v29 = vrot.slane %v1514_v22, %v1522_v23 }
 0x12f   : > { %v591_v49 = vpop.f32.mrb[0].mxu1 }
 0x130   : > { %v593_v54 = vpop.f32.mrb[1].mxu1 }
 0x133   : > { %v597_v10 = vpop.f32.mrb[2].mxu1 }
 0x134   : > { %v599_v50 = vpop.f32.mrb[3].mxu1 }
 0x137   : > { %v603_v14 = vpop.f32.mrb[4].mxu1 }
 0x138   : > { %v605_v15 = vpop.f32.mrb[5].mxu1 }
 0x13b   : > { %v609_v16 = vpop.f32.mrb[6].mxu1 }
 0x13c   : > { %v611_v13 = vpop.f32.mrb[7].mxu1 }
 0x13f   : > { %v615_v17 = vpop.f32.mrb[8].mxu1 }
 0x140   : > { %v617_v18 = vpop.f32.mrb[9].mxu1 }
 0x143   : > { %v621_v7 = vpop.f32.mrb[10].mxu1 }
 0x144   : > { %v623_v26 = vpop.f32.mrb[11].mxu1 }
 0x147   : > { %v2961_v31 = vpop.f32.mrb[12].mxu1 }
 0x148   : > { %v2963_v39 = vpop.f32.mrb[13].mxu1 }
 0x14b   : > { %v2965_v44 = vpop.f32.mrb[14].mxu1 }
 0x14c   : > { %v2968_v21 = vpop.f32.mrb[15].mxu1 }
 0x150   : > { %v1387_v8 = vpop.f32.mrb[0].mxu0 }
 0x151   : > { %v2038_v47 = vadd.f32 %v1387_v8, %v591_v49  ;;  %v1389_v48 = vpop.f32.mrb[1].mxu0 }
 0x152   : > { %v2039_v1 = vadd.f32 %v1389_v48, %v593_v54 }
 0x153   : > { %v1526_v30 = vadd.f32 %v2038_v47, %v2973_v24 }
 0x154   : > { %v1527_v12 = vadd.f32 %v2039_v1, %v2975_v29  ;;  %v1393_v35 = vpop.f32.mrb[2].mxu0 }
 0x155   : > { %v2040_v32 = vadd.f32 %v1393_v35, %v597_v10  ;;  %v1395_v36 = vpop.f32.mrb[3].mxu0 }
 0x156   : > { %v1934_v52 = vpack.c.bf16 %v1527_v12, %v1526_v30  ;;  %v2041_v37 = vadd.f32 %v1395_v36, %v599_v50 }
 0x157   : > { %v1528_v9 = vadd.f32 %v2040_v32, %v2973_v24 }
 0x158   : > { %1654 = vst [vmem:[%s2982_s11] sm:$0xff] %v1934_v52  ;;  %v1529_v38 = vadd.f32 %v2041_v37, %v2975_v29  ;;  %v1399_v20 = vpop.f32.mrb[4].mxu0 }
 0x159   : > { %v2042_v40 = vadd.f32 %v1399_v20, %v603_v14  ;;  %v1401_v25 = vpop.f32.mrb[5].mxu0 }
 0x15a   : > { %v1935_v42 = vpack.c.bf16 %v1529_v38, %v1528_v9  ;;  %v2043_v45 = vadd.f32 %v1401_v25, %v605_v15 }
 0x15b   : > { %v1530_v46 = vadd.f32 %v2042_v40, %v2973_v24 }
 0x15c   : > { %1655 = vst [vmem:[%s2982_s11 + $0x8] sm:$0xff] %v1935_v42  ;;  %v1531_v51 = vadd.f32 %v2043_v45, %v2975_v29  ;;  %v1405_v53 = vpop.f32.mrb[6].mxu0 }
 0x15d   : > { %v2044_v55 = vadd.f32 %v1405_v53, %v609_v16  ;;  %v1407_v34 = vpop.f32.mrb[7].mxu0 }
 0x15e   : > { %v1936_v28 = vpack.c.bf16 %v1531_v51, %v1530_v46  ;;  %v2045_v33 = vadd.f32 %v1407_v34, %v611_v13 }
 0x15f   : > { %v1532_v41 = vadd.f32 %v2044_v55, %v2973_v24 }
 0x160   : > { %1656 = vst [vmem:[%s2982_s11 + $0x10] sm:$0xff] %v1936_v28  ;;  %v1533_v60 = vadd.f32 %v2045_v33, %v2975_v29  ;;  %v1411_v57 = vpop.f32.mrb[8].mxu0 }
 0x161   : > { %v2046_v58 = vadd.f32 %v1411_v57, %v615_v17  ;;  %v1413_v59 = vpop.f32.mrb[9].mxu0 }
 0x162   : > { %v1937_v11 = vpack.c.bf16 %v1533_v60, %v1532_v41  ;;  %v2047_v61 = vadd.f32 %v1413_v59, %v617_v18 }
 0x163   : > { %v1534_v62 = vadd.f32 %v2046_v58, %v2973_v24 }
 0x164   : > { %1657 = vst [vmem:[%s2982_s11 + $0x18] sm:$0xff] %v1937_v11  ;;  %v1535_v63 = vadd.f32 %v2047_v61, %v2975_v29  ;;  %v1417_v27 = vpop.f32.mrb[10].mxu0 }
 0x165   : > { %v2048_v2 = vadd.f32 %v1417_v27, %v621_v7  ;;  %v1419_v3 = vpop.f32.mrb[11].mxu0 }
 0x166   : > { %v1938_v43 = vpack.c.bf16 %v1535_v63, %v1534_v62  ;;  %v2049_v4 = vadd.f32 %v1419_v3, %v623_v26 }
 0x167   : > { %v1536_v5 = vadd.f32 %v2048_v2, %v2973_v24 }
 0x168   : > { %1658 = vst [vmem:[%s2982_s11 + $0x20] sm:$0xff] %v1938_v43  ;;  %v1537_v6 = vadd.f32 %v2049_v4, %v2975_v29  ;;  %v1423_v49 = vpop.f32.mrb[12].mxu0 }
 0x169   : > { %v2050_v54 = vadd.f32 %v1423_v49, %v2961_v31  ;;  %v1425_v10 = vpop.f32.mrb[13].mxu0 }
 0x16a   : > { %v1939_v50 = vpack.c.bf16 %v1537_v6, %v1536_v5  ;;  %v2051_v14 = vadd.f32 %v1425_v10, %v2963_v39 }
 0x16b   : > { %v1538_v15 = vadd.f32 %v2050_v54, %v2973_v24 }
 0x16c   : > { %1659 = vst [vmem:[%s2982_s11 + $0x28] sm:$0xff] %v1939_v50  ;;  %v1539_v16 = vadd.f32 %v2051_v14, %v2975_v29  ;;  %v1429_v13 = vpop.f32.mrb[14].mxu0 }
 0x16d   : > { %v2052_v17 = vadd.f32 %v1429_v13, %v2965_v44  ;;  %v1431_v18 = vpop.f32.mrb[15].mxu0 }
 0x16e   : > { %v1940_v7 = vpack.c.bf16 %v1539_v16, %v1538_v15  ;;  %v2053_v19 = vadd.f32 %v1431_v18, %v2968_v21 }
 0x16f   : > { %v1540_v26 = vadd.f32 %v2052_v17, %v2973_v24  ;;  %v883_v31 = vpop.f32.mrb[16].mxu1 }
 0x170   : > { %1660 = vst [vmem:[%s2982_s11 + $0x30] sm:$0xff] %v1940_v7  ;;  %v1541_v0 = vadd.f32 %v2053_v19, %v2975_v29  ;;  %v1435_v39 = vpop.f32.mrb[16].mxu0  ;;  %v885_v56 = vpop.f32.mrb[17].mxu1 }
 0x171   : > { %v2054_v22 = vadd.f32 %v1435_v39, %v883_v31  ;;  %v1437_v23 = vpop.f32.mrb[17].mxu0 }
 0x172   : > { %v1941_v8 = vpack.c.bf16 %v1541_v0, %v1540_v26  ;;  %v2055_v47 = vadd.f32 %v1437_v23, %v885_v56 }
 0x173   : > { %v1542_v44 = vadd.f32 %v2054_v22, %v2973_v24  ;;  %v889_v48 = vpop.f32.mrb[18].mxu1 }
 0x174   : > { %1661 = vst [vmem:[%s2982_s11 + $0x38] sm:$0xff] %v1941_v8  ;;  %v1543_v1 = vadd.f32 %v2055_v47, %v2975_v29  ;;  %v1441_v21 = vpop.f32.mrb[18].mxu0  ;;  %v891_v30 = vpop.f32.mrb[19].mxu1 }
 0x175   : > { %v2056_v12 = vadd.f32 %v1441_v21, %v889_v48  ;;  %v1443_v35 = vpop.f32.mrb[19].mxu0 }
 0x176   : > { %v1942_v32 = vpack.c.bf16 %v1543_v1, %v1542_v44  ;;  %v2057_v36 = vadd.f32 %v1443_v35, %v891_v30 }
 0x177   : > { %v1544_v52 = vadd.f32 %v2056_v12, %v2973_v24  ;;  %v895_v37 = vpop.f32.mrb[20].mxu1 }
 0x178   : > { %1662 = vst [vmem:[%s2982_s11 + $0x40] sm:$0xff] %v1942_v32  ;;  %v1545_v9 = vadd.f32 %v2057_v36, %v2975_v29  ;;  %v1447_v38 = vpop.f32.mrb[20].mxu0  ;;  %v897_v20 = vpop.f32.mrb[21].mxu1 }
 0x179   : > { %v2058_v40 = vadd.f32 %v1447_v38, %v895_v37  ;;  %v1449_v25 = vpop.f32.mrb[21].mxu0 }
 0x17a   : > { %v1943_v42 = vpack.c.bf16 %v1545_v9, %v1544_v52  ;;  %v2059_v45 = vadd.f32 %v1449_v25, %v897_v20 }
 0x17b   : > { %v1546_v46 = vadd.f32 %v2058_v40, %v2973_v24  ;;  %v901_v51 = vpop.f32.mrb[22].mxu1 }
 0x17c   : > { %1663 = vst [vmem:[%s2982_s11 + $0x48] sm:$0xff] %v1943_v42  ;;  %v1547_v53 = vadd.f32 %v2059_v45, %v2975_v29  ;;  %v1453_v55 = vpop.f32.mrb[22].mxu0  ;;  %v903_v34 = vpop.f32.mrb[23].mxu1 }
 0x17d   : > { %v2060_v28 = vadd.f32 %v1453_v55, %v901_v51  ;;  %v1455_v33 = vpop.f32.mrb[23].mxu0 }
 0x17e   : > { %v1944_v41 = vpack.c.bf16 %v1547_v53, %v1546_v46  ;;  %v2061_v60 = vadd.f32 %v1455_v33, %v903_v34 }
 0x17f   : > { %v1548_v57 = vadd.f32 %v2060_v28, %v2973_v24  ;;  %v907_v58 = vpop.f32.mrb[24].mxu1 }
 0x180   : > { %1664 = vst [vmem:[%s2982_s11 + $0x50] sm:$0xff] %v1944_v41  ;;  %v1549_v59 = vadd.f32 %v2061_v60, %v2975_v29  ;;  %v1459_v11 = vpop.f32.mrb[24].mxu0  ;;  %v909_v61 = vpop.f32.mrb[25].mxu1 }
 0x181   : > { %v2062_v62 = vadd.f32 %v1459_v11, %v907_v58  ;;  %v1461_v63 = vpop.f32.mrb[25].mxu0 }
 0x182   : > { %v1945_v27 = vpack.c.bf16 %v1549_v59, %v1548_v57  ;;  %v2063_v2 = vadd.f32 %v1461_v63, %v909_v61 }
 0x183   : > { %v1550_v3 = vadd.f32 %v2062_v62, %v2973_v24  ;;  %v913_v43 = vpop.f32.mrb[26].mxu1 }
 0x184   : > { %1665 = vst [vmem:[%s2982_s11 + $0x58] sm:$0xff] %v1945_v27  ;;  %v1551_v4 = vadd.f32 %v2063_v2, %v2975_v29  ;;  %v1465_v5 = vpop.f32.mrb[26].mxu0  ;;  %v915_v6 = vpop.f32.mrb[27].mxu1 }
 0x185   : > { %v2064_v49 = vadd.f32 %v1465_v5, %v913_v43  ;;  %v1467_v54 = vpop.f32.mrb[27].mxu0 }
 0x186   : > { %v1946_v10 = vpack.c.bf16 %v1551_v4, %v1550_v3  ;;  %v2065_v50 = vadd.f32 %v1467_v54, %v915_v6 }
 0x187   : > { %v1552_v14 = vadd.f32 %v2064_v49, %v2973_v24  ;;  %v919_v15 = vpop.f32.mrb[28].mxu1 }
 0x188   : > { %1666 = vst [vmem:[%s2982_s11 + $0x60] sm:$0xff] %v1946_v10  ;;  %v1553_v16 = vadd.f32 %v2065_v50, %v2975_v29  ;;  %v1471_v13 = vpop.f32.mrb[28].mxu0  ;;  %v921_v17 = vpop.f32.mrb[29].mxu1 }
 0x189   : > { %v2066_v18 = vadd.f32 %v1471_v13, %v919_v15  ;;  %v1473_v7 = vpop.f32.mrb[29].mxu0 }
 0x18a   : > { %v1947_v19 = vpack.c.bf16 %v1553_v16, %v1552_v14  ;;  %v2067_v26 = vadd.f32 %v1473_v7, %v921_v17 }
 0x18b   : > { %v1554_v31 = vadd.f32 %v2066_v18, %v2973_v24  ;;  %v925_v0 = vpop.f32.mrb[30].mxu1 }
 0x18c   : > { %1667 = vst [vmem:[%s2982_s11 + $0x68] sm:$0xff] %v1947_v19  ;;  %v1555_v39 = vadd.f32 %v2067_v26, %v2975_v29  ;;  %v1477_v56 = vpop.f32.mrb[30].mxu0  ;;  %v927_v22 = vpop.f32.mrb[31].mxu1 }
 0x18d   : > { %v2068_v23 = vadd.f32 %v1477_v56, %v925_v0  ;;  %v1479_v8 = vpop.f32.mrb[31].mxu0 }
 0x18e   : > { %v1948_v47 = vpack.c.bf16 %v1555_v39, %v1554_v31  ;;  %v2069_v44 = vadd.f32 %v1479_v8, %v927_v22 }
 0x18f   : > { %v1556_v48 = vadd.f32 %v2068_v23, %v2973_v24 }
 0x190   : > { %1668 = vst [vmem:[%s2982_s11 + $0x70] sm:$0xff] %v1948_v47  ;;  %v1557_v1 = vadd.f32 %v2069_v44, %v2975_v29 }
 0x192   : > { %v1949_v21 = vpack.c.bf16 %v1557_v1, %v1556_v48 }
 0x194   : > { %1669 = vst [vmem:[%s2982_s11 + $0x78] sm:$0xff] %v1949_v21 }
 0x195 PF: > { %s13_s16 = sadd.s32 1, %s2247_s16   ;;  %s3053_s12 = smov %s2239_s14 }
 0x196   : > { %p10_p7 = scmp.ge.s32.totalorder %s13_s16, 12   ;;  %s3054_s13 = smov %s2243_s15 }
 0x197   : > { %s3055_s14 = smov %s3058_s17  ;;  %s3056_s15 = smov %s3062_s18 }
 0x198   :  { %12 = sbr.rel (!%p10_p7) target bundleno = 3 (0x3), region = 67 }

// kernel: textcnn_forward.4
= control target key start
LH: loop header
LB: loop body
LE: loop exit
PB: predicated region body
PF: predicated region fallthrough
CT: control target
= control target key end

     0   :  { %7 = vsyncpa [#allocation4], 0  ;;  %s8908_s0 = inlined_call_operand.vmem [shape: bf16[2,163840], index: 0, kind: input, shape index: {}]   ;;  %s8909_s1 = inlined_call_operand.hbm [shape: bf16[163840,128], index: 1, kind: input, shape index: {}]   ;;  %s8910_s2 = inlined_call_operand.vmem [shape: f32[2,2,128], index: 2, kind: output, shape index: {}]  }
   0x1   :  { %9 = vsyncpa [#allocation4 + $0x1], 0  ;;  %s8111_s9 = smov 0   ;;  %s8113_s10 = smov 0  }
   0x2   :  { %s8115_s11 = smov 0   ;;  %s8117_s12 = smov 0  }
   0x3   :  { %s8119_s13 = smov 0   ;;  %s8121_s14 = smov 0  }
   0x4   :  { %s8123_s15 = smov 0   ;;  %s8125_s16 = smov 0  }
   0x5 LB: > { %s6166_s17 = sadd.s32 4294967295, %s8089_s16   ;;  %s24_s18 = sadd.s32 1, %s8081_s14  ;;  %s8089_s16 = sphi %s8125_s16, %s15_s16   ;;  %s8085_s15 = sphi %s8123_s15, %s8922_s15   ;;  %s8081_s14 = sphi %s8121_s14, %s8921_s14   ;;  %s8077_s13 = sphi %s8119_s13, %s8920_s13   ;;  %s8073_s12 = sphi %s8117_s12, %s8919_s12   ;;  %s8069_s11 = sphi %s8115_s11, %s8918_s11   ;;  %s8065_s10 = sphi %s8113_s10, %s8917_s10   ;;  %s8061_s9 = sphi %s8111_s9, %s8916_s9  }
   0x6   : > { %p25_p0 = scmp.ge.s32.totalorder %s24_s18, 10  ;;  %s27_s19 = sadd.s32 1, %s8085_s15 }
   0x7   : > { %s61_s20 = smul.u32 10, %s8085_s15  ;;  %s68_s21 = sadd.s32 1, %s8069_s11 }
   0x8   : > { %s8924_s18 = smov (%p25_p0, %s24_s18), 0  ;;  %s8926_s19 = smov (!%p25_p0, %s27_s19), %s8085_s15 }
   0x9   : > { %s62_s22 = sadd.s32 %s8081_s14, %s61_s20  ;;  %p75_p1 = scmp.ne.s32.totalorder %s8069_s11, %s8065_s10 }
   0xa   : > { %p29_p2 = scmp.ge.s32.totalorder %s8926_s19, 2  ;;  %p76_p3 = scmp.eq.s32.totalorder %s8089_s16, 0 }
   0xb   : > { %p81_p4 = scmp.ne.s32.totalorder %s8065_s10, %s8061_s9  ;;  %p82_p5 = scmp.eq.s32.totalorder %s6166_s17, 0 }
   0xc   : > { %s8928_s19 = smov (%p29_p2, %s8926_s19), 0  ;;  %p8164_p6 = por %p76_p3, %p75_p1 }
   0xd   : > { %p8168_p7 = por %p82_p5, %p81_p4  ;;  %s63_s25 = smul.u32 10, %s8928_s19 }
   0xe   : > { %p7404_p8 = scmp.lt.s32.totalorder %s8089_s16, 20  ;;  %s143_s26 = sand.u32 1, %s8069_s11  }
   0xf   : > { %s64_s27 = sadd.s32 %s63_s25, %s8924_s18  ;;  %s6170_s29 = sshll.u32 %s143_s26, 12 }
  0x10   : > { %s65_s28 = ssub.s32 %s62_s22, %s64_s27  ;;  %s6693_s30 = sshll.u32 %s62_s22, 16 }
  0x11   : > { %p66_p9 = scmp.eq.s32.totalorder %s65_s28, 0  ;;  %s147_s3 = scalar_lea.vmem [#allocation3], %s6170_s29 }
  0x12   : > { %s156_s4 = sshll.u32 %s147_s3, 4  ;;  %s8182_s8 = scalar_lea.hbm %s8909_s1, %s6693_s30  ;;  %s8184_s4 = int_to_ptr.vmem [resolvable:$true] %s156_s4 }
  0x13   : > { %s8177_s5 = scalar_select %p66_p9, %s8069_s11, %s68_s21  }
  0x14   : > { %p8188_p10 = pnand %p7404_p8, %p8164_p6  ;;  %s8194_s17 = scalar_lea.sflag [#allocation4], %s143_s26 }
  0x15   : > { %s7993_s20 = scalar_lea.hbm %s8182_s8, 65536  ;;  %s7998_s23 = scalar_lea.hbm %s8909_s1, 1310720 }
  0x16   : > { %p7994_p13 = scmp.ne.s32.totalorder %s8182_s8, %s7993_s20  ;;  %p7995_p0 = pneg %p8188_p10 }
  0x17   : > { %p7999_p3 = scmp.lt.u32.totalorder %s8182_s8, %s8909_s1  ;;  %p8000_p4 = scmp.lt.u32.totalorder %s7998_s23, %s7993_s20 }
  0x18   : > { %p7996_p1 = pnand %p7995_p0, %p7994_p13  ;;  %p8002_p6 = scmp.lt.u32.totalorder %s7993_s20, %s8182_s8 }
  0x19   : > { %p8001_p5 = por %p8000_p4, %p7999_p3 }
  0x1a   : > { %p7997_p2 = pneg %p7996_p1 }
  0x1b   : > { %p8003_p8 = por %p8002_p6, %p8001_p5 }
  0x1d   : > { %p8004_p9 = pnand %p8003_p8, %p7997_p2 }
  0x1f   : > { %8007 = shalt.err (!%p8004_p9)
}
  0x20   : > { %s8008_s26 = scalar_lea.vmem %s8184_s4, 65536  ;;  %s8091_s28 = smov [#allocation3]  }
  0x21   : > { %p8009_p13 = scmp.ne.s32.totalorder %s8184_s4, %s8008_s26  ;;  %s8013_s29 = sshll.u32 %s8091_s28, 4  ;;  %s8014_s29 = int_to_ptr.vmem [resolvable:$false] %s8013_s29 }
  0x22   : > { %s8015_s30 = scalar_lea.vmem %s8014_s29, 131072  ;;  %p8016_p12 = scmp.lt.s32.totalorder %s8184_s4, %s8014_s29 }
  0x23   : > { %p8011_p1 = pnand %p8009_p13, %p7995_p0  ;;  %p8017_p3 = scmp.lt.s32.totalorder %s8015_s30, %s8008_s26 }
  0x25   : > { %p8012_p11 = pneg %p8011_p1  ;;  %p8018_p4 = por %p8017_p3, %p8016_p12 }
  0x27   : > { %p8019_p5 = pnand %p8018_p4, %p8012_p11 }
  0x29   : > { %8022 = shalt.err (!%p8019_p5)
}
  0x2a   : > { %s8092_s3 = smov 64   ;;  %s8093_s6 = smov 4  }
  0x2b   : > { %7403 = dma.hbm_to_vmem [thread:$0]  (!%p8188_p10), %s8182_s8, 65536, %s8184_s4, %s8194_s17, %s8092_s3, %s8092_s3, %s8093_s6  }
  0x2c   : > { %p8914_p0 = scmp.lt.s32.totalorder %s8089_s16, 21  ;;  %p8915_p2 = scmp.ge.s32.totalorder %s8089_s16, 1 }
  0x2e   : > { %p165_p6 = pnand %p8915_p2, %p8914_p0 }
  0x2f   : > { %s170_s7 = sand.u32 (!%p165_p6), 1, %s8065_s10  }
  0x30   : > { %168 = sbr.rel (%p165_p6) target bundleno = 812 (0x32c), region = 28  ;;  %s6174_s20 = sshll.u32 (!%p165_p6), %s170_s7, 12 }
  0x31   : > { %s171_s21 = scalar_lea.sflag (!%p165_p6), [#allocation4], %s170_s7  ;;  %s8227_s22 = scalar_lea.vmem (!%p165_p6), [#allocation3], %s6174_s20 }
  0x37   : > { %8056 = dma.done.wait (%p8168_p7), %s171_s21, 65536  }
  0x38   : > { %8058 = vsyncadd (%p8168_p7), %s171_s21, 4294901760  ;;  %s200_s4 = smul.u32 10, %s8077_s13  ;;  %p212_p10 = scmp.lt.s32.totalorder %s8077_s13, 1 }
  0x39   : > { %p6177_p7 = scmp.ne.s32.totalorder %s8073_s12, 0 }
  0x3a   : > { %s201_s8 = sadd.s32 %s8073_s12, %s200_s4  ;;  %s8930_s13 = smov (!%p212_p10, %s8077_s13), 1  ;;  %v8094_v0 = vmov (!%p6177_p7), 0.0  }
  0x3b   : > { %s6175_s9 = sshll.u32 %s201_s8, 6  ;;  %s6176_s17 = sshll.u32 %s8930_s13, 1  ;;  %221 = vst [vmem:[#allocation2] sm:$0x3] (!%p6177_p7), %v8094_v0 }
  0x3c   : > { %p203_p11 = scmp.lt.s32.totalorder %s6175_s9, 1279  ;;  %s8245_s28 = scalar_lea.vmem %s8910_s2, %s6176_s17 }
  0x3d   : > { %220 = sbr.rel (%p6177_p7) target bundleno = 68 (0x44), region = 36 }
  0x3e   : > { %s8932_s9 = smov (!%p203_p11, %s6175_s9), 1279 }
  0x3f   : > { %s8240_s27 = scalar_lea.vmem %s8908_s0, %s8932_s9 }
  0x44 PF: > { %v7473_v1 = vld [vmem:[%s8227_s22 + $0x40] sm:$0xff]   ;;  %v7477_v5 = vld [vmem:[%s8227_s22 + $0x48] sm:$0xff]   ;;  %v7481_v9 = vld [vmem:[%s8227_s22 + $0x50] sm:$0xff]   ;;  %v1267_v29 = vlaneseq  ;;  %v8095_v37 = vmov 1966171168   ;;  %p6690_p12 = scmp.ne.s32.totalorder %s8073_s12, 9 }
  0x45   : > { %v7474_v2 = vld [vmem:[%s8227_s22 + $0xc0] sm:$0xff]   ;;  %6694 = vmatprep.subr.bf16.mxu0 %v7473_v1  ;;  %v7478_v6 = vld [vmem:[%s8227_s22 + $0xc8] sm:$0xff]   ;;  %v7482_v10 = vld [vmem:[%s8227_s22 + $0xd0] sm:$0xff]   ;;  %v1265_v38 = vunpack.c.l.s4 %v8095_v37 }
  0x46   : > { %v7475_v3 = vld [vmem:[%s8227_s22] sm:$0xff]   ;;  %6716 = vmatprep.subr.bf16.mxu1 %v7474_v2  ;;  %v7479_v7 = vld [vmem:[%s8227_s22 + $0x8] sm:$0xff]   ;;  %v7483_v11 = vld [vmem:[%s8227_s22 + $0x10] sm:$0xff]   ;;  %v1268_v34 = vshrl.u32 %v1267_v29, 7 }
  0x47   : > { %v7476_v4 = vld [vmem:[%s8227_s22 + $0x80] sm:$0xff]   ;;  %6695 = vmatpush3.bf16.msra.mxu0 %v7475_v3  ;;  %v7480_v8 = vld [vmem:[%s8227_s22 + $0x88] sm:$0xff]   ;;  %v7484_v12 = vld [vmem:[%s8227_s22 + $0x90] sm:$0xff]   ;;  %v1266_v41 = vunpack.c.0.s8 %v1265_v38 }
  0x48   : > { %6717 = vmatpush3.bf16.msra.mxu1 %v7476_v4  ;;  %6696 = vmatprep.subr.bf16.mxu0 %v7477_v5  ;;  %v7485_v13 = vld [vmem:[%s8227_s22 + $0x58] sm:$0xff]   ;;  %v7489_v17 = vld [vmem:[%s8227_s22 + $0x60] sm:$0xff]   ;;  %v7493_v21 = vld [vmem:[%s8227_s22 + $0x68] sm:$0xff]  }
  0x49   : > { %6718 = vmatprep.subr.bf16.mxu1 %v7478_v6  ;;  %v7486_v14 = vld [vmem:[%s8227_s22 + $0xd8] sm:$0xff]   ;;  %v7490_v18 = vld [vmem:[%s8227_s22 + $0xe0] sm:$0xff]   ;;  %v7494_v22 = vld [vmem:[%s8227_s22 + $0xe8] sm:$0xff]   ;;  %v8283_v42 = vsub.s32 %v1266_v41, %v1268_v34 }
  0x4a   : > { %v7487_v15 = vld [vmem:[%s8227_s22 + $0x18] sm:$0xff]   ;;  %v7491_v19 = vld [vmem:[%s8227_s22 + $0x20] sm:$0xff]   ;;  %v7495_v23 = vld [vmem:[%s8227_s22 + $0x28] sm:$0xff]  }
  0x4b   : > { %6697 = vmatpush3.bf16.msra.mxu0 %v7479_v7  ;;  %v7488_v16 = vld [vmem:[%s8227_s22 + $0x98] sm:$0xff]   ;;  %v7492_v20 = vld [vmem:[%s8227_s22 + $0xa0] sm:$0xff]   ;;  %v7496_v24 = vld [vmem:[%s8227_s22 + $0xa8] sm:$0xff]  }
  0x4c   : > { %6719 = vmatpush3.bf16.msra.mxu1 %v7480_v8  ;;  %6698 = vmatprep.subr.bf16.mxu0 %v7481_v9  ;;  %v7497_v25 = vld [vmem:[%s8227_s22 + $0x70] sm:$0xff]   ;;  %v7501_v30 = vld [vmem:[%s8227_s22 + $0x78] sm:$0xff]   ;;  %v7506_v36 = vld [vmem:[%s8227_s22 + $0x140] sm:$0xff]  }
  0x4d   : > { %6720 = vmatprep.subr.bf16.mxu1 %v7482_v10  ;;  %v7498_v26 = vld [vmem:[%s8227_s22 + $0xf0] sm:$0xff]   ;;  %v7502_v31 = vld [vmem:[%s8227_s22 + $0xf8] sm:$0xff]   ;;  %v7507_v39 = vld [vmem:[%s8227_s22 + $0x1c0] sm:$0xff]  }
  0x4e   : > { %v7499_v27 = vld [vmem:[%s8227_s22 + $0x30] sm:$0xff]   ;;  %v7503_v32 = vld [vmem:[%s8227_s22 + $0x38] sm:$0xff]   ;;  %v7508_v48 = vld [vmem:[%s8227_s22 + $0x100] sm:$0xff]  }
  0x4f   : > { %6699 = vmatpush3.bf16.msra.mxu0 %v7483_v11  ;;  %v7500_v28 = vld [vmem:[%s8227_s22 + $0xb0] sm:$0xff]   ;;  %v7504_v33 = vld [vmem:[%s8227_s22 + $0xb8] sm:$0xff]   ;;  %v7509_v50 = vld [vmem:[%s8227_s22 + $0x180] sm:$0xff]  }
  0x50   : > { %6721 = vmatpush3.bf16.msra.mxu1 %v7484_v12  ;;  %6700 = vmatprep.subr.bf16.mxu0 %v7485_v13  ;;  %v223_v35 = vld [vmem:[%s8240_s27] sm:$0xff]  ;;  %v7510_v53 = vld [vmem:[%s8227_s22 + $0x148] sm:$0xff]   ;;  %v7514_v59 = vld [vmem:[%s8227_s22 + $0x150] sm:$0xff]  }
  0x51   : > { %6722 = vmatprep.subr.bf16.mxu1 %v7486_v14  ;;  %v1263_v40 = vcombine.high %v223_v35, %v223_v35  ;;  %v1270_v43 = vrot.slane %v223_v35, %v8283_v42  ;;  %v7511_v55 = vld [vmem:[%s8227_s22 + $0x1c8] sm:$0xff]   ;;  %v7515_v60 = vld [vmem:[%s8227_s22 + $0x1d0] sm:$0xff]   ;;  %v7518_v63 = vld [vmem:[%s8227_s22 + $0x158] sm:$0xff]  }
  0x52   : > { %v7512_v56 = vld [vmem:[%s8227_s22 + $0x108] sm:$0xff]   ;;  %v7516_v61 = vld [vmem:[%s8227_s22 + $0x110] sm:$0xff]   ;;  %v7519_v0 = vld [vmem:[%s8227_s22 + $0x1d8] sm:$0xff]  }
  0x53   : > { %6701 = vmatpush3.bf16.msra.mxu0 %v7487_v15  ;;  %v8287_v44 = vrot.slane %v1263_v40, %v8283_v42  ;;  %v1278_v45 = vcombine.high %v1270_v43, %v1270_v43  ;;  %v1286_v46 = vrot.slane %v1270_v43, %v8283_v42  ;;  %v7513_v58 = vld [vmem:[%s8227_s22 + $0x188] sm:$0xff]   ;;  %v7517_v62 = vld [vmem:[%s8227_s22 + $0x190] sm:$0xff]   ;;  %v7520_v1 = vld [vmem:[%s8227_s22 + $0x118] sm:$0xff]  }
  0x54   : > { %6723 = vmatpush3.bf16.msra.mxu1 %v7488_v16  ;;  %6702 = vmatprep.subr.bf16.mxu0 %v7489_v17  ;;  %v7521_v2 = vld [vmem:[%s8227_s22 + $0x198] sm:$0xff]   ;;  %v7522_v3 = vld [vmem:[%s8227_s22 + $0x160] sm:$0xff]   ;;  %v7526_v7 = vld [vmem:[%s8227_s22 + $0x168] sm:$0xff]  }
  0x55   : > { %6724 = vmatprep.subr.bf16.mxu1 %v7490_v18  ;;  %v1279_v47 = vcombine.high %v8287_v44, %v8287_v44  ;;  %v1300_v49 = vrot.slane %v1278_v45, %v8283_v42  ;;  %v1308_v52 = vcombine.high %v1286_v46, %v1286_v46  ;;  %v7523_v4 = vld [vmem:[%s8227_s22 + $0x1e0] sm:$0xff]   ;;  %v7527_v8 = vld [vmem:[%s8227_s22 + $0x1e8] sm:$0xff]   ;;  %v7530_v11 = vld [vmem:[%s8227_s22 + $0x170] sm:$0xff]  }
  0x56   : > { %v7524_v5 = vld [vmem:[%s8227_s22 + $0x120] sm:$0xff]   ;;  %v7528_v9 = vld [vmem:[%s8227_s22 + $0x128] sm:$0xff]   ;;  %v7531_v12 = vld [vmem:[%s8227_s22 + $0x1f0] sm:$0xff]  }
  0x57   : > { %6703 = vmatpush3.bf16.msra.mxu0 %v7491_v19  ;;  %v1307_v51 = vrot.slane %v1279_v47, %v8283_v42  ;;  %4823 = vmatprep.mubr.bf16.mxu0 %v1300_v49  ;;  %v1310_v54 = vcombine.high %v1300_v49, %v1300_v49  ;;  %v7525_v6 = vld [vmem:[%s8227_s22 + $0x1a0] sm:$0xff]   ;;  %v7529_v10 = vld [vmem:[%s8227_s22 + $0x1a8] sm:$0xff]   ;;  %v7532_v13 = vld [vmem:[%s8227_s22 + $0x130] sm:$0xff]   ;;  %v1293_v19 = vrot.slane %v8287_v44, %v8283_v42 }
  0x58   : > { %6725 = vmatpush3.bf16.msra.mxu1 %v7492_v20  ;;  %6704 = vmatprep.subr.bf16.mxu0 %v7493_v21  ;;  %v7533_v14 = vld [vmem:[%s8227_s22 + $0x1b0] sm:$0xff]   ;;  %v7534_v15 = vld [vmem:[%s8227_s22 + $0x178] sm:$0xff]   ;;  %v7538_v20 = vld [vmem:[%s8227_s22 + $0x240] sm:$0xff]  }
  0x59   : > { %6726 = vmatprep.subr.bf16.mxu1 %v7494_v22  ;;  %v1311_v57 = vcombine.high %v1307_v51, %v1307_v51  ;;  %4863 = vmatprep.mubr.bf16.mxu1 %v1310_v54  ;;  %v7535_v16 = vld [vmem:[%s8227_s22 + $0x1f8] sm:$0xff]   ;;  %v7539_v21 = vld [vmem:[%s8227_s22 + $0x2c0] sm:$0xff]   ;;  %v7546_v29 = vld [vmem:[%s8227_s22 + $0x250] sm:$0xff]  }
  0x5a   : > { %v7536_v17 = vld [vmem:[%s8227_s22 + $0x138] sm:$0xff]   ;;  %v7540_v22 = vld [vmem:[%s8227_s22 + $0x200] sm:$0xff]   ;;  %v7558_v41 = vld [vmem:[%s8227_s22 + $0x268] sm:$0xff]  }
  0x5b   : > { %6705 = vmatpush3.bf16.msra.mxu0 %v7495_v23  ;;  %v7537_v18 = vld [vmem:[%s8227_s22 + $0x1b8] sm:$0xff]   ;;  %v7541_v23 = vld [vmem:[%s8227_s22 + $0x280] sm:$0xff]   ;;  %v7559_v43 = vld [vmem:[%s8227_s22 + $0x2e8] sm:$0xff]  }
  0x5c   : > { %6727 = vmatpush3.bf16.msra.mxu1 %v7496_v24  ;;  %6706 = vmatprep.subr.bf16.mxu0 %v7497_v25  ;;  %v1309_v24 = vcombine.high %v1293_v19, %v1293_v19  ;;  %v7542_v25 = vld [vmem:[%s8227_s22 + $0x248] sm:$0xff]   ;;  %v7551_v34 = vld [vmem:[%s8227_s22 + $0x2d8] sm:$0xff]   ;;  %v7554_v37 = vld [vmem:[%s8227_s22 + $0x260] sm:$0xff]  }
  0x5d   : > { %6728 = vmatprep.subr.bf16.mxu1 %v7498_v26  ;;  %v7543_v26 = vld [vmem:[%s8227_s22 + $0x2c8] sm:$0xff]   ;;  %v7552_v35 = vld [vmem:[%s8227_s22 + $0x218] sm:$0xff]   ;;  %v7555_v38 = vld [vmem:[%s8227_s22 + $0x2e0] sm:$0xff]  }
  0x5e   : > { %v7557_v40 = vld [vmem:[%s8227_s22 + $0x2a0] sm:$0xff]   ;;  %v7560_v44 = vld [vmem:[%s8227_s22 + $0x228] sm:$0xff]  }
  0x5f   : > { %6707 = vmatpush3.bf16.msra.mxu0 %v7499_v27  ;;  %v7544_v27 = vld [vmem:[%s8227_s22 + $0x208] sm:$0xff]  }
  0x60   : > { %6729 = vmatpush3.bf16.msra.mxu1 %v7500_v28  ;;  %6708 = vmatprep.subr.bf16.mxu0 %v7501_v30  ;;  %v7545_v28 = vld [vmem:[%s8227_s22 + $0x288] sm:$0xff]   ;;  %v7547_v30 = vld [vmem:[%s8227_s22 + $0x2d0] sm:$0xff]  }
  0x61   : > { %6730 = vmatprep.subr.bf16.mxu1 %v7502_v31  ;;  %v7548_v31 = vld [vmem:[%s8227_s22 + $0x210] sm:$0xff]   ;;  %v7561_v45 = vld [vmem:[%s8227_s22 + $0x2a8] sm:$0xff]  }
  0x62   : > { %v224_v47 = vld [vmem:[%s8240_s27 + $0x8] sm:$0xff] }
  0x63   : > { %6709 = vmatpush3.bf16.msra.mxu0 %v7503_v32  ;;  %v7549_v32 = vld [vmem:[%s8227_s22 + $0x290] sm:$0xff]   ;;  %v1319_v49 = vrot.slane %v224_v47, %v8283_v42 }
  0x64   : > { %6731 = vmatpush3.bf16.msra.mxu1 %v7504_v33  ;;  %6738 = vmatprep.subr.bf16.mxu0 %v7506_v36  ;;  %v7550_v33 = vld [vmem:[%s8227_s22 + $0x258] sm:$0xff]  }
  0x65   : > { %6760 = vmatprep.subr.bf16.mxu1 %v7507_v39  ;;  %v7553_v36 = vld [vmem:[%s8227_s22 + $0x298] sm:$0xff]   ;;  %v7556_v39 = vld [vmem:[%s8227_s22 + $0x220] sm:$0xff]  }
  0x66   : > { %4824 = vmatmul.mubr.bf16.vlgmr.msra.gmra.mrb[0].mxu0 %v1286_v46  ;;  %v7562_v46 = vld [vmem:[%s8227_s22 + $0x270] sm:$0xff]  }
  0x67   : > { %6739 = vmatpush3.bf16.msra.mxu0 %v7508_v48  ;;  %4864 = vmatmul.mubr.bf16.vlgmr.msra.gmra.mrb[0].mxu1 %v1308_v52  ;;  %v7563_v48 = vld [vmem:[%s8227_s22 + $0x2f0] sm:$0xff]  }
  0x68   : > { %6740 = vmatprep.subr.bf16.mxu0 %v7510_v53  ;;  %6761 = vmatpush3.bf16.msra.mxu1 %v7509_v50  ;;  %v1312_v50 = vcombine.high %v224_v47, %v224_v47  ;;  %v7565_v52 = vld [vmem:[%s8227_s22 + $0x2b0] sm:$0xff]   ;;  %v1327_v53 = vcombine.high %v1319_v49, %v1319_v49 }
  0x69   : > { %4903 = vmatprep.mubr.bf16.mxu0 %v1307_v51  ;;  %6762 = vmatprep.subr.bf16.mxu1 %v7511_v55  ;;  %v7564_v51 = vld [vmem:[%s8227_s22 + $0x230] sm:$0xff]   ;;  %v7566_v55 = vld [vmem:[%s8227_s22 + $0x278] sm:$0xff]  }
  0x6a   : > { %4943 = vmatprep.mubr.bf16.mxu1 %v1311_v57  ;;  %v8357_v54 = vrot.slane %v1312_v50, %v8283_v42  ;;  %v1349_v57 = vrot.slane %v1327_v53, %v8283_v42  ;;  %v7613_v47 = vld [vmem:[%s8227_s22 + $0x410] sm:$0xff]   ;;  %v7616_v50 = vld [vmem:[%s8227_s22 + $0x4d8] sm:$0xff]   ;;  %v7619_v53 = vld [vmem:[%s8227_s22 + $0x460] sm:$0xff]  }
  0x6b   : > { %6741 = vmatpush3.bf16.msra.mxu0 %v7512_v56  ;;  %v7567_v56 = vld [vmem:[%s8227_s22 + $0x2f8] sm:$0xff]  }
  0x6c   : > { %6742 = vmatprep.subr.bf16.mxu0 %v7514_v59  ;;  %6763 = vmatpush3.bf16.msra.mxu1 %v7513_v58  ;;  %v1328_v58 = vcombine.high %v8357_v54, %v8357_v54  ;;  %v7568_v59 = vld [vmem:[%s8227_s22 + $0x238] sm:$0xff]  }
  0x6d   : > { %6764 = vmatprep.subr.bf16.mxu1 %v7515_v60  ;;  %v7569_v60 = vld [vmem:[%s8227_s22 + $0x2b8] sm:$0xff]  }
  0x6f   : > { %6743 = vmatpush3.bf16.msra.mxu0 %v7516_v61  ;;  %v1359_v61 = vcombine.high %v1349_v57, %v1349_v57 }
  0x70   : > { %6744 = vmatprep.subr.bf16.mxu0 %v7518_v63  ;;  %6765 = vmatpush3.bf16.msra.mxu1 %v7517_v62  ;;  %v1335_v62 = vrot.slane %v1319_v49, %v8283_v42  ;;  %v7570_v63 = vld [vmem:[%s8227_s22 + $0x340] sm:$0xff]   ;;  %v7615_v49 = vld [vmem:[%s8227_s22 + $0x458] sm:$0xff]  }
  0x71   : > { %6766 = vmatprep.subr.bf16.mxu1 %v7519_v0  ;;  %v7571_v0 = vld [vmem:[%s8227_s22 + $0x3c0] sm:$0xff]  }
  0x73   : > { %6745 = vmatpush3.bf16.msra.mxu0 %v7520_v1  ;;  %v1356_v1 = vrot.slane %v1328_v58, %v8283_v42  ;;  %v7624_v58 = vld [vmem:[%s8227_s22 + $0x4e8] sm:$0xff]  }
  0x74   : > { %6746 = vmatprep.subr.bf16.mxu0 %v7522_v3  ;;  %6767 = vmatpush3.bf16.msra.mxu1 %v7521_v2  ;;  %v7572_v2 = vld [vmem:[%s8227_s22 + $0x300] sm:$0xff]  }
  0x75   : > { %6768 = vmatprep.subr.bf16.mxu1 %v7523_v4  ;;  %v7573_v3 = vld [vmem:[%s8227_s22 + $0x380] sm:$0xff]   ;;  %v1357_v4 = vcombine.high %v1335_v62, %v1335_v62 }
  0x77   : > { %6747 = vmatpush3.bf16.msra.mxu0 %v7524_v5  ;;  %v7574_v5 = vld [vmem:[%s8227_s22 + $0x348] sm:$0xff]  }
  0x78   : > { %6748 = vmatprep.subr.bf16.mxu0 %v7526_v7  ;;  %6769 = vmatpush3.bf16.msra.mxu1 %v7525_v6  ;;  %v7575_v6 = vld [vmem:[%s8227_s22 + $0x3c8] sm:$0xff]   ;;  %v1360_v7 = vcombine.high %v1356_v1, %v1356_v1 }
  0x79   : > { %6770 = vmatprep.subr.bf16.mxu1 %v7527_v8  ;;  %v7576_v8 = vld [vmem:[%s8227_s22 + $0x308] sm:$0xff]  }
  0x7b   : > { %6749 = vmatpush3.bf16.msra.mxu0 %v7528_v9  ;;  %v7577_v9 = vld [vmem:[%s8227_s22 + $0x388] sm:$0xff]  }
  0x7c   : > { %6750 = vmatprep.subr.bf16.mxu0 %v7530_v11  ;;  %6771 = vmatpush3.bf16.msra.mxu1 %v7529_v10  ;;  %v7578_v10 = vld [vmem:[%s8227_s22 + $0x350] sm:$0xff]  }
  0x7d   : > { %6772 = vmatprep.subr.bf16.mxu1 %v7531_v12  ;;  %v7579_v11 = vld [vmem:[%s8227_s22 + $0x3d0] sm:$0xff]  }
  0x7e   : > { %v7580_v12 = vld [vmem:[%s8227_s22 + $0x310] sm:$0xff]  }
  0x7f   : > { %6751 = vmatpush3.bf16.msra.mxu0 %v7532_v13  ;;  %v7581_v13 = vld [vmem:[%s8227_s22 + $0x390] sm:$0xff]  }
  0x80   : > { %6752 = vmatprep.subr.bf16.mxu0 %v7534_v15  ;;  %6773 = vmatpush3.bf16.msra.mxu1 %v7533_v14  ;;  %v7582_v14 = vld [vmem:[%s8227_s22 + $0x358] sm:$0xff]  }
  0x81   : > { %6774 = vmatprep.subr.bf16.mxu1 %v7535_v16  ;;  %v7583_v15 = vld [vmem:[%s8227_s22 + $0x3d8] sm:$0xff]  }
  0x82   : > { %v7584_v16 = vld [vmem:[%s8227_s22 + $0x318] sm:$0xff]  }
  0x83   : > { %6753 = vmatpush3.bf16.msra.mxu0 %v7536_v17  ;;  %v7585_v17 = vld [vmem:[%s8227_s22 + $0x398] sm:$0xff]  }
  0x84   : > { %6782 = vmatprep.subr.bf16.mxu0 %v7538_v20  ;;  %6775 = vmatpush3.bf16.msra.mxu1 %v7537_v18  ;;  %v7586_v18 = vld [vmem:[%s8227_s22 + $0x360] sm:$0xff]  }
  0x85   : > { %6804 = vmatprep.subr.bf16.mxu1 %v7539_v21  ;;  %v7588_v20 = vld [vmem:[%s8227_s22 + $0x320] sm:$0xff]  }
  0x86   : > { %4904 = vmatmul.mubr.bf16.vlgmr.msra.gmra.mrb[4].mxu0 %v1293_v19  ;;  %v7587_v19 = vld [vmem:[%s8227_s22 + $0x3e0] sm:$0xff]  }
  0x87   : > { %6783 = vmatpush3.bf16.msra.mxu0 %v7540_v22  ;;  %4944 = vmatmul.mubr.bf16.vlgmr.msra.gmra.mrb[4].mxu1 %v1309_v24  ;;  %v7589_v21 = vld [vmem:[%s8227_s22 + $0x3a0] sm:$0xff]   ;;  %v7590_v22 = vld [vmem:[%s8227_s22 + $0x368] sm:$0xff]  }
  0x88   : > { %6784 = vmatprep.subr.bf16.mxu0 %v7542_v25  ;;  %6805 = vmatpush3.bf16.msra.mxu1 %v7541_v23  ;;  %v7591_v23 = vld [vmem:[%s8227_s22 + $0x3e8] sm:$0xff]  }
  0x89   : > { %6806 = vmatprep.subr.bf16.mxu1 %v7543_v26  ;;  %4983 = vmatprep.mubr.bf16.mxu0 %v1349_v57  ;;  %v7592_v24 = vld [vmem:[%s8227_s22 + $0x328] sm:$0xff]   ;;  %v7594_v26 = vld [vmem:[%s8227_s22 + $0x370] sm:$0xff]  }
  0x8a   : > { %5023 = vmatprep.mubr.bf16.mxu1 %v1359_v61  ;;  %v7593_v25 = vld [vmem:[%s8227_s22 + $0x3a8] sm:$0xff]   ;;  %v7627_v61 = vld [vmem:[%s8227_s22 + $0x470] sm:$0xff]  }
  0x8b   : > { %6785 = vmatpush3.bf16.msra.mxu0 %v7544_v27  ;;  %v7595_v27 = vld [vmem:[%s8227_s22 + $0x3f0] sm:$0xff]   ;;  %v7623_v57 = vld [vmem:[%s8227_s22 + $0x468] sm:$0xff]  }
  0x8c   : > { %6786 = vmatprep.subr.bf16.mxu0 %v7546_v29  ;;  %6807 = vmatpush3.bf16.msra.mxu1 %v7545_v28  ;;  %v7596_v28 = vld [vmem:[%s8227_s22 + $0x330] sm:$0xff]  }
  0x8d   : > { %6808 = vmatprep.subr.bf16.mxu1 %v7547_v30  ;;  %v7597_v29 = vld [vmem:[%s8227_s22 + $0x3b0] sm:$0xff]   ;;  %v7598_v30 = vld [vmem:[%s8227_s22 + $0x378] sm:$0xff]  }
  0x8f   : > { %6787 = vmatpush3.bf16.msra.mxu0 %v7548_v31  ;;  %v7599_v31 = vld [vmem:[%s8227_s22 + $0x3f8] sm:$0xff]  }
  0x90   : > { %6788 = vmatprep.subr.bf16.mxu0 %v7550_v33  ;;  %6809 = vmatpush3.bf16.msra.mxu1 %v7549_v32  ;;  %v7600_v32 = vld [vmem:[%s8227_s22 + $0x338] sm:$0xff]  }
  0x91   : > { %6810 = vmatprep.subr.bf16.mxu1 %v7551_v34  ;;  %v7601_v33 = vld [vmem:[%s8227_s22 + $0x3b8] sm:$0xff]   ;;  %v1342_v34 = vrot.slane %v8357_v54, %v8283_v42  ;;  %v7620_v54 = vld [vmem:[%s8227_s22 + $0x4e0] sm:$0xff]  }
  0x93   : > { %6789 = vmatpush3.bf16.msra.mxu0 %v7552_v35  ;;  %v7603_v35 = vld [vmem:[%s8227_s22 + $0x440] sm:$0xff]  }
  0x94   : > { %6790 = vmatprep.subr.bf16.mxu0 %v7554_v37  ;;  %6811 = vmatpush3.bf16.msra.mxu1 %v7553_v36  ;;  %v7604_v36 = vld [vmem:[%s8227_s22 + $0x4c0] sm:$0xff]  }
  0x95   : > { %6812 = vmatprep.subr.bf16.mxu1 %v7555_v38  ;;  %v7605_v37 = vld [vmem:[%s8227_s22 + $0x400] sm:$0xff]  }
  0x96   : > { %v7606_v38 = vld [vmem:[%s8227_s22 + $0x480] sm:$0xff]  }
  0x97   : > { %6791 = vmatpush3.bf16.msra.mxu0 %v7556_v39  ;;  %v1358_v39 = vcombine.high %v1342_v34, %v1342_v34 }
  0x98   : > { %6792 = vmatprep.subr.bf16.mxu0 %v7558_v41  ;;  %6813 = vmatpush3.bf16.msra.mxu1 %v7557_v40  ;;  %v7607_v40 = vld [vmem:[%s8227_s22 + $0x448] sm:$0xff]  }
  0x99   : > { %6814 = vmatprep.subr.bf16.mxu1 %v7559_v43  ;;  %v7608_v41 = vld [vmem:[%s8227_s22 + $0x4c8] sm:$0xff]  }
  0x9a   : > { %v7609_v43 = vld [vmem:[%s8227_s22 + $0x408] sm:$0xff]  }
  0x9b   : > { %6793 = vmatpush3.bf16.msra.mxu0 %v7560_v44  ;;  %v7610_v44 = vld [vmem:[%s8227_s22 + $0x488] sm:$0xff]  }
  0x9c   : > { %6794 = vmatprep.subr.bf16.mxu0 %v7562_v46  ;;  %6815 = vmatpush3.bf16.msra.mxu1 %v7561_v45  ;;  %v7611_v45 = vld [vmem:[%s8227_s22 + $0x450] sm:$0xff]  }
  0x9d   : > { %6816 = vmatprep.subr.bf16.mxu1 %v7563_v48  ;;  %v7612_v46 = vld [vmem:[%s8227_s22 + $0x4d0] sm:$0xff]  }
  0x9e   : > { %v7614_v48 = vld [vmem:[%s8227_s22 + $0x490] sm:$0xff]  }
  0x9f   : > { %6795 = vmatpush3.bf16.msra.mxu0 %v7564_v51  ;;  %v7617_v51 = vld [vmem:[%s8227_s22 + $0x418] sm:$0xff]  }
  0xa0   : > { %6796 = vmatprep.subr.bf16.mxu0 %v7566_v55  ;;  %6817 = vmatpush3.bf16.msra.mxu1 %v7565_v52  ;;  %v7618_v52 = vld [vmem:[%s8227_s22 + $0x498] sm:$0xff]   ;;  %v7621_v55 = vld [vmem:[%s8227_s22 + $0x420] sm:$0xff]  }
  0xa1   : > { %6818 = vmatprep.subr.bf16.mxu1 %v7567_v56  ;;  %v7622_v56 = vld [vmem:[%s8227_s22 + $0x4a0] sm:$0xff]  }
  0xa3   : > { %6797 = vmatpush3.bf16.msra.mxu0 %v7568_v59  ;;  %v7625_v59 = vld [vmem:[%s8227_s22 + $0x428] sm:$0xff]  }
  0xa4   : > { %6826 = vmatprep.subr.bf16.mxu0 %v7570_v63  ;;  %6819 = vmatpush3.bf16.msra.mxu1 %v7569_v60  ;;  %v7626_v60 = vld [vmem:[%s8227_s22 + $0x4a8] sm:$0xff]   ;;  %v7628_v63 = vld [vmem:[%s8227_s22 + $0x4f0] sm:$0xff]  }
  0xa5   : > { %6848 = vmatprep.subr.bf16.mxu1 %v7571_v0 }
  0xa6   : > { %4984 = vmatmul.mubr.bf16.vlgmr.msra.gmra.mrb[8].mxu0 %v1335_v62  ;;  %v225_v62 = vld [vmem:[%s8240_s27 + $0x10] sm:$0xff] }
  0xa7   : > { %6827 = vmatpush3.bf16.msra.mxu0 %v7572_v2  ;;  %5063 = vmatprep.mubr.bf16.mxu0 %v1356_v1  ;;  %v1368_v0 = vrot.slane %v225_v62, %v8283_v42  ;;  %v1361_v1 = vcombine.high %v225_v62, %v225_v62  ;;  %v7629_v2 = vld [vmem:[%s8227_s22 + $0x430] sm:$0xff]  }
  0xa8   : > { %5024 = vmatmul.mubr.bf16.vlgmr.msra.gmra.mrb[8].mxu1 %v1357_v4  ;;  %6828 = vmatprep.subr.bf16.mxu0 %v7574_v5  ;;  %v7678_v62 = vld [vmem:[%s8227_s22 + $0x610] sm:$0xff]  }
  0xa9   : > { %6849 = vmatpush3.bf16.msra.mxu1 %v7573_v3  ;;  %5103 = vmatprep.mubr.bf16.mxu1 %v1360_v7  ;;  %v7630_v3 = vld [vmem:[%s8227_s22 + $0x4b0] sm:$0xff]   ;;  %v1376_v4 = vcombine.high %v1368_v0, %v1368_v0  ;;  %v8433_v5 = vrot.slane %v1361_v1, %v8283_v42  ;;  %v7632_v7 = vld [vmem:[%s8227_s22 + $0x4f8] sm:$0xff]  }
  0xaa   : > { %6850 = vmatprep.subr.bf16.mxu1 %v7575_v6  ;;  %v7631_v6 = vld [vmem:[%s8227_s22 + $0x478] sm:$0xff]  }
  0xab   : > { %6829 = vmatpush3.bf16.msra.mxu0 %v7576_v8  ;;  %v1398_v8 = vrot.slane %v1376_v4, %v8283_v42  ;;  %v7681_v1 = vld [vmem:[%s8227_s22 + $0x6d8] sm:$0xff]   ;;  %v7684_v4 = vld [vmem:[%s8227_s22 + $0x660] sm:$0xff]  }
  0xac   : > { %6830 = vmatprep.subr.bf16.mxu0 %v7578_v10  ;;  %v7633_v10 = vld [vmem:[%s8227_s22 + $0x438] sm:$0xff]  }
  0xad   : > { %6851 = vmatpush3.bf16.msra.mxu1 %v7577_v9  ;;  %v1377_v9 = vcombine.high %v8433_v5, %v8433_v5 }
  0xae   : > { %6852 = vmatprep.subr.bf16.mxu1 %v7579_v11  ;;  %v7634_v11 = vld [vmem:[%s8227_s22 + $0x4b8] sm:$0xff]  }
  0xaf   : > { %6831 = vmatpush3.bf16.msra.mxu0 %v7580_v12  ;;  %v1408_v12 = vcombine.high %v1398_v8, %v1398_v8 }
  0xb0   : > { %6832 = vmatprep.subr.bf16.mxu0 %v7582_v14  ;;  %v7635_v14 = vld [vmem:[%s8227_s22 + $0x540] sm:$0xff]  }
  0xb1   : > { %6853 = vmatpush3.bf16.msra.mxu1 %v7581_v13  ;;  %v1384_v13 = vrot.slane %v1368_v0, %v8283_v42  ;;  %v7680_v0 = vld [vmem:[%s8227_s22 + $0x658] sm:$0xff]  }
  0xb2   : > { %6854 = vmatprep.subr.bf16.mxu1 %v7583_v15  ;;  %v7636_v15 = vld [vmem:[%s8227_s22 + $0x5c0] sm:$0xff]  }
  0xb3   : > { %6833 = vmatpush3.bf16.msra.mxu0 %v7584_v16  ;;  %v1405_v16 = vrot.slane %v1377_v9, %v8283_v42  ;;  %v7689_v9 = vld [vmem:[%s8227_s22 + $0x6e8] sm:$0xff]  }
  0xb4   : > { %6834 = vmatprep.subr.bf16.mxu0 %v7586_v18  ;;  %v7638_v18 = vld [vmem:[%s8227_s22 + $0x580] sm:$0xff]  }
  0xb5   : > { %6855 = vmatpush3.bf16.msra.mxu1 %v7585_v17  ;;  %v7637_v17 = vld [vmem:[%s8227_s22 + $0x500] sm:$0xff]  }
  0xb6   : > { %6856 = vmatprep.subr.bf16.mxu1 %v7587_v19  ;;  %v1406_v19 = vcombine.high %v1384_v13, %v1384_v13 }
  0xb7   : > { %6835 = vmatpush3.bf16.msra.mxu0 %v7588_v20  ;;  %v7639_v20 = vld [vmem:[%s8227_s22 + $0x548] sm:$0xff]  }
  0xb8   : > { %6836 = vmatprep.subr.bf16.mxu0 %v7590_v22  ;;  %v1409_v22 = vcombine.high %v1405_v16, %v1405_v16 }
  0xb9   : > { %6857 = vmatpush3.bf16.msra.mxu1 %v7589_v21  ;;  %v7640_v21 = vld [vmem:[%s8227_s22 + $0x5c8] sm:$0xff]  }
  0xba   : > { %6858 = vmatprep.subr.bf16.mxu1 %v7591_v23  ;;  %v7641_v23 = vld [vmem:[%s8227_s22 + $0x508] sm:$0xff]  }
  0xbb   : > { %6837 = vmatpush3.bf16.msra.mxu0 %v7592_v24  ;;  %v7642_v24 = vld [vmem:[%s8227_s22 + $0x588] sm:$0xff]  }
  0xbc   : > { %6838 = vmatprep.subr.bf16.mxu0 %v7594_v26  ;;  %v7644_v26 = vld [vmem:[%s8227_s22 + $0x5d0] sm:$0xff]  }
  0xbd   : > { %6859 = vmatpush3.bf16.msra.mxu1 %v7593_v25  ;;  %v7643_v25 = vld [vmem:[%s8227_s22 + $0x550] sm:$0xff]  }
  0xbe   : > { %6860 = vmatprep.subr.bf16.mxu1 %v7595_v27  ;;  %v7645_v27 = vld [vmem:[%s8227_s22 + $0x510] sm:$0xff]  }
  0xbf   : > { %6839 = vmatpush3.bf16.msra.mxu0 %v7596_v28  ;;  %v7646_v28 = vld [vmem:[%s8227_s22 + $0x590] sm:$0xff]  }
  0xc0   : > { %6840 = vmatprep.subr.bf16.mxu0 %v7598_v30  ;;  %v7648_v30 = vld [vmem:[%s8227_s22 + $0x5d8] sm:$0xff]  }
  0xc1   : > { %6861 = vmatpush3.bf16.msra.mxu1 %v7597_v29  ;;  %v7647_v29 = vld [vmem:[%s8227_s22 + $0x558] sm:$0xff]  }
  0xc2   : > { %6862 = vmatprep.subr.bf16.mxu1 %v7599_v31  ;;  %v7649_v31 = vld [vmem:[%s8227_s22 + $0x518] sm:$0xff]  }
  0xc3   : > { %6841 = vmatpush3.bf16.msra.mxu0 %v7600_v32  ;;  %v7650_v32 = vld [vmem:[%s8227_s22 + $0x598] sm:$0xff]  }
  0xc4   : > { %6870 = vmatprep.subr.bf16.mxu0 %v7603_v35  ;;  %v7653_v35 = vld [vmem:[%s8227_s22 + $0x520] sm:$0xff]  }
  0xc5   : > { %6863 = vmatpush3.bf16.msra.mxu1 %v7601_v33  ;;  %v7651_v33 = vld [vmem:[%s8227_s22 + $0x560] sm:$0xff]  }
  0xc6   : > { %5064 = vmatmul.mubr.bf16.vlgmr.msra.gmra.mrb[12].mxu0 %v1342_v34  ;;  %6892 = vmatprep.subr.bf16.mxu1 %v7604_v36  ;;  %v7652_v34 = vld [vmem:[%s8227_s22 + $0x5e0] sm:$0xff]  }
  0xc7   : > { %6871 = vmatpush3.bf16.msra.mxu0 %v7605_v37  ;;  %5143 = vmatprep.mubr.bf16.mxu0 %v1398_v8  ;;  %v7654_v36 = vld [vmem:[%s8227_s22 + $0x5a0] sm:$0xff]   ;;  %v7655_v37 = vld [vmem:[%s8227_s22 + $0x568] sm:$0xff]  }
  0xc8   : > { %5104 = vmatmul.mubr.bf16.vlgmr.msra.gmra.mrb[12].mxu1 %v1358_v39  ;;  %6872 = vmatprep.subr.bf16.mxu0 %v7607_v40  ;;  %v7657_v39 = vld [vmem:[%s8227_s22 + $0x528] sm:$0xff]  }
  0xc9   : > { %6893 = vmatpush3.bf16.msra.mxu1 %v7606_v38  ;;  %5183 = vmatprep.mubr.bf16.mxu1 %v1408_v12  ;;  %v7656_v38 = vld [vmem:[%s8227_s22 + $0x5e8] sm:$0xff]   ;;  %v7692_v12 = vld [vmem:[%s8227_s22 + $0x670] sm:$0xff]  }
  0xca   : > { %6894 = vmatprep.subr.bf16.mxu1 %v7608_v41  ;;  %v7658_v40 = vld [vmem:[%s8227_s22 + $0x5a8] sm:$0xff]   ;;  %v7659_v41 = vld [vmem:[%s8227_s22 + $0x570] sm:$0xff]  }
  0xcb   : > { %6873 = vmatpush3.bf16.msra.mxu0 %v7609_v43  ;;  %v7660_v43 = vld [vmem:[%s8227_s22 + $0x5f0] sm:$0xff]   ;;  %v7688_v8 = vld [vmem:[%s8227_s22 + $0x668] sm:$0xff]  }
  0xcc   : > { %6874 = vmatprep.subr.bf16.mxu0 %v7611_v45  ;;  %v7662_v45 = vld [vmem:[%s8227_s22 + $0x5b0] sm:$0xff]  }
  0xcd   : > { %6895 = vmatpush3.bf16.msra.mxu1 %v7610_v44  ;;  %v7661_v44 = vld [vmem:[%s8227_s22 + $0x530] sm:$0xff]  }
  0xce   : > { %6896 = vmatprep.subr.bf16.mxu1 %v7612_v46  ;;  %v7663_v46 = vld [vmem:[%s8227_s22 + $0x578] sm:$0xff]  }
  0xcf   : > { %6875 = vmatpush3.bf16.msra.mxu0 %v7613_v47  ;;  %v7664_v47 = vld [vmem:[%s8227_s22 + $0x5f8] sm:$0xff]  }
  0xd0   : > { %6876 = vmatprep.subr.bf16.mxu0 %v7615_v49  ;;  %v7666_v49 = vld [vmem:[%s8227_s22 + $0x5b8] sm:$0xff]  }
  0xd1   : > { %6897 = vmatpush3.bf16.msra.mxu1 %v7614_v48  ;;  %v7665_v48 = vld [vmem:[%s8227_s22 + $0x538] sm:$0xff]  }
  0xd2   : > { %6898 = vmatprep.subr.bf16.mxu1 %v7616_v50  ;;  %v1391_v50 = vrot.slane %v8433_v5, %v8283_v42  ;;  %v7685_v5 = vld [vmem:[%s8227_s22 + $0x6e0] sm:$0xff]  }
  0xd3   : > { %6877 = vmatpush3.bf16.msra.mxu0 %v7617_v51  ;;  %v7668_v51 = vld [vmem:[%s8227_s22 + $0x640] sm:$0xff]  }
  0xd4   : > { %6878 = vmatprep.subr.bf16.mxu0 %v7619_v53  ;;  %v7670_v53 = vld [vmem:[%s8227_s22 + $0x600] sm:$0xff]  }
  0xd5   : > { %6899 = vmatpush3.bf16.msra.mxu1 %v7618_v52  ;;  %v7669_v52 = vld [vmem:[%s8227_s22 + $0x6c0] sm:$0xff]  }
  0xd6   : > { %6900 = vmatprep.subr.bf16.mxu1 %v7620_v54  ;;  %v7671_v54 = vld [vmem:[%s8227_s22 + $0x680] sm:$0xff]  }
  0xd7   : > { %6879 = vmatpush3.bf16.msra.mxu0 %v7621_v55  ;;  %v1407_v55 = vcombine.high %v1391_v50, %v1391_v50 }
  0xd8   : > { %6880 = vmatprep.subr.bf16.mxu0 %v7623_v57  ;;  %v7673_v57 = vld [vmem:[%s8227_s22 + $0x6c8] sm:$0xff]  }
  0xd9   : > { %6901 = vmatpush3.bf16.msra.mxu1 %v7622_v56  ;;  %v7672_v56 = vld [vmem:[%s8227_s22 + $0x648] sm:$0xff]  }
  0xda   : > { %6902 = vmatprep.subr.bf16.mxu1 %v7624_v58  ;;  %v7674_v58 = vld [vmem:[%s8227_s22 + $0x608] sm:$0xff]  }
  0xdb   : > { %6881 = vmatpush3.bf16.msra.mxu0 %v7625_v59  ;;  %v7675_v59 = vld [vmem:[%s8227_s22 + $0x688] sm:$0xff]  }
  0xdc   : > { %6882 = vmatprep.subr.bf16.mxu0 %v7627_v61  ;;  %v7677_v61 = vld [vmem:[%s8227_s22 + $0x6d0] sm:$0xff]  }
  0xdd   : > { %6903 = vmatpush3.bf16.msra.mxu1 %v7626_v60  ;;  %v7676_v60 = vld [vmem:[%s8227_s22 + $0x650] sm:$0xff]  }
  0xde   : > { %6904 = vmatprep.subr.bf16.mxu1 %v7628_v63  ;;  %v7679_v63 = vld [vmem:[%s8227_s22 + $0x690] sm:$0xff]  }
  0xdf   : > { %6883 = vmatpush3.bf16.msra.mxu0 %v7629_v2  ;;  %v7682_v2 = vld [vmem:[%s8227_s22 + $0x618] sm:$0xff]  }
  0xe0   : > { %6884 = vmatprep.subr.bf16.mxu0 %v7631_v6  ;;  %v7686_v6 = vld [vmem:[%s8227_s22 + $0x620] sm:$0xff]  }
  0xe1   : > { %6905 = vmatpush3.bf16.msra.mxu1 %v7630_v3  ;;  %v7683_v3 = vld [vmem:[%s8227_s22 + $0x698] sm:$0xff]  }
  0xe2   : > { %6906 = vmatprep.subr.bf16.mxu1 %v7632_v7  ;;  %v7687_v7 = vld [vmem:[%s8227_s22 + $0x6a0] sm:$0xff]  }
  0xe3   : > { %6885 = vmatpush3.bf16.msra.mxu0 %v7633_v10  ;;  %v7690_v10 = vld [vmem:[%s8227_s22 + $0x628] sm:$0xff]  }
  0xe4   : > { %6914 = vmatprep.subr.bf16.mxu0 %v7635_v14  ;;  %v226_v14 = vld [vmem:[%s8240_s27 + $0x18] sm:$0xff] }
  0xe5   : > { %6907 = vmatpush3.bf16.msra.mxu1 %v7634_v11  ;;  %v7691_v11 = vld [vmem:[%s8227_s22 + $0x6a8] sm:$0xff]  }
  0xe6   : > { %5144 = vmatmul.mubr.bf16.vlgmr.msra.gmra.mrb[16].mxu0 %v1384_v13  ;;  %6936 = vmatprep.subr.bf16.mxu1 %v7636_v15  ;;  %v7693_v13 = vld [vmem:[%s8227_s22 + $0x6f0] sm:$0xff]  }
  0xe7   : > { %6915 = vmatpush3.bf16.msra.mxu0 %v7637_v17  ;;  %5223 = vmatprep.mubr.bf16.mxu0 %v1405_v16  ;;  %v7694_v15 = vld [vmem:[%s8227_s22 + $0x630] sm:$0xff]   ;;  %v1417_v16 = vrot.slane %v226_v14, %v8283_v42  ;;  %v1410_v17 = vcombine.high %v226_v14, %v226_v14  ;;  %v7734_v14 = vld [vmem:[%s8227_s22 + $0x8c0] sm:$0xff]  }
  0xe8   : > { %5184 = vmatmul.mubr.bf16.vlgmr.msra.gmra.mrb[16].mxu1 %v1406_v19  ;;  %6916 = vmatprep.subr.bf16.mxu0 %v7639_v20  ;;  %v7696_v19 = vld [vmem:[%s8227_s22 + $0x678] sm:$0xff]  }
  0xe9   : > { %6937 = vmatpush3.bf16.msra.mxu1 %v7638_v18  ;;  %5263 = vmatprep.mubr.bf16.mxu1 %v1409_v22  ;;  %v7695_v18 = vld [vmem:[%s8227_s22 + $0x6b0] sm:$0xff]   ;;  %v1425_v20 = vcombine.high %v1417_v16, %v1417_v16  ;;  %v7697_v22 = vld [vmem:[%s8227_s22 + $0x6f8] sm:$0xff]  }
  0xea   : > { %6938 = vmatprep.subr.bf16.mxu1 %v7640_v21  ;;  %v8510_v21 = vrot.slane %v1410_v17, %v8283_v42 }
  0xeb   : > { %6917 = vmatpush3.bf16.msra.mxu0 %v7641_v23  ;;  %v7698_v23 = vld [vmem:[%s8227_s22 + $0x638] sm:$0xff]  }
  0xec   : > { %6918 = vmatprep.subr.bf16.mxu0 %v7643_v25  ;;  %v1426_v25 = vcombine.high %v8510_v21, %v8510_v21 }
  0xed   : > { %6939 = vmatpush3.bf16.msra.mxu1 %v7642_v24  ;;  %v1447_v24 = vrot.slane %v1425_v20, %v8283_v42  ;;  %v7739_v20 = vld [vmem:[%s8227_s22 + $0x808] sm:$0xff]  }
  0xee   : > { %6940 = vmatprep.subr.bf16.mxu1 %v7644_v26  ;;  %v7699_v26 = vld [vmem:[%s8227_s22 + $0x6b8] sm:$0xff]  }
  0xef   : > { %6919 = vmatpush3.bf16.msra.mxu0 %v7645_v27  ;;  %v1457_v27 = vcombine.high %v1447_v24, %v1447_v24 }
  0xf0   : > { %6920 = vmatprep.subr.bf16.mxu0 %v7647_v29  ;;  %v7700_v29 = vld [vmem:[%s8227_s22 + $0x740] sm:$0xff]  }
  0xf1   : > { %6941 = vmatpush3.bf16.msra.mxu1 %v7646_v28  ;;  %v1433_v28 = vrot.slane %v1417_v16, %v8283_v42  ;;  %v7736_v16 = vld [vmem:[%s8227_s22 + $0x880] sm:$0xff]  }
  0xf2   : > { %6942 = vmatprep.subr.bf16.mxu1 %v7648_v30  ;;  %v7701_v30 = vld [vmem:[%s8227_s22 + $0x7c0] sm:$0xff]  }
  0xf3   : > { %6921 = vmatpush3.bf16.msra.mxu0 %v7649_v31  ;;  %v1454_v31 = vrot.slane %v1426_v25, %v8283_v42  ;;  %v7744_v25 = vld [vmem:[%s8227_s22 + $0x890] sm:$0xff]  }
  0xf4   : > { %6922 = vmatprep.subr.bf16.mxu0 %v7651_v33  ;;  %v7703_v33 = vld [vmem:[%s8227_s22 + $0x780] sm:$0xff]  }
  0xf5   : > { %6943 = vmatpush3.bf16.msra.mxu1 %v7650_v32  ;;  %v7702_v32 = vld [vmem:[%s8227_s22 + $0x700] sm:$0xff]  }
  0xf6   : > { %6944 = vmatprep.subr.bf16.mxu1 %v7652_v34  ;;  %v1455_v34 = vcombine.high %v1433_v28, %v1433_v28 }
  0xf7   : > { %6923 = vmatpush3.bf16.msra.mxu0 %v7653_v35  ;;  %v7704_v35 = vld [vmem:[%s8227_s22 + $0x748] sm:$0xff]  }
  0xf8   : > { %6924 = vmatprep.subr.bf16.mxu0 %v7655_v37  ;;  %v1458_v37 = vcombine.high %v1454_v31, %v1454_v31 }
  0xf9   : > { %6945 = vmatpush3.bf16.msra.mxu1 %v7654_v36  ;;  %v7705_v36 = vld [vmem:[%s8227_s22 + $0x7c8] sm:$0xff]  }
  0xfa   : > { %6946 = vmatprep.subr.bf16.mxu1 %v7656_v38  ;;  %v7706_v38 = vld [vmem:[%s8227_s22 + $0x708] sm:$0xff]  }
  0xfb   : > { %6925 = vmatpush3.bf16.msra.mxu0 %v7657_v39  ;;  %v7707_v39 = vld [vmem:[%s8227_s22 + $0x788] sm:$0xff]  }
  0xfc   : > { %6926 = vmatprep.subr.bf16.mxu0 %v7659_v41  ;;  %v7709_v41 = vld [vmem:[%s8227_s22 + $0x7d0] sm:$0xff]  }
  0xfd   : > { %6947 = vmatpush3.bf16.msra.mxu1 %v7658_v40  ;;  %v7708_v40 = vld [vmem:[%s8227_s22 + $0x750] sm:$0xff]  }
  0xfe   : > { %6948 = vmatprep.subr.bf16.mxu1 %v7660_v43  ;;  %v7710_v43 = vld [vmem:[%s8227_s22 + $0x710] sm:$0xff]  }
  0xff   : > { %6927 = vmatpush3.bf16.msra.mxu0 %v7661_v44  ;;  %v7711_v44 = vld [vmem:[%s8227_s22 + $0x790] sm:$0xff]  }
 0x100   : > { %6928 = vmatprep.subr.bf16.mxu0 %v7663_v46  ;;  %v7713_v46 = vld [vmem:[%s8227_s22 + $0x7d8] sm:$0xff]  }
 0x101   : > { %6949 = vmatpush3.bf16.msra.mxu1 %v7662_v45  ;;  %v7712_v45 = vld [vmem:[%s8227_s22 + $0x758] sm:$0xff]  }
 0x102   : > { %6950 = vmatprep.subr.bf16.mxu1 %v7664_v47  ;;  %v7714_v47 = vld [vmem:[%s8227_s22 + $0x718] sm:$0xff]  }
 0x103   : > { %6929 = vmatpush3.bf16.msra.mxu0 %v7665_v48  ;;  %v7715_v48 = vld [vmem:[%s8227_s22 + $0x798] sm:$0xff]  }
 0x104   : > { %6958 = vmatprep.subr.bf16.mxu0 %v7668_v51  ;;  %v7718_v51 = vld [vmem:[%s8227_s22 + $0x720] sm:$0xff]  }
 0x105   : > { %6951 = vmatpush3.bf16.msra.mxu1 %v7666_v49  ;;  %v7716_v49 = vld [vmem:[%s8227_s22 + $0x760] sm:$0xff]  }
 0x106   : > { %5224 = vmatmul.mubr.bf16.vlgmr.msra.gmra.mrb[20].mxu0 %v1391_v50  ;;  %6980 = vmatprep.subr.bf16.mxu1 %v7669_v52  ;;  %v7717_v50 = vld [vmem:[%s8227_s22 + $0x7e0] sm:$0xff]  }
 0x107   : > { %6959 = vmatpush3.bf16.msra.mxu0 %v7670_v53  ;;  %5303 = vmatprep.mubr.bf16.mxu0 %v1447_v24  ;;  %v7719_v52 = vld [vmem:[%s8227_s22 + $0x7a0] sm:$0xff]   ;;  %v7720_v53 = vld [vmem:[%s8227_s22 + $0x768] sm:$0xff]   ;;  %v7743_v24 = vld [vmem:[%s8227_s22 + $0x810] sm:$0xff]  }
 0x108   : > { %5264 = vmatmul.mubr.bf16.vlgmr.msra.gmra.mrb[20].mxu1 %v1407_v55  ;;  %6960 = vmatprep.subr.bf16.mxu0 %v7672_v56  ;;  %v7722_v55 = vld [vmem:[%s8227_s22 + $0x728] sm:$0xff]  }
 0x109   : > { %6981 = vmatpush3.bf16.msra.mxu1 %v7671_v54  ;;  %5343 = vmatprep.mubr.bf16.mxu1 %v1457_v27  ;;  %v7721_v54 = vld [vmem:[%s8227_s22 + $0x7e8] sm:$0xff]   ;;  %v7746_v27 = vld [vmem:[%s8227_s22 + $0x8d8] sm:$0xff]  }
 0x10a   : > { %6982 = vmatprep.subr.bf16.mxu1 %v7673_v57  ;;  %v7723_v56 = vld [vmem:[%s8227_s22 + $0x7a8] sm:$0xff]   ;;  %v7724_v57 = vld [vmem:[%s8227_s22 + $0x770] sm:$0xff]  }
 0x10b   : > { %6961 = vmatpush3.bf16.msra.mxu0 %v7674_v58 }
 0x10c   : > { %6962 = vmatprep.subr.bf16.mxu0 %v7676_v60 }
 0x10d   : > { %6983 = vmatpush3.bf16.msra.mxu1 %v7675_v59  ;;  %v7725_v59 = vld [vmem:[%s8227_s22 + $0x7f0] sm:$0xff]  }
 0x10e   : > { %6984 = vmatprep.subr.bf16.mxu1 %v7677_v61  ;;  %v7726_v61 = vld [vmem:[%s8227_s22 + $0x730] sm:$0xff]  }
 0x10f   : > { %6963 = vmatpush3.bf16.msra.mxu0 %v7678_v62 }
 0x110   : > { %6964 = vmatprep.subr.bf16.mxu0 %v7680_v0 }
 0x111   : > { %6985 = vmatpush3.bf16.msra.mxu1 %v7679_v63 }
 0x112   : > { %6986 = vmatprep.subr.bf16.mxu1 %v7681_v1  ;;  %v7727_v1 = vld [vmem:[%s8227_s22 + $0x7b0] sm:$0xff]  }
 0x113   : > { %6965 = vmatpush3.bf16.msra.mxu0 %v7682_v2  ;;  %v7728_v2 = vld [vmem:[%s8227_s22 + $0x778] sm:$0xff]  }
 0x114   : > { %6966 = vmatprep.subr.bf16.mxu0 %v7684_v4 }
 0x115   : > { %6987 = vmatpush3.bf16.msra.mxu1 %v7683_v3 }
 0x116   : > { %6988 = vmatprep.subr.bf16.mxu1 %v7685_v5 }
 0x117   : > { %6967 = vmatpush3.bf16.msra.mxu0 %v7686_v6 }
 0x118   : > { %6968 = vmatprep.subr.bf16.mxu0 %v7688_v8 }
 0x119   : > { %6989 = vmatpush3.bf16.msra.mxu1 %v7687_v7  ;;  %v7729_v7 = vld [vmem:[%s8227_s22 + $0x7f8] sm:$0xff]  }
 0x11a   : > { %6990 = vmatprep.subr.bf16.mxu1 %v7689_v9  ;;  %v7730_v9 = vld [vmem:[%s8227_s22 + $0x738] sm:$0xff]  }
 0x11b   : > { %6969 = vmatpush3.bf16.msra.mxu0 %v7690_v10 }
 0x11c   : > { %6970 = vmatprep.subr.bf16.mxu0 %v7692_v12  ;;  %v1440_v12 = vrot.slane %v8510_v21, %v8283_v42  ;;  %v7740_v21 = vld [vmem:[%s8227_s22 + $0x888] sm:$0xff]  }
 0x11d   : > { %6991 = vmatpush3.bf16.msra.mxu1 %v7691_v11  ;;  %v7731_v11 = vld [vmem:[%s8227_s22 + $0x7b8] sm:$0xff]  }
 0x11e   : > { %6992 = vmatprep.subr.bf16.mxu1 %v7693_v13  ;;  %v7733_v13 = vld [vmem:[%s8227_s22 + $0x840] sm:$0xff]   ;;  %v1456_v17 = vcombine.high %v1440_v12, %v1440_v12 }
 0x11f   : > { %6971 = vmatpush3.bf16.msra.mxu0 %v7694_v15  ;;  %v7735_v15 = vld [vmem:[%s8227_s22 + $0x800] sm:$0xff]  }
 0x120   : > { %6972 = vmatprep.subr.bf16.mxu0 %v7696_v19  ;;  %v7738_v19 = vld [vmem:[%s8227_s22 + $0x8c8] sm:$0xff]  }
 0x121   : > { %6993 = vmatpush3.bf16.msra.mxu1 %v7695_v18  ;;  %v7737_v18 = vld [vmem:[%s8227_s22 + $0x848] sm:$0xff]  }
 0x122   : > { %6994 = vmatprep.subr.bf16.mxu1 %v7697_v22  ;;  %v7741_v22 = vld [vmem:[%s8227_s22 + $0x850] sm:$0xff]  }
 0x123   : > { %6973 = vmatpush3.bf16.msra.mxu0 %v7698_v23  ;;  %v7742_v23 = vld [vmem:[%s8227_s22 + $0x8d0] sm:$0xff]  }
 0x124   : > { %7002 = vmatprep.subr.bf16.mxu0 %v7700_v29  ;;  %v7748_v29 = vld [vmem:[%s8227_s22 + $0x898] sm:$0xff]  }
 0x125   : > { %6995 = vmatpush3.bf16.msra.mxu1 %v7699_v26  ;;  %v7745_v26 = vld [vmem:[%s8227_s22 + $0x858] sm:$0xff]  }
 0x126   : > { %5304 = vmatmul.mubr.bf16.vlgmr.msra.gmra.mrb[24].mxu0 %v1433_v28  ;;  %7024 = vmatprep.subr.bf16.mxu1 %v7701_v30  ;;  %v7747_v28 = vld [vmem:[%s8227_s22 + $0x818] sm:$0xff]   ;;  %v7749_v30 = vld [vmem:[%s8227_s22 + $0x860] sm:$0xff]  }
 0x127   : > { %7003 = vmatpush3.bf16.msra.mxu0 %v7702_v32  ;;  %5383 = vmatprep.mubr.bf16.mxu0 %v1454_v31  ;;  %v7750_v31 = vld [vmem:[%s8227_s22 + $0x8e0] sm:$0xff]  }
 0x128   : > { %5344 = vmatmul.mubr.bf16.vlgmr.msra.gmra.mrb[24].mxu1 %v1455_v34  ;;  %7004 = vmatprep.subr.bf16.mxu0 %v7704_v35  ;;  %v7751_v32 = vld [vmem:[%s8227_s22 + $0x820] sm:$0xff]   ;;  %v7753_v34 = vld [vmem:[%s8227_s22 + $0x868] sm:$0xff]  }
 0x129   : > { %7025 = vmatpush3.bf16.msra.mxu1 %v7703_v33  ;;  %5423 = vmatprep.mubr.bf16.mxu1 %v1458_v37  ;;  %v7752_v33 = vld [vmem:[%s8227_s22 + $0x8a0] sm:$0xff]   ;;  %v7754_v35 = vld [vmem:[%s8227_s22 + $0x8e8] sm:$0xff]  }
 0x12a   : > { %7026 = vmatprep.subr.bf16.mxu1 %v7705_v36  ;;  %v7755_v36 = vld [vmem:[%s8227_s22 + $0x828] sm:$0xff]  }
 0x12b   : > { %7005 = vmatpush3.bf16.msra.mxu0 %v7706_v38  ;;  %v7756_v37 = vld [vmem:[%s8227_s22 + $0x8a8] sm:$0xff]   ;;  %v7757_v38 = vld [vmem:[%s8227_s22 + $0x870] sm:$0xff]  }
 0x12c   : > { %7006 = vmatprep.subr.bf16.mxu0 %v7708_v40  ;;  %v7758_v40 = vld [vmem:[%s8227_s22 + $0x8f0] sm:$0xff]  }
 0x12d   : > { %7027 = vmatpush3.bf16.msra.mxu1 %v7707_v39 }
 0x12e   : > { %7028 = vmatprep.subr.bf16.mxu1 %v7709_v41  ;;  %v227_v41 = vld [vmem:[%s8240_s27 + $0x20] sm:$0xff] }
 0x12f   : > { %7007 = vmatpush3.bf16.msra.mxu0 %v7710_v43 }
 0x130   : > { %7008 = vmatprep.subr.bf16.mxu0 %v7712_v45  ;;  %v1466_v45 = vrot.slane %v227_v41, %v8283_v42 }
 0x131   : > { %7029 = vmatpush3.bf16.msra.mxu1 %v7711_v44  ;;  %v7759_v44 = vld [vmem:[%s8227_s22 + $0x830] sm:$0xff]  }
 0x132   : > { %7030 = vmatprep.subr.bf16.mxu1 %v7713_v46  ;;  %v1459_v46 = vcombine.high %v227_v41, %v227_v41 }
 0x133   : > { %7009 = vmatpush3.bf16.msra.mxu0 %v7714_v47 }
 0x134   : > { %7010 = vmatprep.subr.bf16.mxu0 %v7716_v49 }
 0x135   : > { %7031 = vmatpush3.bf16.msra.mxu1 %v7715_v48 }
 0x136   : > { %7032 = vmatprep.subr.bf16.mxu1 %v7717_v50 }
 0x137   : > { %7011 = vmatpush3.bf16.msra.mxu0 %v7718_v51 }
 0x138   : > { %7012 = vmatprep.subr.bf16.mxu0 %v7720_v53  ;;  %v7761_v53 = vld [vmem:[%s8227_s22 + $0x878] sm:$0xff]  }
 0x139   : > { %7033 = vmatpush3.bf16.msra.mxu1 %v7719_v52  ;;  %v6710_v58 = vpop.f32.mrb[0].mxu0  ;;  %v7760_v52 = vld [vmem:[%s8227_s22 + $0x8b0] sm:$0xff]  }
 0x13a   : > { %v6711_v60 = vpop.f32.mrb[1].mxu0  ;;  %7034 = vmatprep.subr.bf16.mxu1 %v7721_v54  ;;  %v6732_v62 = vpop.f32.mrb[0].mxu1  ;;  %v1474_v54 = vcombine.high %v1466_v45, %v1466_v45 }
 0x13b   : > { %v6712_v63 = vadd.f32 %v6711_v60, %v6710_v58  ;;  %v6713_v0 = vpop.f32.mrb[2].mxu0  ;;  %7013 = vmatpush3.bf16.msra.mxu0 %v7722_v55  ;;  %v6733_v3 = vpop.f32.mrb[1].mxu1  ;;  %v8588_v55 = vrot.slane %v1459_v46, %v8283_v42 }
 0x13c   : > { %v6714_v4 = vpop.f32.mrb[3].mxu0  ;;  %7014 = vmatprep.subr.bf16.mxu0 %v7724_v57  ;;  %v6734_v5 = vadd.f32 %v6733_v3, %v6732_v62  ;;  %v6735_v6 = vpop.f32.mrb[2].mxu1  ;;  %v1496_v62 = vrot.slane %v1474_v54, %v8283_v42  ;;  %v1482_v3 = vrot.slane %v1466_v45, %v8283_v42  ;;  %v7799_v54 = vld [vmem:[%s8227_s22 + $0xac0] sm:$0xff]  }
 0x13d   : > { %7035 = vmatpush3.bf16.msra.mxu1 %v7723_v56  ;;  %v6736_v8 = vpop.f32.mrb[3].mxu1  ;;  %v7765_v4 = vld [vmem:[%s8227_s22 + $0x940] sm:$0xff]  }
 0x13e   : > { %7036 = vmatprep.subr.bf16.mxu1 %v7725_v59  ;;  %v8551_v10 = vadd.f32 %v6734_v5, %v6712_v63  ;;  %v7762_v59 = vld [vmem:[%s8227_s22 + $0x8f8] sm:$0xff]   ;;  %v1475_v63 = vcombine.high %v8588_v55, %v8588_v55  ;;  %v7766_v5 = vld [vmem:[%s8227_s22 + $0x9c0] sm:$0xff]  }
 0x13f   : > { %7015 = vmatpush3.bf16.msra.mxu0 %v7726_v61  ;;  %v7763_v61 = vld [vmem:[%s8227_s22 + $0x838] sm:$0xff]   ;;  %v7768_v8 = vld [vmem:[%s8227_s22 + $0x980] sm:$0xff]  }
 0x140   : > { %7016 = vmatprep.subr.bf16.mxu0 %v7728_v2  ;;  %v1506_v2 = vcombine.high %v1496_v62, %v1496_v62  ;;  %v1503_v6 = vrot.slane %v1475_v63, %v8283_v42  ;;  %v7807_v63 = vld [vmem:[%s8227_s22 + $0xad0] sm:$0xff]  }
 0x141   : > { %7037 = vmatpush3.bf16.msra.mxu1 %v7727_v1  ;;  %v7764_v1 = vld [vmem:[%s8227_s22 + $0x8b8] sm:$0xff]  }
 0x142   : > { %7038 = vmatprep.subr.bf16.mxu1 %v7729_v7  ;;  %v7767_v7 = vld [vmem:[%s8227_s22 + $0x900] sm:$0xff]  }
 0x143   : > { %7017 = vmatpush3.bf16.msra.mxu0 %v7730_v9  ;;  %v1504_v9 = vcombine.high %v1482_v3, %v1482_v3 }
 0x144   : > { %7046 = vmatprep.subr.bf16.mxu0 %v7733_v13  ;;  %v7771_v13 = vld [vmem:[%s8227_s22 + $0x908] sm:$0xff]  }
 0x145   : > { %7039 = vmatpush3.bf16.msra.mxu1 %v7731_v11  ;;  %v7770_v11 = vld [vmem:[%s8227_s22 + $0x9c8] sm:$0xff]  }
 0x146   : > { %5384 = vmatmul.mubr.bf16.vlgmr.msra.gmra.mrb[28].mxu0 %v1440_v12  ;;  %7068 = vmatprep.subr.bf16.mxu1 %v7734_v14  ;;  %v1507_v12 = vcombine.high %v1503_v6, %v1503_v6  ;;  %v7772_v14 = vld [vmem:[%s8227_s22 + $0x988] sm:$0xff]  }
 0x147   : > { %7047 = vmatpush3.bf16.msra.mxu0 %v7735_v15  ;;  %5463 = vmatprep.mubr.bf16.mxu0 %v1496_v62  ;;  %v7773_v15 = vld [vmem:[%s8227_s22 + $0x950] sm:$0xff]  }
 0x148   : > { %5424 = vmatmul.mubr.bf16.vlgmr.msra.gmra.mrb[28].mxu1 %v1456_v17  ;;  %7048 = vmatprep.subr.bf16.mxu0 %v7737_v18  ;;  %v7775_v17 = vld [vmem:[%s8227_s22 + $0x910] sm:$0xff]  }
 0x149   : > { %7069 = vmatpush3.bf16.msra.mxu1 %v7736_v16  ;;  %5503 = vmatprep.mubr.bf16.mxu1 %v1506_v2  ;;  %v7774_v16 = vld [vmem:[%s8227_s22 + $0x9d0] sm:$0xff]   ;;  %v7810_v2 = vld [vmem:[%s8227_s22 + $0xa58] sm:$0xff]  }
 0x14a   : > { %7070 = vmatprep.subr.bf16.mxu1 %v7738_v19  ;;  %v7776_v18 = vld [vmem:[%s8227_s22 + $0x990] sm:$0xff]   ;;  %v7777_v19 = vld [vmem:[%s8227_s22 + $0x958] sm:$0xff]  }
 0x14b   : > { %7049 = vmatpush3.bf16.msra.mxu0 %v7739_v20  ;;  %v7778_v20 = vld [vmem:[%s8227_s22 + $0x9d8] sm:$0xff]   ;;  %v7806_v62 = vld [vmem:[%s8227_s22 + $0xa50] sm:$0xff]  }
 0x14c   : > { %7050 = vmatprep.subr.bf16.mxu0 %v7741_v22  ;;  %v7780_v22 = vld [vmem:[%s8227_s22 + $0x998] sm:$0xff]  }
 0x14d   : > { %7071 = vmatpush3.bf16.msra.mxu1 %v7740_v21  ;;  %v7779_v21 = vld [vmem:[%s8227_s22 + $0x918] sm:$0xff]  }
 0x14e   : > { %7072 = vmatprep.subr.bf16.mxu1 %v7742_v23  ;;  %v7781_v23 = vld [vmem:[%s8227_s22 + $0x960] sm:$0xff]  }
 0x14f   : > { %7051 = vmatpush3.bf16.msra.mxu0 %v7743_v24  ;;  %v7782_v24 = vld [vmem:[%s8227_s22 + $0x9e0] sm:$0xff]  }
 0x150   : > { %7052 = vmatprep.subr.bf16.mxu0 %v7745_v26  ;;  %v7784_v26 = vld [vmem:[%s8227_s22 + $0x9a0] sm:$0xff]  }
 0x151   : > { %7073 = vmatpush3.bf16.msra.mxu1 %v7744_v25  ;;  %v7783_v25 = vld [vmem:[%s8227_s22 + $0x920] sm:$0xff]  }
 0x152   : > { %7074 = vmatprep.subr.bf16.mxu1 %v7746_v27  ;;  %v7785_v27 = vld [vmem:[%s8227_s22 + $0x968] sm:$0xff]  }
 0x153   : > { %7053 = vmatpush3.bf16.msra.mxu0 %v7747_v28  ;;  %v7786_v28 = vld [vmem:[%s8227_s22 + $0x9e8] sm:$0xff]  }
 0x154   : > { %7054 = vmatprep.subr.bf16.mxu0 %v7749_v30  ;;  %v7788_v30 = vld [vmem:[%s8227_s22 + $0x9a8] sm:$0xff]  }
 0x155   : > { %7075 = vmatpush3.bf16.msra.mxu1 %v7748_v29  ;;  %v7787_v29 = vld [vmem:[%s8227_s22 + $0x928] sm:$0xff]  }
 0x156   : > { %7076 = vmatprep.subr.bf16.mxu1 %v7750_v31  ;;  %v7789_v31 = vld [vmem:[%s8227_s22 + $0x970] sm:$0xff]  }
 0x157   : > { %7055 = vmatpush3.bf16.msra.mxu0 %v7751_v32 }
 0x158   : > { %7056 = vmatprep.subr.bf16.mxu0 %v7753_v34 }
 0x159   : > { %7077 = vmatpush3.bf16.msra.mxu1 %v7752_v33  ;;  %v6754_v39 = vpop.f32.mrb[4].mxu0  ;;  %v7790_v33 = vld [vmem:[%s8227_s22 + $0x9f0] sm:$0xff]  }
 0x15a   : > { %v6755_v43 = vpop.f32.mrb[5].mxu0  ;;  %7078 = vmatprep.subr.bf16.mxu1 %v7754_v35  ;;  %v6776_v47 = vpop.f32.mrb[4].mxu1  ;;  %v7791_v35 = vld [vmem:[%s8227_s22 + $0x930] sm:$0xff]  }
 0x15b   : > { %v6756_v48 = vadd.f32 %v6755_v43, %v6754_v39  ;;  %v6757_v49 = vpop.f32.mrb[6].mxu0  ;;  %7057 = vmatpush3.bf16.msra.mxu0 %v7755_v36  ;;  %v6777_v50 = vpop.f32.mrb[5].mxu1  ;;  %v7792_v39 = vld [vmem:[%s8227_s22 + $0x9b0] sm:$0xff]  }
 0x15c   : > { %v6758_v51 = vpop.f32.mrb[7].mxu0  ;;  %7058 = vmatprep.subr.bf16.mxu0 %v7757_v38  ;;  %v6778_v57 = vadd.f32 %v6777_v50, %v6776_v47  ;;  %v6779_v58 = vpop.f32.mrb[6].mxu1  ;;  %v7794_v47 = vld [vmem:[%s8227_s22 + $0x9f8] sm:$0xff]  }
 0x15d   : > { %v4906_v56 = vadd.f32 %v6756_v48, %v8551_v10  ;;  %7079 = vmatpush3.bf16.msra.mxu1 %v7756_v37  ;;  %v6780_v60 = vpop.f32.mrb[7].mxu1  ;;  %v7769_v10 = vld [vmem:[%s8227_s22 + $0x948] sm:$0xff]   ;;  %v7795_v49 = vld [vmem:[%s8227_s22 + $0x938] sm:$0xff]  }
 0x15e   : > { %7080 = vmatprep.subr.bf16.mxu1 %v7758_v40  ;;  %v7793_v40 = vld [vmem:[%s8227_s22 + $0x978] sm:$0xff]   ;;  %v7803_v60 = vld [vmem:[%s8227_s22 + $0xac8] sm:$0xff]  }
 0x15f   : > { %v8596_v0 = vadd.f32 %v6778_v57, %v4906_v56  ;;  %7059 = vmatpush3.bf16.msra.mxu0 %v7759_v44  ;;  %v7796_v51 = vld [vmem:[%s8227_s22 + $0x9b8] sm:$0xff]   ;;  %v7800_v56 = vld [vmem:[%s8227_s22 + $0xa00] sm:$0xff]  }
 0x160   : > { %7060 = vmatprep.subr.bf16.mxu0 %v7761_v53  ;;  %v7798_v53 = vld [vmem:[%s8227_s22 + $0xa40] sm:$0xff]  }
 0x161   : > { %7081 = vmatpush3.bf16.msra.mxu1 %v7760_v52  ;;  %v1489_v52 = vrot.slane %v8588_v55, %v8283_v42  ;;  %v7801_v57 = vld [vmem:[%s8227_s22 + $0xa80] sm:$0xff]   ;;  %v7804_v55 = vld [vmem:[%s8227_s22 + $0xa08] sm:$0xff]  }
 0x162   : > { %7082 = vmatprep.subr.bf16.mxu1 %v7762_v59  ;;  %v7802_v59 = vld [vmem:[%s8227_s22 + $0xa48] sm:$0xff]  }
 0x163   : > { %7061 = vmatpush3.bf16.msra.mxu0 %v7763_v61  ;;  %v1505_v58 = vcombine.high %v1489_v52, %v1489_v52  ;;  %v7805_v61 = vld [vmem:[%s8227_s22 + $0xa88] sm:$0xff]  }
 0x164   : > { %7090 = vmatprep.subr.bf16.mxu0 %v7765_v4  ;;  %v7812_v4 = vld [vmem:[%s8227_s22 + $0xa18] sm:$0xff]  }
 0x165   : > { %7083 = vmatpush3.bf16.msra.mxu1 %v7764_v1  ;;  %v7809_v1 = vld [vmem:[%s8227_s22 + $0xa90] sm:$0xff]  }
 0x166   : > { %5464 = vmatmul.mubr.bf16.vlgmr.msra.gmra.mrb[32].mxu0 %v1482_v3  ;;  %7112 = vmatprep.subr.bf16.mxu1 %v7766_v5  ;;  %v7811_v3 = vld [vmem:[%s8227_s22 + $0xad8] sm:$0xff]  }
 0x167   : > { %7091 = vmatpush3.bf16.msra.mxu0 %v7767_v7  ;;  %5543 = vmatprep.mubr.bf16.mxu0 %v1503_v6  ;;  %v7813_v5 = vld [vmem:[%s8227_s22 + $0xa98] sm:$0xff]   ;;  %v7814_v6 = vld [vmem:[%s8227_s22 + $0xa60] sm:$0xff]  }
 0x168   : > { %5504 = vmatmul.mubr.bf16.vlgmr.msra.gmra.mrb[32].mxu1 %v1504_v9  ;;  %7092 = vmatprep.subr.bf16.mxu0 %v7769_v10  ;;  %v7815_v7 = vld [vmem:[%s8227_s22 + $0xae0] sm:$0xff]   ;;  %v7818_v10 = vld [vmem:[%s8227_s22 + $0xa68] sm:$0xff]  }
 0x169   : > { %7113 = vmatpush3.bf16.msra.mxu1 %v7768_v8  ;;  %5583 = vmatprep.mubr.bf16.mxu1 %v1507_v12  ;;  %v7816_v8 = vld [vmem:[%s8227_s22 + $0xa20] sm:$0xff]   ;;  %v7820_v12 = vld [vmem:[%s8227_s22 + $0xa28] sm:$0xff]  }
 0x16a   : > { %7114 = vmatprep.subr.bf16.mxu1 %v7770_v11  ;;  %v7817_v9 = vld [vmem:[%s8227_s22 + $0xaa0] sm:$0xff]   ;;  %v7819_v11 = vld [vmem:[%s8227_s22 + $0xae8] sm:$0xff]  }
 0x16b   : > { %7093 = vmatpush3.bf16.msra.mxu0 %v7771_v13  ;;  %v7821_v13 = vld [vmem:[%s8227_s22 + $0xaa8] sm:$0xff]  }
 0x16c   : > { %7094 = vmatprep.subr.bf16.mxu0 %v7773_v15 }
 0x16d   : > { %7115 = vmatpush3.bf16.msra.mxu1 %v7772_v14  ;;  %v7822_v14 = vld [vmem:[%s8227_s22 + $0xa70] sm:$0xff]  }
 0x16e   : > { %7116 = vmatprep.subr.bf16.mxu1 %v7774_v16  ;;  %v7823_v16 = vld [vmem:[%s8227_s22 + $0xaf0] sm:$0xff]  }
 0x16f   : > { %7095 = vmatpush3.bf16.msra.mxu0 %v7775_v17 }
 0x170   : > { %7096 = vmatprep.subr.bf16.mxu0 %v7777_v19  ;;  %v228_v19 = vld [vmem:[%s8240_s27 + $0x28] sm:$0xff] }
 0x171   : > { %7117 = vmatpush3.bf16.msra.mxu1 %v7776_v18  ;;  %v7824_v18 = vld [vmem:[%s8227_s22 + $0xa30] sm:$0xff]  }
 0x172   : > { %7118 = vmatprep.subr.bf16.mxu1 %v7778_v20 }
 0x173   : > { %7097 = vmatpush3.bf16.msra.mxu0 %v7779_v21 }
 0x174   : > { %7098 = vmatprep.subr.bf16.mxu0 %v7781_v23  ;;  %v1515_v23 = vrot.slane %v228_v19, %v8283_v42 }
 0x175   : > { %7119 = vmatpush3.bf16.msra.mxu1 %v7780_v22 }
 0x176   : > { %7120 = vmatprep.subr.bf16.mxu1 %v7782_v24  ;;  %v1508_v24 = vcombine.high %v228_v19, %v228_v19 }
 0x177   : > { %7099 = vmatpush3.bf16.msra.mxu0 %v7783_v25 }
 0x178   : > { %7100 = vmatprep.subr.bf16.mxu0 %v7785_v27  ;;  %v7825_v27 = vld [vmem:[%s8227_s22 + $0xab0] sm:$0xff]  }
 0x179   : > { %7121 = vmatpush3.bf16.msra.mxu1 %v7784_v26  ;;  %v6798_v32 = vpop.f32.mrb[8].mxu0 }
 0x17a   : > { %v6799_v34 = vpop.f32.mrb[9].mxu0  ;;  %7122 = vmatprep.subr.bf16.mxu1 %v7786_v28  ;;  %v7826_v28 = vld [vmem:[%s8227_s22 + $0xa78] sm:$0xff]  }
 0x17b   : > { %v6820_v36 = vpop.f32.mrb[8].mxu1  ;;  %v6800_v37 = vadd.f32 %v6799_v34, %v6798_v32  ;;  %v6801_v38 = vpop.f32.mrb[10].mxu0  ;;  %7101 = vmatpush3.bf16.msra.mxu0 %v7787_v29  ;;  %v7827_v32 = vld [vmem:[%s8227_s22 + $0xaf8] sm:$0xff]  }
 0x17c   : > { %v6821_v41 = vpop.f32.mrb[9].mxu1  ;;  %v6802_v43 = vpop.f32.mrb[11].mxu0  ;;  %7102 = vmatprep.subr.bf16.mxu0 %v7789_v31  ;;  %v7829_v38 = vld [vmem:[%s8227_s22 + $0xab8] sm:$0xff]  }
 0x17d   : > { %v4986_v44 = vadd.f32 %v6800_v37, %v8596_v0  ;;  %v6822_v45 = vadd.f32 %v6821_v41, %v6820_v36  ;;  %v6823_v46 = vpop.f32.mrb[10].mxu1  ;;  %7123 = vmatpush3.bf16.msra.mxu1 %v7788_v30  ;;  %v7808_v0 = vld [vmem:[%s8227_s22 + $0xa10] sm:$0xff]   ;;  %v8673_v36 = vrot.slane %v1508_v24, %v8283_v42  ;;  %v7830_v41 = vld [vmem:[%s8227_s22 + $0xb40] sm:$0xff]   ;;  %v7860_v24 = vld [vmem:[%s8227_s22 + $0xb38] sm:$0xff]  }
 0x17e   : > { %v6824_v48 = vpop.f32.mrb[11].mxu1  ;;  %7124 = vmatprep.subr.bf16.mxu1 %v7790_v33  ;;  %v1523_v33 = vcombine.high %v1515_v23, %v1515_v23  ;;  %v7832_v46 = vld [vmem:[%s8227_s22 + $0xb00] sm:$0xff]  }
 0x17f   : > { %v8633_v50 = vadd.f32 %v6822_v45, %v4986_v44  ;;  %7103 = vmatpush3.bf16.msra.mxu0 %v7791_v35  ;;  %v7828_v35 = vld [vmem:[%s8227_s22 + $0xa38] sm:$0xff]   ;;  %v1524_v43 = vcombine.high %v8673_v36, %v8673_v36  ;;  %v7831_v45 = vld [vmem:[%s8227_s22 + $0xbc0] sm:$0xff]  }
 0x180   : > { %7104 = vmatprep.subr.bf16.mxu0 %v7793_v40  ;;  %v1531_v40 = vrot.slane %v1515_v23, %v8283_v42  ;;  %v7833_v48 = vld [vmem:[%s8227_s22 + $0xb80] sm:$0xff]  }
 0x181   : > { %7125 = vmatpush3.bf16.msra.mxu1 %v7792_v39  ;;  %v1545_v39 = vrot.slane %v1523_v33, %v8283_v42  ;;  %v7867_v33 = vld [vmem:[%s8227_s22 + $0xc48] sm:$0xff]  }
 0x182   : > { %7126 = vmatprep.subr.bf16.mxu1 %v7794_v47  ;;  %v1552_v47 = vrot.slane %v1524_v43, %v8283_v42  ;;  %v7876_v43 = vld [vmem:[%s8227_s22 + $0xcd8] sm:$0xff]  }
 0x183   : > { %7105 = vmatpush3.bf16.msra.mxu0 %v7795_v49  ;;  %v1555_v44 = vcombine.high %v1545_v39, %v1545_v39  ;;  %v1553_v49 = vcombine.high %v1531_v40, %v1531_v40 }
 0x184   : > { %7134 = vmatprep.subr.bf16.mxu0 %v7798_v53  ;;  %v7836_v53 = vld [vmem:[%s8227_s22 + $0xb08] sm:$0xff]  }
 0x185   : > { %7127 = vmatpush3.bf16.msra.mxu1 %v7796_v51  ;;  %v7835_v51 = vld [vmem:[%s8227_s22 + $0xbc8] sm:$0xff]  }
 0x186   : > { %5544 = vmatmul.mubr.bf16.vlgmr.msra.gmra.mrb[36].mxu0 %v1489_v52  ;;  %7156 = vmatprep.subr.bf16.mxu1 %v7799_v54  ;;  %v1556_v52 = vcombine.high %v1552_v47, %v1552_v47  ;;  %v7837_v54 = vld [vmem:[%s8227_s22 + $0xb88] sm:$0xff]  }
 0x187   : > { %7135 = vmatpush3.bf16.msra.mxu0 %v7800_v56  ;;  %5623 = vmatprep.mubr.bf16.mxu0 %v1545_v39  ;;  %v7838_v56 = vld [vmem:[%s8227_s22 + $0xb50] sm:$0xff]  }
 0x188   : > { %5584 = vmatmul.mubr.bf16.vlgmr.msra.gmra.mrb[36].mxu1 %v1505_v58  ;;  %7136 = vmatprep.subr.bf16.mxu0 %v7802_v59  ;;  %v7840_v58 = vld [vmem:[%s8227_s22 + $0xb10] sm:$0xff]  }
 0x189   : > { %7157 = vmatpush3.bf16.msra.mxu1 %v7801_v57  ;;  %5663 = vmatprep.mubr.bf16.mxu1 %v1555_v44  ;;  %v7839_v57 = vld [vmem:[%s8227_s22 + $0xbd0] sm:$0xff]   ;;  %v7877_v44 = vld [vmem:[%s8227_s22 + $0xc18] sm:$0xff]  }
 0x18a   : > { %7158 = vmatprep.subr.bf16.mxu1 %v7803_v60  ;;  %v7841_v59 = vld [vmem:[%s8227_s22 + $0xb90] sm:$0xff]   ;;  %v7842_v60 = vld [vmem:[%s8227_s22 + $0xb58] sm:$0xff]  }
 0x18b   : > { %7137 = vmatpush3.bf16.msra.mxu0 %v7804_v55  ;;  %v7843_v55 = vld [vmem:[%s8227_s22 + $0xbd8] sm:$0xff]   ;;  %v7873_v39 = vld [vmem:[%s8227_s22 + $0xc10] sm:$0xff]  }
 0x18c   : > { %7138 = vmatprep.subr.bf16.mxu0 %v7806_v62  ;;  %v7845_v62 = vld [vmem:[%s8227_s22 + $0xb98] sm:$0xff]  }
 0x18d   : > { %7159 = vmatpush3.bf16.msra.mxu1 %v7805_v61  ;;  %v7844_v61 = vld [vmem:[%s8227_s22 + $0xb18] sm:$0xff]  }
 0x18e   : > { %7160 = vmatprep.subr.bf16.mxu1 %v7807_v63  ;;  %v7846_v63 = vld [vmem:[%s8227_s22 + $0xb60] sm:$0xff]  }
 0x18f   : > { %7139 = vmatpush3.bf16.msra.mxu0 %v7808_v0  ;;  %v7847_v0 = vld [vmem:[%s8227_s22 + $0xbe0] sm:$0xff]  }
 0x190   : > { %7140 = vmatprep.subr.bf16.mxu0 %v7810_v2  ;;  %v7849_v2 = vld [vmem:[%s8227_s22 + $0xba0] sm:$0xff]  }
 0x191   : > { %7161 = vmatpush3.bf16.msra.mxu1 %v7809_v1  ;;  %v7848_v1 = vld [vmem:[%s8227_s22 + $0xb20] sm:$0xff]  }
 0x192   : > { %7162 = vmatprep.subr.bf16.mxu1 %v7811_v3  ;;  %v7850_v3 = vld [vmem:[%s8227_s22 + $0xb68] sm:$0xff]  }
 0x193   : > { %7141 = vmatpush3.bf16.msra.mxu0 %v7812_v4  ;;  %v7851_v4 = vld [vmem:[%s8227_s22 + $0xbe8] sm:$0xff]  }
 0x194   : > { %7142 = vmatprep.subr.bf16.mxu0 %v7814_v6  ;;  %v7853_v6 = vld [vmem:[%s8227_s22 + $0xba8] sm:$0xff]  }
 0x195   : > { %7163 = vmatpush3.bf16.msra.mxu1 %v7813_v5  ;;  %v7852_v5 = vld [vmem:[%s8227_s22 + $0xb28] sm:$0xff]  }
 0x196   : > { %7164 = vmatprep.subr.bf16.mxu1 %v7815_v7  ;;  %v7854_v7 = vld [vmem:[%s8227_s22 + $0xb70] sm:$0xff]  }
 0x197   : > { %7143 = vmatpush3.bf16.msra.mxu0 %v7816_v8 }
 0x198   : > { %7144 = vmatprep.subr.bf16.mxu0 %v7818_v10 }
 0x199   : > { %7165 = vmatpush3.bf16.msra.mxu1 %v7817_v9  ;;  %v6842_v15 = vpop.f32.mrb[12].mxu0  ;;  %v7855_v9 = vld [vmem:[%s8227_s22 + $0xbf0] sm:$0xff]  }
 0x19a   : > { %v6843_v17 = vpop.f32.mrb[13].mxu0  ;;  %7166 = vmatprep.subr.bf16.mxu1 %v7819_v11  ;;  %v7856_v11 = vld [vmem:[%s8227_s22 + $0xb30] sm:$0xff]  }
 0x19b   : > { %v6864_v20 = vpop.f32.mrb[12].mxu1  ;;  %v6844_v21 = vadd.f32 %v6843_v17, %v6842_v15  ;;  %v6845_v22 = vpop.f32.mrb[14].mxu0  ;;  %7145 = vmatpush3.bf16.msra.mxu0 %v7820_v12  ;;  %v7857_v15 = vld [vmem:[%s8227_s22 + $0xbb0] sm:$0xff]  }
 0x19c   : > { %v6865_v25 = vpop.f32.mrb[13].mxu1  ;;  %v6846_v26 = vpop.f32.mrb[15].mxu0  ;;  %7146 = vmatprep.subr.bf16.mxu0 %v7822_v14  ;;  %v7859_v22 = vld [vmem:[%s8227_s22 + $0xbf8] sm:$0xff]  }
 0x19d   : > { %v5066_v29 = vadd.f32 %v6844_v21, %v8633_v50  ;;  %v6866_v30 = vadd.f32 %v6865_v25, %v6864_v20  ;;  %v6867_v31 = vpop.f32.mrb[14].mxu1  ;;  %7167 = vmatpush3.bf16.msra.mxu1 %v7821_v13  ;;  %v7834_v50 = vld [vmem:[%s8227_s22 + $0xb48] sm:$0xff]   ;;  %v7861_v26 = vld [vmem:[%s8227_s22 + $0xbb8] sm:$0xff]  }
 0x19e   : > { %v6868_v34 = vpop.f32.mrb[15].mxu1  ;;  %7168 = vmatprep.subr.bf16.mxu1 %v7823_v16  ;;  %v7858_v16 = vld [vmem:[%s8227_s22 + $0xb78] sm:$0xff]   ;;  %v7866_v31 = vld [vmem:[%s8227_s22 + $0xc80] sm:$0xff]  }
 0x19f   : > { %v8675_v37 = vadd.f32 %v6866_v30, %v5066_v29  ;;  %7147 = vmatpush3.bf16.msra.mxu0 %v7824_v18  ;;  %v7864_v29 = vld [vmem:[%s8227_s22 + $0xcc0] sm:$0xff]   ;;  %v7868_v34 = vld [vmem:[%s8227_s22 + $0xcc8] sm:$0xff]  }
 0x1a0   : > { %7148 = vmatprep.subr.bf16.mxu0 %v7826_v28  ;;  %v7863_v28 = vld [vmem:[%s8227_s22 + $0xc40] sm:$0xff]  }
 0x1a1   : > { %7169 = vmatpush3.bf16.msra.mxu1 %v7825_v27  ;;  %v1538_v27 = vrot.slane %v8673_v36, %v8283_v42  ;;  %v7865_v30 = vld [vmem:[%s8227_s22 + $0xc00] sm:$0xff]   ;;  %v7870_v36 = vld [vmem:[%s8227_s22 + $0xc88] sm:$0xff]  }
 0x1a2   : > { %7170 = vmatprep.subr.bf16.mxu1 %v7827_v32 }
 0x1a3   : > { %7149 = vmatpush3.bf16.msra.mxu0 %v7828_v35  ;;  %v1554_v32 = vcombine.high %v1538_v27, %v1538_v27  ;;  %v7869_v35 = vld [vmem:[%s8227_s22 + $0xc08] sm:$0xff]  }
 0x1a4   : > { %7178 = vmatprep.subr.bf16.mxu0 %v7830_v41  ;;  %v7875_v41 = vld [vmem:[%s8227_s22 + $0xc58] sm:$0xff]  }
 0x1a5   : > { %7171 = vmatpush3.bf16.msra.mxu1 %v7829_v38  ;;  %v7872_v38 = vld [vmem:[%s8227_s22 + $0xcd0] sm:$0xff]  }
 0x1a6   : > { %5624 = vmatmul.mubr.bf16.vlgmr.msra.gmra.mrb[40].mxu0 %v1531_v40  ;;  %7200 = vmatprep.subr.bf16.mxu1 %v7831_v45  ;;  %v7874_v40 = vld [vmem:[%s8227_s22 + $0xc90] sm:$0xff]   ;;  %v7878_v45 = vld [vmem:[%s8227_s22 + $0xc98] sm:$0xff]  }
 0x1a7   : > { %7179 = vmatpush3.bf16.msra.mxu0 %v7832_v46  ;;  %5703 = vmatprep.mubr.bf16.mxu0 %v1552_v47  ;;  %v7879_v46 = vld [vmem:[%s8227_s22 + $0xc60] sm:$0xff]  }
 0x1a8   : > { %5664 = vmatmul.mubr.bf16.vlgmr.msra.gmra.mrb[40].mxu1 %v1553_v49  ;;  %7180 = vmatprep.subr.bf16.mxu0 %v7834_v50  ;;  %v7880_v47 = vld [vmem:[%s8227_s22 + $0xce0] sm:$0xff]   ;;  %v7883_v50 = vld [vmem:[%s8227_s22 + $0xc68] sm:$0xff]  }
 0x1a9   : > { %7201 = vmatpush3.bf16.msra.mxu1 %v7833_v48  ;;  %5743 = vmatprep.mubr.bf16.mxu1 %v1556_v52  ;;  %v7881_v48 = vld [vmem:[%s8227_s22 + $0xc20] sm:$0xff]   ;;  %v7885_v52 = vld [vmem:[%s8227_s22 + $0xc28] sm:$0xff]  }
 0x1aa   : > { %7202 = vmatprep.subr.bf16.mxu1 %v7835_v51  ;;  %v7882_v49 = vld [vmem:[%s8227_s22 + $0xca0] sm:$0xff]   ;;  %v7884_v51 = vld [vmem:[%s8227_s22 + $0xce8] sm:$0xff]  }
 0x1ab   : > { %7181 = vmatpush3.bf16.msra.mxu0 %v7836_v53  ;;  %v7886_v53 = vld [vmem:[%s8227_s22 + $0xca8] sm:$0xff]  }
 0x1ac   : > { %7182 = vmatprep.subr.bf16.mxu0 %v7838_v56 }
 0x1ad   : > { %7203 = vmatpush3.bf16.msra.mxu1 %v7837_v54  ;;  %v7887_v54 = vld [vmem:[%s8227_s22 + $0xc70] sm:$0xff]  }
 0x1ae   : > { %7204 = vmatprep.subr.bf16.mxu1 %v7839_v57  ;;  %v7888_v57 = vld [vmem:[%s8227_s22 + $0xcf0] sm:$0xff]  }
 0x1af   : > { %7183 = vmatpush3.bf16.msra.mxu0 %v7840_v58 }
 0x1b0   : > { %7184 = vmatprep.subr.bf16.mxu0 %v7842_v60 }
 0x1b1   : > { %7205 = vmatpush3.bf16.msra.mxu1 %v7841_v59  ;;  %v7889_v59 = vld [vmem:[%s8227_s22 + $0xc30] sm:$0xff]  }
 0x1b2   : > { %7206 = vmatprep.subr.bf16.mxu1 %v7843_v55 }
 0x1b3   : > { %7185 = vmatpush3.bf16.msra.mxu0 %v7844_v61 }
 0x1b4   : > { %7186 = vmatprep.subr.bf16.mxu0 %v7846_v63  ;;  %v7891_v63 = vld [vmem:[%s8227_s22 + $0xc78] sm:$0xff]  }
 0x1b5   : > { %7207 = vmatpush3.bf16.msra.mxu1 %v7845_v62  ;;  %v7890_v62 = vld [vmem:[%s8227_s22 + $0xcb0] sm:$0xff]  }
 0x1b6   : > { %7208 = vmatprep.subr.bf16.mxu1 %v7847_v0  ;;  %v229_v0 = vld [vmem:[%s8240_s27 + $0x30] sm:$0xff] }
 0x1b7   : > { %7187 = vmatpush3.bf16.msra.mxu0 %v7848_v1 }
 0x1b8   : > { %7188 = vmatprep.subr.bf16.mxu0 %v7850_v3  ;;  %v1564_v3 = vrot.slane %v229_v0, %v8283_v42 }
 0x1b9   : > { %7209 = vmatpush3.bf16.msra.mxu1 %v7849_v2  ;;  %v6886_v8 = vpop.f32.mrb[16].mxu0 }
 0x1ba   : > { %v6887_v10 = vpop.f32.mrb[17].mxu0  ;;  %7210 = vmatprep.subr.bf16.mxu1 %v7851_v4  ;;  %v1557_v4 = vcombine.high %v229_v0, %v229_v0  ;;  %v7925_v0 = vld [vmem:[%s8227_s22 + $0xd38] sm:$0xff]  }
 0x1bb   : > { %v6908_v12 = vpop.f32.mrb[16].mxu1  ;;  %v6888_v13 = vadd.f32 %v6887_v10, %v6886_v8  ;;  %v6889_v14 = vpop.f32.mrb[18].mxu0  ;;  %7189 = vmatpush3.bf16.msra.mxu0 %v7852_v5  ;;  %v7892_v8 = vld [vmem:[%s8227_s22 + $0xcf8] sm:$0xff]  }
 0x1bc   : > { %v6909_v17 = vpop.f32.mrb[17].mxu1  ;;  %v6890_v18 = vpop.f32.mrb[19].mxu0  ;;  %7190 = vmatprep.subr.bf16.mxu0 %v7854_v7  ;;  %v7893_v10 = vld [vmem:[%s8227_s22 + $0xc38] sm:$0xff]  }
 0x1bd   : > { %v5146_v19 = vadd.f32 %v6888_v13, %v8675_v37  ;;  %v6910_v20 = vadd.f32 %v6909_v17, %v6908_v12  ;;  %v6911_v21 = vpop.f32.mrb[18].mxu1  ;;  %7211 = vmatpush3.bf16.msra.mxu1 %v7853_v6  ;;  %v7871_v37 = vld [vmem:[%s8227_s22 + $0xc50] sm:$0xff]   ;;  %v8755_v12 = vrot.slane %v1557_v4, %v8283_v42  ;;  %v7894_v14 = vld [vmem:[%s8227_s22 + $0xcb8] sm:$0xff]   ;;  %v7895_v17 = vld [vmem:[%s8227_s22 + $0xd40] sm:$0xff]  }
 0x1be   : > { %v6912_v23 = vpop.f32.mrb[19].mxu1  ;;  %7212 = vmatprep.subr.bf16.mxu1 %v7855_v9  ;;  %v7897_v21 = vld [vmem:[%s8227_s22 + $0xd00] sm:$0xff]  }
 0x1bf   : > { %v8715_v25 = vadd.f32 %v6910_v20, %v5146_v19  ;;  %7191 = vmatpush3.bf16.msra.mxu0 %v7856_v11  ;;  %v1572_v11 = vcombine.high %v1564_v3, %v1564_v3  ;;  %v1573_v18 = vcombine.high %v8755_v12, %v8755_v12  ;;  %v7896_v19 = vld [vmem:[%s8227_s22 + $0xdc0] sm:$0xff]  }
 0x1c0   : > { %7192 = vmatprep.subr.bf16.mxu0 %v7858_v16  ;;  %v1580_v16 = vrot.slane %v1564_v3, %v8283_v42  ;;  %v7898_v23 = vld [vmem:[%s8227_s22 + $0xd80] sm:$0xff]   ;;  %v1587_v3 = vrot.slane %v8755_v12, %v8283_v42  ;;  %v7935_v12 = vld [vmem:[%s8227_s22 + $0xe88] sm:$0xff]  }
 0x1c1   : > { %7213 = vmatpush3.bf16.msra.mxu1 %v7857_v15  ;;  %v1594_v15 = vrot.slane %v1572_v11, %v8283_v42  ;;  %v7928_v4 = vld [vmem:[%s8227_s22 + $0xe40] sm:$0xff]   ;;  %v7934_v11 = vld [vmem:[%s8227_s22 + $0xe08] sm:$0xff]  }
 0x1c2   : > { %7214 = vmatprep.subr.bf16.mxu1 %v7859_v22  ;;  %v1601_v22 = vrot.slane %v1573_v18, %v8283_v42  ;;  %v7941_v18 = vld [vmem:[%s8227_s22 + $0xed8] sm:$0xff]  }
 0x1c3   : > { %7193 = vmatpush3.bf16.msra.mxu0 %v7860_v24  ;;  %v1604_v20 = vcombine.high %v1594_v15, %v1594_v15  ;;  %v1602_v24 = vcombine.high %v1580_v16, %v1580_v16 }
 0x1c4   : > { %7222 = vmatprep.subr.bf16.mxu0 %v7863_v28  ;;  %v7901_v28 = vld [vmem:[%s8227_s22 + $0xd08] sm:$0xff]  }
 0x1c5   : > { %7215 = vmatpush3.bf16.msra.mxu1 %v7861_v26  ;;  %v7900_v26 = vld [vmem:[%s8227_s22 + $0xdc8] sm:$0xff]  }
 0x1c6   : > { %5704 = vmatmul.mubr.bf16.vlgmr.msra.gmra.mrb[44].mxu0 %v1538_v27  ;;  %7244 = vmatprep.subr.bf16.mxu1 %v7864_v29  ;;  %v1605_v27 = vcombine.high %v1601_v22, %v1601_v22  ;;  %v7902_v29 = vld [vmem:[%s8227_s22 + $0xd88] sm:$0xff]  }
 0x1c7   : > { %7223 = vmatpush3.bf16.msra.mxu0 %v7865_v30  ;;  %5783 = vmatprep.mubr.bf16.mxu0 %v1594_v15  ;;  %v7903_v30 = vld [vmem:[%s8227_s22 + $0xd50] sm:$0xff]  }
 0x1c8   : > { %5744 = vmatmul.mubr.bf16.vlgmr.msra.gmra.mrb[44].mxu1 %v1554_v32  ;;  %7224 = vmatprep.subr.bf16.mxu0 %v7867_v33  ;;  %v7905_v32 = vld [vmem:[%s8227_s22 + $0xd10] sm:$0xff]  }
 0x1c9   : > { %7245 = vmatpush3.bf16.msra.mxu1 %v7866_v31  ;;  %5823 = vmatprep.mubr.bf16.mxu1 %v1604_v20  ;;  %v7904_v31 = vld [vmem:[%s8227_s22 + $0xdd0] sm:$0xff]   ;;  %v7943_v20 = vld [vmem:[%s8227_s22 + $0xe98] sm:$0xff]  }
 0x1ca   : > { %7246 = vmatprep.subr.bf16.mxu1 %v7868_v34  ;;  %v7906_v33 = vld [vmem:[%s8227_s22 + $0xd90] sm:$0xff]   ;;  %v7907_v34 = vld [vmem:[%s8227_s22 + $0xd58] sm:$0xff]  }
 0x1cb   : > { %7225 = vmatpush3.bf16.msra.mxu0 %v7869_v35  ;;  %v7908_v35 = vld [vmem:[%s8227_s22 + $0xdd8] sm:$0xff]   ;;  %v7938_v15 = vld [vmem:[%s8227_s22 + $0xe10] sm:$0xff]  }
 0x1cc   : > { %7226 = vmatprep.subr.bf16.mxu0 %v7871_v37  ;;  %v7910_v37 = vld [vmem:[%s8227_s22 + $0xd98] sm:$0xff]  }
 0x1cd   : > { %7247 = vmatpush3.bf16.msra.mxu1 %v7870_v36  ;;  %v7909_v36 = vld [vmem:[%s8227_s22 + $0xd18] sm:$0xff]  }
 0x1ce   : > { %7248 = vmatprep.subr.bf16.mxu1 %v7872_v38  ;;  %v7911_v38 = vld [vmem:[%s8227_s22 + $0xd60] sm:$0xff]  }
 0x1cf   : > { %7227 = vmatpush3.bf16.msra.mxu0 %v7873_v39  ;;  %v7912_v39 = vld [vmem:[%s8227_s22 + $0xde0] sm:$0xff]  }
 0x1d0   : > { %7228 = vmatprep.subr.bf16.mxu0 %v7875_v41  ;;  %v7914_v41 = vld [vmem:[%s8227_s22 + $0xda0] sm:$0xff]  }
 0x1d1   : > { %7249 = vmatpush3.bf16.msra.mxu1 %v7874_v40  ;;  %v7913_v40 = vld [vmem:[%s8227_s22 + $0xd20] sm:$0xff]  }
 0x1d2   : > { %7250 = vmatprep.subr.bf16.mxu1 %v7876_v43  ;;  %v7915_v43 = vld [vmem:[%s8227_s22 + $0xd68] sm:$0xff]  }
 0x1d3   : > { %7229 = vmatpush3.bf16.msra.mxu0 %v7877_v44  ;;  %v7916_v44 = vld [vmem:[%s8227_s22 + $0xde8] sm:$0xff]  }
 0x1d4   : > { %7230 = vmatprep.subr.bf16.mxu0 %v7879_v46  ;;  %v7918_v46 = vld [vmem:[%s8227_s22 + $0xda8] sm:$0xff]  }
 0x1d5   : > { %7251 = vmatpush3.bf16.msra.mxu1 %v7878_v45  ;;  %v7917_v45 = vld [vmem:[%s8227_s22 + $0xd28] sm:$0xff]  }
 0x1d6   : > { %7252 = vmatprep.subr.bf16.mxu1 %v7880_v47  ;;  %v7919_v47 = vld [vmem:[%s8227_s22 + $0xd70] sm:$0xff]  }
 0x1d7   : > { %7231 = vmatpush3.bf16.msra.mxu0 %v7881_v48 }
 0x1d8   : > { %7232 = vmatprep.subr.bf16.mxu0 %v7883_v50 }
 0x1d9   : > { %7253 = vmatpush3.bf16.msra.mxu1 %v7882_v49  ;;  %v6930_v56 = vpop.f32.mrb[20].mxu0  ;;  %v7920_v49 = vld [vmem:[%s8227_s22 + $0xdf0] sm:$0xff]  }
 0x1da   : > { %v6931_v58 = vpop.f32.mrb[21].mxu0  ;;  %7254 = vmatprep.subr.bf16.mxu1 %v7884_v51  ;;  %v7921_v51 = vld [vmem:[%s8227_s22 + $0xd30] sm:$0xff]  }
 0x1db   : > { %v6952_v60 = vpop.f32.mrb[20].mxu1  ;;  %v6932_v55 = vadd.f32 %v6931_v58, %v6930_v56  ;;  %v6933_v61 = vpop.f32.mrb[22].mxu0  ;;  %7233 = vmatpush3.bf16.msra.mxu0 %v7885_v52  ;;  %v7922_v56 = vld [vmem:[%s8227_s22 + $0xdb0] sm:$0xff]  }
 0x1dc   : > { %v6953_v1 = vpop.f32.mrb[21].mxu1  ;;  %v6934_v2 = vpop.f32.mrb[23].mxu0  ;;  %7234 = vmatprep.subr.bf16.mxu0 %v7887_v54 }
 0x1dd   : > { %v5226_v5 = vadd.f32 %v6932_v55, %v8715_v25  ;;  %v6954_v6 = vadd.f32 %v6953_v1, %v6952_v60  ;;  %v6955_v7 = vpop.f32.mrb[22].mxu1  ;;  %7255 = vmatpush3.bf16.msra.mxu1 %v7886_v53  ;;  %v7899_v25 = vld [vmem:[%s8227_s22 + $0xd48] sm:$0xff]   ;;  %v7926_v2 = vld [vmem:[%s8227_s22 + $0xdb8] sm:$0xff]  }
 0x1de   : > { %v6956_v9 = vpop.f32.mrb[23].mxu1  ;;  %7256 = vmatprep.subr.bf16.mxu1 %v7888_v57  ;;  %v7923_v57 = vld [vmem:[%s8227_s22 + $0xd78] sm:$0xff]   ;;  %v7931_v7 = vld [vmem:[%s8227_s22 + $0xe80] sm:$0xff]  }
 0x1df   : > { %v8757_v13 = vadd.f32 %v6954_v6, %v5226_v5  ;;  %7235 = vmatpush3.bf16.msra.mxu0 %v7889_v59  ;;  %v7929_v5 = vld [vmem:[%s8227_s22 + $0xec0] sm:$0xff]   ;;  %v7932_v9 = vld [vmem:[%s8227_s22 + $0xe48] sm:$0xff]  }
 0x1e0   : > { %7236 = vmatprep.subr.bf16.mxu0 %v7891_v63  ;;  %v7930_v6 = vld [vmem:[%s8227_s22 + $0xe00] sm:$0xff]  }
 0x1e1   : > { %7257 = vmatpush3.bf16.msra.mxu1 %v7890_v62  ;;  %v7924_v62 = vld [vmem:[%s8227_s22 + $0xdf8] sm:$0xff]  }
 0x1e2   : > { %7258 = vmatprep.subr.bf16.mxu1 %v7892_v8  ;;  %v1603_v8 = vcombine.high %v1587_v3, %v1587_v3 }
 0x1e3   : > { %7237 = vmatpush3.bf16.msra.mxu0 %v7893_v10  ;;  %v7933_v10 = vld [vmem:[%s8227_s22 + $0xec8] sm:$0xff]  }
 0x1e4   : > { %7266 = vmatprep.subr.bf16.mxu0 %v7895_v17  ;;  %v7940_v17 = vld [vmem:[%s8227_s22 + $0xe58] sm:$0xff]  }
 0x1e5   : > { %7259 = vmatpush3.bf16.msra.mxu1 %v7894_v14  ;;  %v7937_v14 = vld [vmem:[%s8227_s22 + $0xed0] sm:$0xff]  }
 0x1e6   : > { %5784 = vmatmul.mubr.bf16.vlgmr.msra.gmra.mrb[48].mxu0 %v1580_v16  ;;  %7288 = vmatprep.subr.bf16.mxu1 %v7896_v19  ;;  %v7939_v16 = vld [vmem:[%s8227_s22 + $0xe90] sm:$0xff]   ;;  %v7942_v19 = vld [vmem:[%s8227_s22 + $0xe18] sm:$0xff]  }
 0x1e7   : > { %7267 = vmatpush3.bf16.msra.mxu0 %v7897_v21  ;;  %5863 = vmatprep.mubr.bf16.mxu0 %v1601_v22  ;;  %v7944_v21 = vld [vmem:[%s8227_s22 + $0xe60] sm:$0xff]  }
 0x1e8   : > { %5824 = vmatmul.mubr.bf16.vlgmr.msra.gmra.mrb[48].mxu1 %v1602_v24  ;;  %7268 = vmatprep.subr.bf16.mxu0 %v7899_v25  ;;  %v7945_v22 = vld [vmem:[%s8227_s22 + $0xee0] sm:$0xff]   ;;  %v7948_v25 = vld [vmem:[%s8227_s22 + $0xe68] sm:$0xff]  }
 0x1e9   : > { %7289 = vmatpush3.bf16.msra.mxu1 %v7898_v23  ;;  %5903 = vmatprep.mubr.bf16.mxu1 %v1605_v27  ;;  %v7946_v23 = vld [vmem:[%s8227_s22 + $0xe20] sm:$0xff]   ;;  %v7950_v27 = vld [vmem:[%s8227_s22 + $0xe28] sm:$0xff]  }
 0x1ea   : > { %7290 = vmatprep.subr.bf16.mxu1 %v7900_v26  ;;  %v7947_v24 = vld [vmem:[%s8227_s22 + $0xea0] sm:$0xff]   ;;  %v7949_v26 = vld [vmem:[%s8227_s22 + $0xee8] sm:$0xff]  }
 0x1eb   : > { %7269 = vmatpush3.bf16.msra.mxu0 %v7901_v28  ;;  %v7951_v28 = vld [vmem:[%s8227_s22 + $0xea8] sm:$0xff]  }
 0x1ec   : > { %7270 = vmatprep.subr.bf16.mxu0 %v7903_v30 }
 0x1ed   : > { %7291 = vmatpush3.bf16.msra.mxu1 %v7902_v29  ;;  %v7952_v29 = vld [vmem:[%s8227_s22 + $0xe70] sm:$0xff]  }
 0x1ee   : > { %7292 = vmatprep.subr.bf16.mxu1 %v7904_v31  ;;  %v7953_v31 = vld [vmem:[%s8227_s22 + $0xef0] sm:$0xff]  }
 0x1ef   : > { %7271 = vmatpush3.bf16.msra.mxu0 %v7905_v32 }
 0x1f0   : > { %7272 = vmatprep.subr.bf16.mxu0 %v7907_v34 }
 0x1f1   : > { %7293 = vmatpush3.bf16.msra.mxu1 %v7906_v33  ;;  %v7954_v33 = vld [vmem:[%s8227_s22 + $0xe30] sm:$0xff]  }
 0x1f2   : > { %7294 = vmatprep.subr.bf16.mxu1 %v7908_v35 }
 0x1f3   : > { %7273 = vmatpush3.bf16.msra.mxu0 %v7909_v36 }
 0x1f4   : > { %7274 = vmatprep.subr.bf16.mxu0 %v7911_v38  ;;  %v7956_v38 = vld [vmem:[%s8227_s22 + $0xe78] sm:$0xff]  }
 0x1f5   : > { %7295 = vmatpush3.bf16.msra.mxu1 %v7910_v37  ;;  %v7955_v37 = vld [vmem:[%s8227_s22 + $0xeb0] sm:$0xff]  }
 0x1f6   : > { %7296 = vmatprep.subr.bf16.mxu1 %v7912_v39 }
 0x1f7   : > { %7275 = vmatpush3.bf16.msra.mxu0 %v7913_v40 }
 0x1f8   : > { %7276 = vmatprep.subr.bf16.mxu0 %v7915_v43 }
 0x1f9   : > { %7297 = vmatpush3.bf16.msra.mxu1 %v7914_v41  ;;  %v6974_v48 = vpop.f32.mrb[24].mxu0 }
 0x1fa   : > { %v6975_v50 = vpop.f32.mrb[25].mxu0  ;;  %7298 = vmatprep.subr.bf16.mxu1 %v7916_v44 }
 0x1fb   : > { %v6996_v52 = vpop.f32.mrb[24].mxu1  ;;  %v6976_v53 = vadd.f32 %v6975_v50, %v6974_v48  ;;  %v6977_v54 = vpop.f32.mrb[26].mxu0  ;;  %7277 = vmatpush3.bf16.msra.mxu0 %v7917_v45  ;;  %v230_v45 = vld [vmem:[%s8240_s27 + $0x38] sm:$0xff] }
 0x1fc   : > { %v6997_v58 = vpop.f32.mrb[25].mxu1  ;;  %v6978_v59 = vpop.f32.mrb[27].mxu0  ;;  %7278 = vmatprep.subr.bf16.mxu0 %v7919_v47  ;;  %v7957_v47 = vld [vmem:[%s8227_s22 + $0xef8] sm:$0xff]   ;;  %v1613_v48 = vrot.slane %v230_v45, %v8283_v42  ;;  %v7960_v54 = vld [vmem:[%s8227_s22 + $0xf40] sm:$0xff]  }
 0x1fd   : > { %v5306_v60 = vadd.f32 %v6976_v53, %v8757_v13  ;;  %v6998_v55 = vadd.f32 %v6997_v58, %v6996_v52  ;;  %v6999_v61 = vpop.f32.mrb[26].mxu1  ;;  %7299 = vmatpush3.bf16.msra.mxu1 %v7918_v46  ;;  %v7936_v13 = vld [vmem:[%s8227_s22 + $0xe50] sm:$0xff]   ;;  %v7961_v59 = vld [vmem:[%s8227_s22 + $0xfc0] sm:$0xff]  }
 0x1fe   : > { %v7000_v63 = vpop.f32.mrb[27].mxu1  ;;  %7300 = vmatprep.subr.bf16.mxu1 %v7920_v49  ;;  %v1606_v49 = vcombine.high %v230_v45, %v230_v45  ;;  %v1621_v52 = vcombine.high %v1613_v48, %v1613_v48  ;;  %v1629_v53 = vrot.slane %v1613_v48, %v8283_v42 }
 0x1ff   : > { %v8797_v1 = vadd.f32 %v6998_v55, %v5306_v60  ;;  %7279 = vmatpush3.bf16.msra.mxu0 %v7921_v51  ;;  %v7958_v51 = vld [vmem:[%s8227_s22 + $0xe38] sm:$0xff]   ;;  %v7962_v55 = vld [vmem:[%s8227_s22 + $0xf00] sm:$0xff]   ;;  %v7964_v63 = vld [vmem:[%s8227_s22 + $0xf48] sm:$0xff]  }
 0x200   : > { %7280 = vmatprep.subr.bf16.mxu0 %v7923_v57  ;;  %v7959_v57 = vld [vmem:[%s8227_s22 + $0xeb8] sm:$0xff]   ;;  %v1643_v58 = vrot.slane %v1621_v52, %v8283_v42 }
 0x201   : > { %7301 = vmatpush3.bf16.msra.mxu1 %v7922_v56  ;;  %v8841_v56 = vrot.slane %v1606_v49, %v8283_v42 }
 0x202   : > { %7302 = vmatprep.subr.bf16.mxu1 %v7924_v62  ;;  %v1653_v61 = vcombine.high %v1643_v58, %v1643_v58  ;;  %v1651_v62 = vcombine.high %v1629_v53, %v1629_v53 }
 0x203   : > { %7281 = vmatpush3.bf16.msra.mxu0 %v7925_v0  ;;  %v1622_v60 = vcombine.high %v8841_v56, %v8841_v56 }
 0x204   : > { %7310 = vmatprep.subr.bf16.mxu0 %v7928_v4  ;;  %v7966_v4 = vld [vmem:[%s8227_s22 + $0xf08] sm:$0xff]  }
 0x205   : > { %7303 = vmatpush3.bf16.msra.mxu1 %v7926_v2  ;;  %v1650_v0 = vrot.slane %v1622_v60, %v8283_v42  ;;  %v7965_v2 = vld [vmem:[%s8227_s22 + $0xfc8] sm:$0xff]  }
 0x206   : > { %5864 = vmatmul.mubr.bf16.vlgmr.msra.gmra.mrb[52].mxu0 %v1587_v3  ;;  %7332 = vmatprep.subr.bf16.mxu1 %v7929_v5  ;;  %v7968_v5 = vld [vmem:[%s8227_s22 + $0xf50] sm:$0xff]  }
 0x207   : > { %7311 = vmatpush3.bf16.msra.mxu0 %v7930_v6  ;;  %5943 = vmatprep.mubr.bf16.mxu0 %v1643_v58  ;;  %v1654_v3 = vcombine.high %v1650_v0, %v1650_v0  ;;  %v7967_v6 = vld [vmem:[%s8227_s22 + $0xf88] sm:$0xff]  }
 0x208   : > { %5904 = vmatmul.mubr.bf16.vlgmr.msra.gmra.mrb[52].mxu1 %v1603_v8  ;;  %7312 = vmatprep.subr.bf16.mxu0 %v7932_v9  ;;  %v7970_v8 = vld [vmem:[%s8227_s22 + $0xf10] sm:$0xff]   ;;  %v7972_v9 = vld [vmem:[%s8227_s22 + $0xf58] sm:$0xff]  }
 0x209   : > { %7333 = vmatpush3.bf16.msra.mxu1 %v7931_v7  ;;  %5983 = vmatprep.mubr.bf16.mxu1 %v1653_v61  ;;  %v7969_v7 = vld [vmem:[%s8227_s22 + $0xfd0] sm:$0xff]  }
 0x20a   : > { %7334 = vmatprep.subr.bf16.mxu1 %v7933_v10  ;;  %v7971_v10 = vld [vmem:[%s8227_s22 + $0xf90] sm:$0xff]  }
 0x20b   : > { %7313 = vmatpush3.bf16.msra.mxu0 %v7934_v11  ;;  %v7973_v11 = vld [vmem:[%s8227_s22 + $0xfd8] sm:$0xff]  }
 0x20c   : > { %7314 = vmatprep.subr.bf16.mxu0 %v7936_v13  ;;  %v7976_v13 = vld [vmem:[%s8227_s22 + $0xf60] sm:$0xff]  }
 0x20d   : > { %7335 = vmatpush3.bf16.msra.mxu1 %v7935_v12  ;;  %v7974_v12 = vld [vmem:[%s8227_s22 + $0xf18] sm:$0xff]  }
 0x20e   : > { %7336 = vmatprep.subr.bf16.mxu1 %v7937_v14  ;;  %v7975_v14 = vld [vmem:[%s8227_s22 + $0xf98] sm:$0xff]  }
 0x20f   : > { %7315 = vmatpush3.bf16.msra.mxu0 %v7938_v15  ;;  %v7977_v15 = vld [vmem:[%s8227_s22 + $0xfe0] sm:$0xff]  }
 0x210   : > { %7316 = vmatprep.subr.bf16.mxu0 %v7940_v17  ;;  %v7980_v17 = vld [vmem:[%s8227_s22 + $0xf68] sm:$0xff]  }
 0x211   : > { %7337 = vmatpush3.bf16.msra.mxu1 %v7939_v16  ;;  %v7978_v16 = vld [vmem:[%s8227_s22 + $0xf20] sm:$0xff]  }
 0x212   : > { %7338 = vmatprep.subr.bf16.mxu1 %v7941_v18  ;;  %v7979_v18 = vld [vmem:[%s8227_s22 + $0xfa0] sm:$0xff]  }
 0x213   : > { %7317 = vmatpush3.bf16.msra.mxu0 %v7942_v19  ;;  %v7981_v19 = vld [vmem:[%s8227_s22 + $0xfe8] sm:$0xff]  }
 0x214   : > { %7318 = vmatprep.subr.bf16.mxu0 %v7944_v21  ;;  %v7984_v21 = vld [vmem:[%s8227_s22 + $0xf70] sm:$0xff]  }
 0x215   : > { %7339 = vmatpush3.bf16.msra.mxu1 %v7943_v20  ;;  %v7982_v20 = vld [vmem:[%s8227_s22 + $0xf28] sm:$0xff]  }
 0x216   : > { %7340 = vmatprep.subr.bf16.mxu1 %v7945_v22 }
 0x217   : > { %7319 = vmatpush3.bf16.msra.mxu0 %v7946_v23  ;;  %v7983_v23 = vld [vmem:[%s8227_s22 + $0xfa8] sm:$0xff]  }
 0x218   : > { %7320 = vmatprep.subr.bf16.mxu0 %v7948_v25  ;;  %v7985_v25 = vld [vmem:[%s8227_s22 + $0xff0] sm:$0xff]  }
 0x219   : > { %7341 = vmatpush3.bf16.msra.mxu1 %v7947_v24  ;;  %v7018_v30 = vpop.f32.mrb[28].mxu0 }
 0x21a   : > { %v7019_v32 = vpop.f32.mrb[29].mxu0  ;;  %7342 = vmatprep.subr.bf16.mxu1 %v7949_v26 }
 0x21b   : > { %v7040_v34 = vpop.f32.mrb[28].mxu1  ;;  %v7020_v35 = vadd.f32 %v7019_v32, %v7018_v30  ;;  %v7021_v36 = vpop.f32.mrb[30].mxu0  ;;  %7321 = vmatpush3.bf16.msra.mxu0 %v7950_v27  ;;  %v7988_v30 = vld [vmem:[%s8227_s22 + $0xf78] sm:$0xff]  }
 0x21c   : > { %v7041_v39 = vpop.f32.mrb[29].mxu1  ;;  %v7022_v40 = vpop.f32.mrb[31].mxu0  ;;  %7322 = vmatprep.subr.bf16.mxu0 %v7952_v29  ;;  %v7986_v29 = vld [vmem:[%s8227_s22 + $0xf30] sm:$0xff]  }
 0x21d   : > { %v5386_v41 = vadd.f32 %v7020_v35, %v8797_v1  ;;  %v7042_v43 = vadd.f32 %v7041_v39, %v7040_v34  ;;  %v7043_v44 = vpop.f32.mrb[30].mxu1  ;;  %7343 = vmatpush3.bf16.msra.mxu1 %v7951_v28  ;;  %v7963_v1 = vld [vmem:[%s8227_s22 + $0xf80] sm:$0xff]   ;;  %v7987_v36 = vld [vmem:[%s8227_s22 + $0xfb0] sm:$0xff]   ;;  %v7990_v40 = vld [vmem:[%s8227_s22 + $0xf38] sm:$0xff]  }
 0x21e   : > { %v7044_v46 = vpop.f32.mrb[31].mxu1  ;;  %7344 = vmatprep.subr.bf16.mxu1 %v7953_v31 }
 0x21f   : > { %v8835_v50 = vadd.f32 %v7042_v43, %v5386_v41  ;;  %7323 = vmatpush3.bf16.msra.mxu0 %v7954_v33  ;;  %v1636_v41 = vrot.slane %v8841_v56, %v8283_v42  ;;  %v7991_v43 = vld [vmem:[%s8227_s22 + $0xfb8] sm:$0xff]  }
 0x220   : > { %7324 = vmatprep.subr.bf16.mxu0 %v7956_v38  ;;  %v7989_v38 = vld [vmem:[%s8227_s22 + $0xff8] sm:$0xff]  }
 0x221   : > { %7345 = vmatpush3.bf16.msra.mxu1 %v7955_v37  ;;  %v1652_v44 = vcombine.high %v1636_v41, %v1636_v41 }
 0x222   : > { %7346 = vmatprep.subr.bf16.mxu1 %v7957_v47 }
 0x223   : > { %7325 = vmatpush3.bf16.msra.mxu0 %v7958_v51 }
 0x224   : > { %7354 = vmatprep.subr.bf16.mxu0 %v7960_v54 }
 0x225   : > { %7347 = vmatpush3.bf16.msra.mxu1 %v7959_v57 }
 0x226   : > { %5944 = vmatmul.mubr.bf16.vlgmr.msra.gmra.mrb[56].mxu0 %v1629_v53  ;;  %7376 = vmatprep.subr.bf16.mxu1 %v7961_v59 }
 0x227   : > { %7355 = vmatpush3.bf16.msra.mxu0 %v7962_v55  ;;  %6023 = vmatprep.mubr.bf16.mxu0 %v1650_v0 }
 0x228   : > { %5984 = vmatmul.mubr.bf16.vlgmr.msra.gmra.mrb[56].mxu1 %v1651_v62  ;;  %7356 = vmatprep.subr.bf16.mxu0 %v7964_v63 }
 0x229   : > { %7377 = vmatpush3.bf16.msra.mxu1 %v7963_v1  ;;  %6063 = vmatprep.mubr.bf16.mxu1 %v1654_v3 }
 0x22a   : > { %7378 = vmatprep.subr.bf16.mxu1 %v7965_v2 }
 0x22b   : > { %7357 = vmatpush3.bf16.msra.mxu0 %v7966_v4 }
 0x22c   : > { %7358 = vmatprep.subr.bf16.mxu0 %v7968_v5 }
 0x22d   : > { %7379 = vmatpush3.bf16.msra.mxu1 %v7967_v6 }
 0x22e   : > { %7380 = vmatprep.subr.bf16.mxu1 %v7969_v7 }
 0x22f   : > { %7359 = vmatpush3.bf16.msra.mxu0 %v7970_v8 }
 0x230   : > { %7360 = vmatprep.subr.bf16.mxu0 %v7972_v9 }
 0x231   : > { %7381 = vmatpush3.bf16.msra.mxu1 %v7971_v10 }
 0x232   : > { %7382 = vmatprep.subr.bf16.mxu1 %v7973_v11 }
 0x233   : > { %7361 = vmatpush3.bf16.msra.mxu0 %v7974_v12 }
 0x234   : > { %7362 = vmatprep.subr.bf16.mxu0 %v7976_v13 }
 0x235   : > { %7383 = vmatpush3.bf16.msra.mxu1 %v7975_v14 }
 0x236   : > { %7384 = vmatprep.subr.bf16.mxu1 %v7977_v15 }
 0x237   : > { %7363 = vmatpush3.bf16.msra.mxu0 %v7978_v16 }
 0x238   : > { %7364 = vmatprep.subr.bf16.mxu0 %v7980_v17 }
 0x239   : > { %7385 = vmatpush3.bf16.msra.mxu1 %v7979_v18  ;;  %v7062_v22 = vpop.f32.mrb[32].mxu0 }
 0x23a   : > { %v7063_v24 = vpop.f32.mrb[33].mxu0  ;;  %7386 = vmatprep.subr.bf16.mxu1 %v7981_v19 }
 0x23b   : > { %v7084_v26 = vpop.f32.mrb[32].mxu1  ;;  %v7064_v27 = vadd.f32 %v7063_v24, %v7062_v22  ;;  %v7065_v28 = vpop.f32.mrb[34].mxu0  ;;  %7365 = vmatpush3.bf16.msra.mxu0 %v7982_v20 }
 0x23c   : > { %v7085_v31 = vpop.f32.mrb[33].mxu1  ;;  %v7066_v32 = vpop.f32.mrb[35].mxu0  ;;  %7366 = vmatprep.subr.bf16.mxu0 %v7984_v21 }
 0x23d   : > { %v5466_v33 = vadd.f32 %v7064_v27, %v8835_v50  ;;  %v7086_v34 = vadd.f32 %v7085_v31, %v7084_v26  ;;  %v7087_v35 = vpop.f32.mrb[34].mxu1  ;;  %7387 = vmatpush3.bf16.msra.mxu1 %v7983_v23 }
 0x23e   : > { %v7088_v37 = vpop.f32.mrb[35].mxu1  ;;  %7388 = vmatprep.subr.bf16.mxu1 %v7985_v25 }
 0x23f   : > { %v5506_v39 = vadd.f32 %v7086_v34, %v5466_v33  ;;  %7367 = vmatpush3.bf16.msra.mxu0 %v7986_v29 }
 0x240   : > { %7368 = vmatprep.subr.bf16.mxu0 %v7988_v30 }
 0x241   : > { %7389 = vmatpush3.bf16.msra.mxu1 %v7987_v36 }
 0x242   : > { %7390 = vmatprep.subr.bf16.mxu1 %v7989_v38 }
 0x243   : > { %7369 = vmatpush3.bf16.msra.mxu0 %v7990_v40 }
 0x245   : > { %7391 = vmatpush3.bf16.msra.mxu1 %v7991_v43 }
 0x246   : > { %6024 = vmatmul.mubr.bf16.vlgmr.msra.gmra.mrb[60].mxu0 %v1636_v41 }
 0x248   : > { %6064 = vmatmul.mubr.bf16.vlgmr.msra.gmra.mrb[60].mxu1 %v1652_v44 }
 0x259   : > { %v7106_v45 = vpop.f32.mrb[36].mxu0 }
 0x25a   : > { %v7107_v46 = vpop.f32.mrb[37].mxu0 }
 0x25b   : > { %v7128_v47 = vpop.f32.mrb[36].mxu1  ;;  %v7108_v48 = vadd.f32 %v7107_v46, %v7106_v45  ;;  %v7109_v49 = vpop.f32.mrb[38].mxu0 }
 0x25c   : > { %v7129_v50 = vpop.f32.mrb[37].mxu1  ;;  %v7110_v51 = vpop.f32.mrb[39].mxu0 }
 0x25d   : > { %v5546_v52 = vadd.f32 %v7108_v48, %v5506_v39  ;;  %v7130_v53 = vadd.f32 %v7129_v50, %v7128_v47  ;;  %v7131_v54 = vpop.f32.mrb[38].mxu1 }
 0x25e   : > { %v7132_v57 = vpop.f32.mrb[39].mxu1 }
 0x25f   : > { %v5586_v42 = vadd.f32 %v7130_v53, %v5546_v52 }
 0x279   : > { %v7150_v56 = vpop.f32.mrb[40].mxu0 }
 0x27a   : > { %v7151_v58 = vpop.f32.mrb[41].mxu0 }
 0x27b   : > { %v7172_v59 = vpop.f32.mrb[40].mxu1  ;;  %v7152_v60 = vadd.f32 %v7151_v58, %v7150_v56  ;;  %v7153_v55 = vpop.f32.mrb[42].mxu0 }
 0x27c   : > { %v7173_v61 = vpop.f32.mrb[41].mxu1  ;;  %v7154_v62 = vpop.f32.mrb[43].mxu0 }
 0x27d   : > { %v5626_v63 = vadd.f32 %v7152_v60, %v5586_v42  ;;  %v7174_v0 = vadd.f32 %v7173_v61, %v7172_v59  ;;  %v7175_v1 = vpop.f32.mrb[42].mxu1  ;;  %v222_v62 = vld [vmem:[#allocation2] sm:$0x3] }
 0x27e   : > { %v7176_v2 = vpop.f32.mrb[43].mxu1 }
 0x27f   : > { %v5666_v3 = vadd.f32 %v7174_v0, %v5626_v63 }
 0x299   : > { %v7194_v4 = vpop.f32.mrb[44].mxu0 }
 0x29a   : > { %v7195_v5 = vpop.f32.mrb[45].mxu0 }
 0x29b   : > { %v7216_v6 = vpop.f32.mrb[44].mxu1  ;;  %v7196_v7 = vadd.f32 %v7195_v5, %v7194_v4  ;;  %v7197_v8 = vpop.f32.mrb[46].mxu0 }
 0x29c   : > { %v7217_v9 = vpop.f32.mrb[45].mxu1  ;;  %v7198_v10 = vpop.f32.mrb[47].mxu0 }
 0x29d   : > { %v5706_v11 = vadd.f32 %v7196_v7, %v5666_v3  ;;  %v7218_v12 = vadd.f32 %v7217_v9, %v7216_v6  ;;  %v7219_v13 = vpop.f32.mrb[46].mxu1 }
 0x29e   : > { %v7220_v14 = vpop.f32.mrb[47].mxu1 }
 0x29f   : > { %v5746_v15 = vadd.f32 %v7218_v12, %v5706_v11 }
 0x2b9   : > { %v7238_v16 = vpop.f32.mrb[48].mxu0 }
 0x2ba   : > { %v7239_v17 = vpop.f32.mrb[49].mxu0 }
 0x2bb   : > { %v7260_v18 = vpop.f32.mrb[48].mxu1  ;;  %v7240_v19 = vadd.f32 %v7239_v17, %v7238_v16  ;;  %v7241_v20 = vpop.f32.mrb[50].mxu0 }
 0x2bc   : > { %v7261_v21 = vpop.f32.mrb[49].mxu1  ;;  %v7242_v22 = vpop.f32.mrb[51].mxu0 }
 0x2bd   : > { %v5786_v23 = vadd.f32 %v7240_v19, %v5746_v15  ;;  %v7262_v24 = vadd.f32 %v7261_v21, %v7260_v18  ;;  %v7263_v25 = vpop.f32.mrb[50].mxu1 }
 0x2be   : > { %v7264_v26 = vpop.f32.mrb[51].mxu1 }
 0x2bf   : > { %v5826_v27 = vadd.f32 %v7262_v24, %v5786_v23 }
 0x2d9   : > { %v7282_v28 = vpop.f32.mrb[52].mxu0 }
 0x2da   : > { %v7283_v29 = vpop.f32.mrb[53].mxu0 }
 0x2db   : > { %v7304_v30 = vpop.f32.mrb[52].mxu1  ;;  %v7284_v31 = vadd.f32 %v7283_v29, %v7282_v28  ;;  %v7285_v32 = vpop.f32.mrb[54].mxu0 }
 0x2dc   : > { %v7305_v33 = vpop.f32.mrb[53].mxu1  ;;  %v7286_v34 = vpop.f32.mrb[55].mxu0 }
 0x2dd   : > { %v5866_v35 = vadd.f32 %v7284_v31, %v5826_v27  ;;  %v7306_v36 = vadd.f32 %v7305_v33, %v7304_v30  ;;  %v7307_v37 = vpop.f32.mrb[54].mxu1 }
 0x2de   : > { %v7308_v38 = vpop.f32.mrb[55].mxu1 }
 0x2df   : > { %v5906_v39 = vadd.f32 %v7306_v36, %v5866_v35 }
 0x2f9   : > { %v7326_v40 = vpop.f32.mrb[56].mxu0 }
 0x2fa   : > { %v7327_v41 = vpop.f32.mrb[57].mxu0 }
 0x2fb   : > { %v7348_v43 = vpop.f32.mrb[56].mxu1  ;;  %v7328_v44 = vadd.f32 %v7327_v41, %v7326_v40  ;;  %v7329_v45 = vpop.f32.mrb[58].mxu0 }
 0x2fc   : > { %v7349_v46 = vpop.f32.mrb[57].mxu1  ;;  %v7330_v47 = vpop.f32.mrb[59].mxu0 }
 0x2fd   : > { %v5946_v48 = vadd.f32 %v7328_v44, %v5906_v39  ;;  %v7350_v49 = vadd.f32 %v7349_v46, %v7348_v43  ;;  %v7351_v50 = vpop.f32.mrb[58].mxu1 }
 0x2fe   : > { %v7352_v51 = vpop.f32.mrb[59].mxu1 }
 0x2ff   : > { %v5986_v52 = vadd.f32 %v7350_v49, %v5946_v48 }
 0x319   : > { %v7370_v53 = vpop.f32.mrb[60].mxu0 }
 0x31a   : > { %v7371_v54 = vpop.f32.mrb[61].mxu0 }
 0x31b   : > { %v7392_v57 = vpop.f32.mrb[60].mxu1  ;;  %v7372_v42 = vadd.f32 %v7371_v54, %v7370_v53  ;;  %v7373_v56 = vpop.f32.mrb[62].mxu0 }
 0x31c   : > { %v7393_v58 = vpop.f32.mrb[61].mxu1  ;;  %v7374_v59 = vpop.f32.mrb[63].mxu0 }
 0x31d   : > { %v6026_v60 = vadd.f32 %v7372_v42, %v5986_v52  ;;  %v7394_v55 = vadd.f32 %v7393_v58, %v7392_v57  ;;  %v7395_v61 = vpop.f32.mrb[62].mxu1  ;;  %6076 = sbr.rel (%p6690_p12) target bundleno = 812 (0x32c), region = 40 }
 0x31e   : > { %v7396_v63 = vpop.f32.mrb[63].mxu1 }
 0x31f   : > { %v6066_v0 = vadd.f32 %v7394_v55, %v6026_v60 }
 0x321   : > { %v6071_v1 = vadd.f32 %v6066_v0, %v222_v62 }
 0x323   : > { %6072 = vst [vmem:[#allocation2] sm:$0x3] %v6071_v1 }
 0x32a   : > { %v6077_v2 = vld [vmem:[#allocation2] sm:$0x3] }
 0x32b   : > { %6078 = vst [vmem:[%s8245_s28] sm:$0x3] %v6077_v2 }
 0x32c PF: > { %s15_s16 = sadd.s32 1, %s8089_s16   ;;  %s8916_s9 = smov %s8065_s10 }
 0x32d   : > { %p12_p8 = scmp.ge.s32.totalorder %s15_s16, 22   ;;  %s8917_s10 = smov %s8069_s11 }
 0x32e   : > { %s8918_s11 = smov %s8177_s5  ;;  %s8919_s12 = smov %s8081_s14 }
 0x32f   : > { %s8920_s13 = smov %s8085_s15  ;;  %s8921_s14 = smov %s8924_s18 }
 0x330   : > { %s8922_s15 = smov %s8928_s19  ;;  %14 = sbr.rel (!%p12_p8) target bundleno = 5 (0x5), region = 79 }
 0x337   :  { %6098 = vsyncpa [#allocation4], 1 }
 0x338   :  { %6100 = vsyncpa [#allocation4 + $0x1], 1 }

</bundles_post_ra>
